<compile_context>
chip_gen: v6e
topology: v6e:2x2x1
jax: 0.10.0
libtpu: 0.0.40
codegen_flags: <defaults>
</compile_context>

<pallas_src>
import functools

import jax
import jax.numpy as jnp
from jax import lax
from jax.experimental import pallas as pl
from jax.experimental.pallas import tpu as pltpu

EPS = 1e-8      # losses/dm_loss.py EPS
M_EPS = 1e-16   # DM-Count bregman_pytorch.M_EPS


def _dm_loss_kernel(xc_ref, yc_ref, xr_ref, yr_ref,
                    cxr_ref, cyr_ref, cxc_ref, cyc_ref,
                    pred_ref, tgt_ref, out_ref,
                    u_ref, v_ref, ktu_ref, act_ref, *,
                    num_points, reg, n_iters, stop_thr, eval_freq):
    # Per grid step (block of Bb images):
    #   xc/yc : (Bb, P, 1)   point coords, column (sublane) layout  -> K construction
    #   xr/yr : (Bb, 1, P)   point coords, row (lane) layout        -> Kt construction
    #   cxr/cyr : (1, 1, CC) flattened bin coords, row layout       -> K construction
    #   cxc/cyc : (1, CC, 1) flattened bin coords, column layout    -> Kt construction
    #   pred/tgt : (Bb, 1, CC) flattened densities (lane-dense)
    #   out_ref  : (Bb, 1, 128) lane 0 = OT contribution, 1 = TV*count, 2 = pred count
    P = num_points
    Bb = pred_ref.shape[0]
    CC = pred_ref.shape[2]

    xc = xc_ref[...]
    yc = yc_ref[...]
    xr = xr_ref[...]
    yr = yr_ref[...]
    cxr = cxr_ref[...]
    cyr = cyr_ref[...]
    cxc = cxc_ref[...]
    cyc = cyc_ref[...]
    pred = pred_ref[...]
    tgt = tgt_ref[...]

    neg_inv_reg = jnp.float32(-1.0 / reg)

    # ---- cost matrix (lane-dense over the C*C bins) and its transpose, both built
    #      directly from the coordinates: no transpose op anywhere, and both Sinkhorn
    #      contractions below are canonical (M,K)x(K,N) MXU matmuls.  K / Kt are bf16
    #      (MXU-native, halves the dominant VMEM resident); elementwise math stays f32.
    dist = (xc * xc + yc * yc) + (cxr * cxr + cyr * cyr) \
        - 2.0 * (xc * cxr + yc * cyr)                           # (Bb, P, CC) f32
    K = jnp.exp(dist * neg_inv_reg).astype(jnp.bfloat16)        # (Bb, P, CC)
    dist_t = (xr * xr + yr * yr) + (cxc * cxc + cyc * cyc) \
        - 2.0 * (cxc * xr + cyc * yr)                           # (Bb, CC, P) f32
    Kt = jnp.exp(dist_t * neg_inv_reg).astype(jnp.bfloat16)     # (Bb, CC, P)
    # TODO(synk): for very large P*C^2, chunk K/Kt over P (recompute per chunk,
    # accumulate KTu) to stay inside v7x's 64 MiB VMEM, or switch the m=1 matvecs to a
    # VPU broadcast-multiply-reduce formulation.

    # ---- marginals ----
    pred_count = jnp.sum(pred, axis=(1, 2), keepdims=True)      # (Bb, 1, 1)
    src_prob = pred / (pred_count + EPS)                         # (Bb, 1, CC) == "b"
    a_val = jnp.float32(1.0 / P)                                 # uniform target prob

    def recip(z):
        # EUP approx reciprocal + one Newton step (~f32 accurate, off the VALU/MXU path)
        r = pl.reciprocal(z, approx=True)
        return r * (2.0 - z * r)

    def mm_uK(u):    # (Bb,1,P) x (Bb,P,CC) -> (Bb,1,CC)   [u^T K]
        return jnp.einsum('bmp,bpc->bmc', u.astype(jnp.bfloat16), K,
                          preferred_element_type=jnp.float32)

    def mm_vKt(v):   # (Bb,1,CC) x (Bb,CC,P) -> (Bb,1,P)   [K v]
        return jnp.einsum('bmc,bcp->bmp', v.astype(jnp.bfloat16), Kt,
                          preferred_element_type=jnp.float32)

    def count_nonfinite(z):
        return jnp.sum(jnp.where(jnp.isfinite(z), 0.0, 1.0), axis=(1, 2), keepdims=True)

    # ---- Sinkhorn state lives in scratch so converged blocks can be skipped via pl.when
    u0 = jnp.full((Bb, 1, P), 1.0 / P, dtype=jnp.float32)
    v0 = jnp.full((Bb, 1, CC), 1.0 / CC, dtype=jnp.float32)
    u_ref[...] = u0
    v_ref[...] = v0
    ktu_ref[...] = mm_uK(u0)                       # invariant: ktu_ref == u_ref @ K
    act_ref[...] = jnp.ones((Bb, 1, 1), dtype=jnp.float32)

    def run_block(n_steps):
        # n_steps Sinkhorn iterations; the first reuses the carried KTu, and the
        # refreshed KTu (== u_new @ K) doubles as the b_hat matmul and the next block's
        # first contraction (saves 1 of 2*n_steps+1 matmuls per block).
        u = u_ref[...]
        v = v_ref[...]
        ktu_old = ktu_ref[...]
        v_n = src_prob * recip(ktu_old + M_EPS)
        u_n = a_val * recip(mm_vKt(v_n) + M_EPS)
        for _ in range(n_steps - 1):
            v_n = src_prob * recip(mm_uK(u_n) + M_EPS)
            u_n = a_val * recip(mm_vKt(v_n) + M_EPS)
        ktu_n = mm_uK(u_n)
        # nan/inf guard + convergence check once per block, per image.  (torch checks
        # nan every iteration and reverts one step; here a divergent image reverts to
        # the block start — identical in all non-degenerate runs.)
        bad = (count_nonfinite(u_n) + count_nonfinite(v_n)) > 0.0           # (Bb,1,1)
        take = jnp.logical_and(act_ref[...] > 0.5, jnp.logical_not(bad))
        b_hat = ktu_n * v_n
        err = jnp.sum((src_prob - b_hat) ** 2, axis=(1, 2), keepdims=True)
        u_ref[...] = jnp.where(take, u_n, u)
        v_ref[...] = jnp.where(take, v_n, v)
        ktu_ref[...] = jnp.where(take, ktu_n, ktu_old)
        act_ref[...] = jnp.where(jnp.logical_and(take, err > stop_thr), 1.0, 0.0)

    n_outer = n_iters // eval_freq
    n_tail = n_iters % eval_freq

    if n_outer > 0:                                # static
        def outer_body(_, carry):
            @pl.when(jnp.sum(act_ref[...]) > 0.5)  # skip whole blocks once converged
            def _():
                run_block(eval_freq)
            return carry
        lax.fori_loop(0, n_outer, outer_body, jnp.int32(0))

    if n_tail > 0:                                 # static
        @pl.when(jnp.sum(act_ref[...]) > 0.5)
        def _():
            run_block(n_tail)

    v_fin = v_ref[...]
    beta = reg * jnp.log(v_fin + M_EPS)            # dual potential over the bins (Bb,1,CC)

    # ---- OT gradient wrt pred density (detached in torch; forward value only here) ----
    src_count = pred_count
    denom = src_count * src_count + EPS
    grad1 = (src_count / denom) * beta
    grad2 = jnp.sum(pred * beta, axis=(1, 2), keepdims=True) / denom
    gradient = grad1 - grad2
    ot_contrib = jnp.sum(pred * gradient, axis=(1, 2), keepdims=True)      # (Bb,1,1)

    # ---- TV term: sum |normed_pred - normed_target| * target_count ----
    normed_tgt = tgt / (P + EPS)
    tv_term = jnp.sum(jnp.abs(src_prob - normed_tgt), axis=(1, 2), keepdims=True) * P

    # ---- single lane-dense packed store: lane 0 = ot, 1 = tv, 2 = pred_count ----
    lane = lax.broadcasted_iota(jnp.int32, (Bb, 1, out_ref.shape[2]), 2)
    out_ref[...] = jnp.where(lane == 0, ot_contrib,
                             jnp.where(lane == 1, tv_term,
                                       jnp.where(lane == 2, src_count, 0.0)))


def _pick_block_config(B, P, CC):
    """Pick (block_batch, padded_batch, vmem_limit_bytes) from the VMEM capacity of
    the current TPU generation (v5e/v6e: 128 MiB, v7x: 64 MiB / TensorCore)."""
    try:
        vmem_cap = int(pltpu.get_tpu_info().vmem_capacity_bytes)
    except Exception:            # query unavailable -> assume the smallest (v7x, 64 MiB)
        vmem_cap = 64 << 20
    vmem_limit = max(32 << 20, min(int(vmem_cap * 0.75), 112 << 20))

    # Per-image resident: K + Kt in bf16 + ~2x f32 construction temporaries, plus the
    # 8-sublane-padded CC rows (pred/tgt/src_prob/v/KTu/beta).
    per_img = 12 * P * CC + 256 * CC + (64 << 10)
    # Fixed overhead: double-buffered lane-padded (1, CC, 1) column coords, misc.
    fixed = (4 << 20) + 4 * CC * 128 * 4
    budget = max(per_img, vmem_limit - fixed)
    bb_max = max(1, budget // per_img)

    two_core = vmem_cap <= (72 << 20)    # v7x-class: 64 MiB VMEM, 2 TensorCores / chip
    if two_core and B >= 2:
        bb = min(bb_max, -(-B // 2))     # keep the grid length >= 2 so both cores work
    else:
        bb = min(bb_max, B)              # single TC: batch block as large as VMEM allows
    bb = max(1, int(bb))
    b_pad = -(-B // bb) * bb
    return bb, b_pad, int(vmem_limit)


def dm_loss(pred_density, target_density, points, *,
            input_size, reduction, norm_cood=False,
            weight_ot=0.1, weight_tv=0.01,
            num_of_iter_in_ot=100, regularization=10.0):
    pred_density = pred_density.astype(jnp.float32)
    target_density = target_density.astype(jnp.float32)
    points = points.astype(jnp.float32)

    B, ch, H, W = pred_density.shape
    assert ch == 1 and H == W
    C = H
    assert input_size % reduction == 0 and input_size // reduction == C
    P = points.shape[1]
    CC = C * C

    # _reshape_density: sum-pool the target to pred resolution if needed (glue).
    if target_density.shape[-2:] != pred_density.shape[-2:]:
        r = reduction
        Bt, _, Ht, Wt = target_density.shape
        target_density = target_density.reshape(Bt, 1, Ht // r, r, Wt // r, r).sum(axis=(3, 5))

    cood = jnp.arange(0, input_size, reduction, dtype=jnp.float32) + reduction / 2   # (C,)
    if norm_cood:
        cood = cood / input_size * 2.0 - 1.0
        points = points / input_size * 2.0 - 1.0

    # flattened per-bin coordinates, k = i*C + j (torch .view order): x <- cood[j], y <- cood[i]
    cood_x = jnp.tile(cood, C)                     # (CC,)
    cood_y = jnp.repeat(cood, C)                   # (CC,)
    cxr = cood_x.reshape(1, 1, CC)                 # row (lane) layout  -> K
    cyr = cood_y.reshape(1, 1, CC)
    cxc = cood_x.reshape(1, CC, 1)                 # column (sublane) layout -> Kt
    cyc = cood_y.reshape(1, CC, 1)
    # TODO(synk): for very large C (CC >= ~16K) regenerate the column-layout coords
    # in-kernel (iota) instead of shipping lane-padded (1, CC, 1) inputs.

    x_col = points[:, :, 0:1]                      # (B, P, 1)
    y_col = points[:, :, 1:2]
    x_row = points[:, :, 0].reshape(B, 1, P)       # (B, 1, P)
    y_row = points[:, :, 1].reshape(B, 1, P)
    pred_flat = pred_density.reshape(B, 1, CC)     # lane-dense flattened densities
    tgt_flat = target_density.reshape(B, 1, CC)

    Bb, B_pad, vmem_limit = _pick_block_config(B, P, CC)
    if B_pad > B:                                  # pad with dummy images, sliced off below
        def _pad(a):
            return jnp.concatenate(
                [a, jnp.zeros((B_pad - B,) + a.shape[1:], a.dtype)], axis=0)
        x_col, y_col, x_row, y_row, pred_flat, tgt_flat = map(
            _pad, (x_col, y_col, x_row, y_row, pred_flat, tgt_flat))
    grid = (B_pad // Bb,)
    OUT_LANES = 128                                # lane-dense, unmasked output store

    kernel = functools.partial(
        _dm_loss_kernel, num_points=P, reg=regularization,
        n_iters=num_of_iter_in_ot, stop_thr=1e-9, eval_freq=10)

    packed = pl.pallas_call(
        kernel,
        grid_spec=pltpu.PrefetchScalarGridSpec(
            num_scalar_prefetch=0,
            grid=grid,
            in_specs=[
                pl.BlockSpec((Bb, P, 1), lambda g: (g, 0, 0)),    # x (column layout)
                pl.BlockSpec((Bb, P, 1), lambda g: (g, 0, 0)),    # y (column layout)
                pl.BlockSpec((Bb, 1, P), lambda g: (g, 0, 0)),    # x (row layout)
                pl.BlockSpec((Bb, 1, P), lambda g: (g, 0, 0)),    # y (row layout)
                pl.BlockSpec((1, 1, CC), lambda g: (0, 0, 0)),    # bin x coords (row)
                pl.BlockSpec((1, 1, CC), lambda g: (0, 0, 0)),    # bin y coords (row)
                pl.BlockSpec((1, CC, 1), lambda g: (0, 0, 0)),    # bin x coords (column)
                pl.BlockSpec((1, CC, 1), lambda g: (0, 0, 0)),    # bin y coords (column)
                pl.BlockSpec((Bb, 1, CC), lambda g: (g, 0, 0)),   # pred density (flat)
                pl.BlockSpec((Bb, 1, CC), lambda g: (g, 0, 0)),   # target density (flat)
            ],
            out_specs=pl.BlockSpec((Bb, 1, OUT_LANES), lambda g: (g, 0, 0)),
            scratch_shapes=[
                pltpu.VMEM((Bb, 1, P), jnp.float32),     # u
                pltpu.VMEM((Bb, 1, CC), jnp.float32),    # v
                pltpu.VMEM((Bb, 1, CC), jnp.float32),    # carried KTu = u @ K
                pltpu.VMEM((Bb, 1, 1), jnp.float32),     # per-image "still active" flag
            ]),
        out_shape=jax.ShapeDtypeStruct((B_pad, 1, OUT_LANES), jnp.float32),
        compiler_params=pltpu.CompilerParams(
            dimension_semantics=("parallel",),
            vmem_limit_bytes=vmem_limit),
    )(x_col, y_col, x_row, y_row, cxr, cyr, cxc, cyc, pred_flat, tgt_flat)

    packed = packed[:B]                            # drop padded dummy images
    ot_c = packed[:, 0, 0]                         # per-image OT contribution
    tv_c = packed[:, 0, 1]                         # per-image TV term (already * target_count)
    pred_count = packed[:, 0, 2]                   # per-image predicted count

    # ---- final (scalar) combination, plain JAX glue ----
    ot_loss = jnp.sum(ot_c).reshape(1)                             # torch shape [1]
    target_count = jnp.full((B,), float(P), dtype=jnp.float32)     # len(points) per image
    tv_loss = jnp.mean(tv_c)
    count_loss = jnp.mean(jnp.abs(pred_count - target_count))
    loss = ot_loss * weight_ot + tv_loss * weight_tv + count_loss
    loss_info = {"loss": loss, "ot_loss": ot_loss,
                 "tv_loss": tv_loss, "count_loss": count_loss}
    return loss, loss_info


if __name__ == "__main__":
    # TODO(synk): per-image variable point counts (PyTorch list of tensors) would need
    # padding + masking inside the Sinkhorn; here every image has the same P points.
    key = jax.random.PRNGKey(0)
    k1, k2, k3 = jax.random.split(key, 3)

    B, P = 2, 8
    input_size, reduction = 128, 8
    C = input_size // reduction                      # density map is (B, 1, 16, 16)

    pred_density = jax.random.uniform(k1, (B, 1, C, C), dtype=jnp.float32)
    target_density = jax.random.uniform(k2, (B, 1, C, C), dtype=jnp.float32)
    points = jax.random.uniform(k3, (B, P, 2), dtype=jnp.float32) * input_size

    loss, loss_info = dm_loss(
        pred_density, target_density, points,
        input_size=input_size, reduction=reduction,
        norm_cood=True, weight_ot=0.1, weight_tv=0.01,
        num_of_iter_in_ot=100, regularization=10.0)

    jax.block_until_ready(loss)
    jax.block_until_ready(loss_info["ot_loss"])
    print("KERNEL_OK")
</pallas_src>

<mosaic_0001>
module attributes {stable_mosaic.version = 11 : i64} {
  func.func @_dm_loss_kernel(%arg0: i32, %arg1: memref<1x8x1xf32, #tpu.memory_space<vmem>>, %arg2: memref<1x8x1xf32, #tpu.memory_space<vmem>>, %arg3: memref<1x1x8xf32, #tpu.memory_space<vmem>>, %arg4: memref<1x1x8xf32, #tpu.memory_space<vmem>>, %arg5: memref<1x1x256xf32, #tpu.memory_space<vmem>>, %arg6: memref<1x1x256xf32, #tpu.memory_space<vmem>>, %arg7: memref<1x256x1xf32, #tpu.memory_space<vmem>>, %arg8: memref<1x256x1xf32, #tpu.memory_space<vmem>>, %arg9: memref<1x1x256xf32, #tpu.memory_space<vmem>>, %arg10: memref<1x1x256xf32, #tpu.memory_space<vmem>>, %arg11: memref<1x1x128xf32, #tpu.memory_space<vmem>>, %arg12: memref<1x1x8xf32, #tpu.memory_space<vmem>>, %arg13: memref<1x1x256xf32, #tpu.memory_space<vmem>>, %arg14: memref<1x1x256xf32, #tpu.memory_space<vmem>>, %arg15: memref<1x1x1xf32, #tpu.memory_space<vmem>>) attributes {dimension_semantics = [#tpu.dimension_semantics<parallel>], iteration_bounds = array<i64: 2>, scalar_prefetch = 0 : i64, scratch_operands = 4 : i64, tpu.core_type = #tpu.core_type<tc>, window_params = [{transform_indices = @transform_0, window_bounds = array<i64: 1, 8, 1>}, {transform_indices = @transform_1, window_bounds = array<i64: 1, 8, 1>}, {transform_indices = @transform_2, window_bounds = array<i64: 1, 1, 8>}, {transform_indices = @transform_3, window_bounds = array<i64: 1, 1, 8>}, {pipeline_mode = #tpu.pipeline_mode<synchronous>, transform_indices = @transform_4, window_bounds = array<i64: 1, 1, 256>}, {pipeline_mode = #tpu.pipeline_mode<synchronous>, transform_indices = @transform_5, window_bounds = array<i64: 1, 1, 256>}, {pipeline_mode = #tpu.pipeline_mode<synchronous>, transform_indices = @transform_6, window_bounds = array<i64: 1, 256, 1>}, {pipeline_mode = #tpu.pipeline_mode<synchronous>, transform_indices = @transform_7, window_bounds = array<i64: 1, 256, 1>}, {transform_indices = @transform_8, window_bounds = array<i64: 1, 1, 256>}, {transform_indices = @transform_9, window_bounds = array<i64: 1, 1, 256>}, {transform_indices = @transform_10, window_bounds = array<i64: 1, 1, 128>}]} {
    %c0 = arith.constant 0 : index
    %c0_0 = arith.constant 0 : index
    %c0_1 = arith.constant 0 : index
    %0 = vector.load %arg1[%c0, %c0_0, %c0_1] : memref<1x8x1xf32, #tpu.memory_space<vmem>>, vector<1x8x1xf32>
    %c0_2 = arith.constant 0 : index
    %c0_3 = arith.constant 0 : index
    %c0_4 = arith.constant 0 : index
    %1 = vector.load %arg2[%c0_2, %c0_3, %c0_4] : memref<1x8x1xf32, #tpu.memory_space<vmem>>, vector<1x8x1xf32>
    %c0_5 = arith.constant 0 : index
    %c0_6 = arith.constant 0 : index
    %c0_7 = arith.constant 0 : index
    %2 = vector.load %arg3[%c0_5, %c0_6, %c0_7] : memref<1x1x8xf32, #tpu.memory_space<vmem>>, vector<1x1x8xf32>
    %c0_8 = arith.constant 0 : index
    %c0_9 = arith.constant 0 : index
    %c0_10 = arith.constant 0 : index
    %3 = vector.load %arg4[%c0_8, %c0_9, %c0_10] : memref<1x1x8xf32, #tpu.memory_space<vmem>>, vector<1x1x8xf32>
    %c0_11 = arith.constant 0 : index
    %c0_12 = arith.constant 0 : index
    %c0_13 = arith.constant 0 : index
    %4 = vector.load %arg5[%c0_11, %c0_12, %c0_13] : memref<1x1x256xf32, #tpu.memory_space<vmem>>, vector<1x1x256xf32>
    %c0_14 = arith.constant 0 : index
    %c0_15 = arith.constant 0 : index
    %c0_16 = arith.constant 0 : index
    %5 = vector.load %arg6[%c0_14, %c0_15, %c0_16] : memref<1x1x256xf32, #tpu.memory_space<vmem>>, vector<1x1x256xf32>
    %c0_17 = arith.constant 0 : index
    %c0_18 = arith.constant 0 : index
    %c0_19 = arith.constant 0 : index
    %6 = vector.load %arg7[%c0_17, %c0_18, %c0_19] : memref<1x256x1xf32, #tpu.memory_space<vmem>>, vector<1x256x1xf32>
    %c0_20 = arith.constant 0 : index
    %c0_21 = arith.constant 0 : index
    %c0_22 = arith.constant 0 : index
    %7 = vector.load %arg8[%c0_20, %c0_21, %c0_22] : memref<1x256x1xf32, #tpu.memory_space<vmem>>, vector<1x256x1xf32>
    %c0_23 = arith.constant 0 : index
    %c0_24 = arith.constant 0 : index
    %c0_25 = arith.constant 0 : index
    %8 = vector.load %arg9[%c0_23, %c0_24, %c0_25] : memref<1x1x256xf32, #tpu.memory_space<vmem>>, vector<1x1x256xf32>
    %c0_26 = arith.constant 0 : index
    %c0_27 = arith.constant 0 : index
    %c0_28 = arith.constant 0 : index
    %9 = vector.load %arg10[%c0_26, %c0_27, %c0_28] : memref<1x1x256xf32, #tpu.memory_space<vmem>>, vector<1x1x256xf32>
    %10 = arith.mulf %0, %0 : vector<1x8x1xf32>
    %11 = arith.mulf %1, %1 : vector<1x8x1xf32>
    %12 = arith.addf %10, %11 : vector<1x8x1xf32>
    %13 = arith.mulf %4, %4 : vector<1x1x256xf32>
    %14 = arith.mulf %5, %5 : vector<1x1x256xf32>
    %15 = arith.addf %13, %14 : vector<1x1x256xf32>
    %16 = vector.broadcast %12 : vector<1x8x1xf32> to vector<1x8x256xf32>
    %17 = vector.broadcast %15 : vector<1x1x256xf32> to vector<1x8x256xf32>
    %18 = arith.addf %16, %17 : vector<1x8x256xf32>
    %19 = vector.broadcast %0 : vector<1x8x1xf32> to vector<1x8x256xf32>
    %20 = vector.broadcast %4 : vector<1x1x256xf32> to vector<1x8x256xf32>
    %21 = arith.mulf %19, %20 : vector<1x8x256xf32>
    %22 = vector.broadcast %1 : vector<1x8x1xf32> to vector<1x8x256xf32>
    %23 = vector.broadcast %5 : vector<1x1x256xf32> to vector<1x8x256xf32>
    %24 = arith.mulf %22, %23 : vector<1x8x256xf32>
    %25 = arith.addf %21, %24 : vector<1x8x256xf32>
    %cst = arith.constant 2.000000e+00 : f32
    %26 = vector.broadcast %cst : f32 to vector<1x8x256xf32>
    %27 = arith.mulf %26, %25 : vector<1x8x256xf32>
    %28 = arith.subf %18, %27 : vector<1x8x256xf32>
    %cst_29 = arith.constant -1.000000e-01 : f32
    %29 = vector.broadcast %cst_29 : f32 to vector<1x8x256xf32>
    %30 = arith.mulf %28, %29 : vector<1x8x256xf32>
    %31 = math.exp %30 : vector<1x8x256xf32>
    %32 = arith.truncf %31 : vector<1x8x256xf32> to vector<1x8x256xbf16>
    %33 = arith.mulf %2, %2 : vector<1x1x8xf32>
    %34 = arith.mulf %3, %3 : vector<1x1x8xf32>
    %35 = arith.addf %33, %34 : vector<1x1x8xf32>
    %36 = arith.mulf %6, %6 : vector<1x256x1xf32>
    %37 = arith.mulf %7, %7 : vector<1x256x1xf32>
    %38 = arith.addf %36, %37 : vector<1x256x1xf32>
    %39 = vector.broadcast %35 : vector<1x1x8xf32> to vector<1x256x8xf32>
    %40 = vector.broadcast %38 : vector<1x256x1xf32> to vector<1x256x8xf32>
    %41 = arith.addf %39, %40 : vector<1x256x8xf32>
    %42 = vector.broadcast %6 : vector<1x256x1xf32> to vector<1x256x8xf32>
    %43 = vector.broadcast %2 : vector<1x1x8xf32> to vector<1x256x8xf32>
    %44 = arith.mulf %42, %43 : vector<1x256x8xf32>
    %45 = vector.broadcast %7 : vector<1x256x1xf32> to vector<1x256x8xf32>
    %46 = vector.broadcast %3 : vector<1x1x8xf32> to vector<1x256x8xf32>
    %47 = arith.mulf %45, %46 : vector<1x256x8xf32>
    %48 = arith.addf %44, %47 : vector<1x256x8xf32>
    %cst_30 = arith.constant 2.000000e+00 : f32
    %49 = vector.broadcast %cst_30 : f32 to vector<1x256x8xf32>
    %50 = arith.mulf %49, %48 : vector<1x256x8xf32>
    %51 = arith.subf %41, %50 : vector<1x256x8xf32>
    %cst_31 = arith.constant -1.000000e-01 : f32
    %52 = vector.broadcast %cst_31 : f32 to vector<1x256x8xf32>
    %53 = arith.mulf %51, %52 : vector<1x256x8xf32>
    %54 = math.exp %53 : vector<1x256x8xf32>
    %55 = arith.truncf %54 : vector<1x256x8xf32> to vector<1x256x8xbf16>
    %cst_32 = arith.constant dense<0.000000e+00> : vector<1xf32>
    %56 = vector.multi_reduction <add>, %8, %cst_32 [1, 2] : vector<1x1x256xf32> to vector<1xf32>
    %57 = vector.shape_cast %56 : vector<1xf32> to vector<1x1x1xf32>
    %cst_33 = arith.constant 9.99999993E-9 : f32
    %58 = vector.broadcast %cst_33 : f32 to vector<1x1x1xf32>
    %59 = arith.addf %57, %58 : vector<1x1x1xf32>
    %60 = vector.broadcast %59 : vector<1x1x1xf32> to vector<1x1x256xf32>
    %61 = arith.divf %8, %60 : vector<1x1x256xf32>
    %cst_34 = arith.constant 1.250000e-01 : f32
    %62 = vector.broadcast %cst_34 : f32 to vector<1x1x8xf32>
    %cst_35 = arith.constant 3.906250e-03 : f32
    %63 = vector.broadcast %cst_35 : f32 to vector<1x1x256xf32>
    %c0_36 = arith.constant 0 : index
    %c0_37 = arith.constant 0 : index
    %c0_38 = arith.constant 0 : index
    %64 = vector.load %arg12[%c0_36, %c0_37, %c0_38] : memref<1x1x8xf32, #tpu.memory_space<vmem>>, vector<1x1x8xf32>
    tpu.vector_store %arg12[%c0_36, %c0_37, %c0_38], %62 {strides = array<i32>} : memref<1x1x8xf32, #tpu.memory_space<vmem>>, vector<1x1x8xf32>,
    %c0_39 = arith.constant 0 : index
    %c0_40 = arith.constant 0 : index
    %c0_41 = arith.constant 0 : index
    %65 = vector.load %arg13[%c0_39, %c0_40, %c0_41] : memref<1x1x256xf32, #tpu.memory_space<vmem>>, vector<1x1x256xf32>
    tpu.vector_store %arg13[%c0_39, %c0_40, %c0_41], %63 {strides = array<i32>} : memref<1x1x256xf32, #tpu.memory_space<vmem>>, vector<1x1x256xf32>,
    %66 = arith.truncf %62 : vector<1x1x8xf32> to vector<1x1x8xbf16>
    "tpu.trace_start"() <{level = 10 : i32, message = "bmp,bpc->bmc"}> : () -> ()
    %cst_42 = arith.constant dense<0.000000e+00> : vector<1x1x256xf32>
    %67 = tpu.matmul %66, %32, %cst_42 {dimension_numbers = #tpu.dot_dimension_numbers<[2], [1], [1], [2], [0, 0, 0, 1, 1, 2], [0], [0]>} : vector<1x1x8xbf16>, vector<1x8x256xbf16>, vector<1x1x256xf32> -> vector<1x1x256xf32>
    "tpu.trace_stop"() : () -> ()
    %c0_43 = arith.constant 0 : index
    %c0_44 = arith.constant 0 : index
    %c0_45 = arith.constant 0 : index
    %68 = vector.load %arg14[%c0_43, %c0_44, %c0_45] : memref<1x1x256xf32, #tpu.memory_space<vmem>>, vector<1x1x256xf32>
    tpu.vector_store %arg14[%c0_43, %c0_44, %c0_45], %67 {strides = array<i32>} : memref<1x1x256xf32, #tpu.memory_space<vmem>>, vector<1x1x256xf32>,
    %cst_46 = arith.constant 1.000000e+00 : f32
    %69 = vector.broadcast %cst_46 : f32 to vector<1x1x1xf32>
    %c0_47 = arith.constant 0 : index
    %c0_48 = arith.constant 0 : index
    %c0_49 = arith.constant 0 : index
    %70 = vector.load %arg15[%c0_47, %c0_48, %c0_49] : memref<1x1x1xf32, #tpu.memory_space<vmem>>, vector<1x1x1xf32>
    tpu.vector_store %arg15[%c0_47, %c0_48, %c0_49], %69 {strides = array<i32>} : memref<1x1x1xf32, #tpu.memory_space<vmem>>, vector<1x1x1xf32>,
    %cst_50 = arith.constant 1.250000e-01 : f32
    %c0_i32 = arith.constant 0 : i32
    %c10_i32 = arith.constant 10 : i32
    %71 = arith.addi %c0_i32, %c10_i32 : i32
    %c1_i32 = arith.constant 1 : i32
    scf.for %arg16 = %c0_i32 to %71 step %c1_i32  : i32 {
      %c0_68 = arith.constant 0 : index
      %c0_69 = arith.constant 0 : index
      %c0_70 = arith.constant 0 : index
      %119 = vector.load %arg15[%c0_68, %c0_69, %c0_70] : memref<1x1x1xf32, #tpu.memory_space<vmem>>, vector<1x1x1xf32>
      %120 = vector.shape_cast %119 : vector<1x1x1xf32> to vector<1x1x1x1xf32>
      %cst_71 = arith.constant dense<0.000000e+00> : vector<1xf32>
      %121 = vector.multi_reduction <add>, %120, %cst_71 [1, 2, 3] : vector<1x1x1x1xf32> to vector<1xf32>
      %122 = vector.shape_cast %121 : vector<1xf32> to vector<1x1x1x1xf32>
      %123 = vector.extract %122[0, 0, 0, 0] : f32 from vector<1x1x1x1xf32>
      %cst_72 = arith.constant 5.000000e-01 : f32
      %124 = arith.cmpf ogt, %123, %cst_72 : f32
      %125 = arith.extui %124 : i1 to i32
      %c0_i32_73 = arith.constant 0 : i32
      %126 = arith.cmpi ne, %125, %c0_i32_73 : i32
      scf.if %126 {
        %c0_74 = arith.constant 0 : index
        %c0_75 = arith.constant 0 : index
        %c0_76 = arith.constant 0 : index
        %127 = vector.load %arg12[%c0_74, %c0_75, %c0_76] : memref<1x1x8xf32, #tpu.memory_space<vmem>>, vector<1x1x8xf32>
        %c0_77 = arith.constant 0 : index
        %c0_78 = arith.constant 0 : index
        %c0_79 = arith.constant 0 : index
        %128 = vector.load %arg13[%c0_77, %c0_78, %c0_79] : memref<1x1x256xf32, #tpu.memory_space<vmem>>, vector<1x1x256xf32>
        %c0_80 = arith.constant 0 : index
        %c0_81 = arith.constant 0 : index
        %c0_82 = arith.constant 0 : index
        %129 = vector.load %arg14[%c0_80, %c0_81, %c0_82] : memref<1x1x256xf32, #tpu.memory_space<vmem>>, vector<1x1x256xf32>
        %cst_83 = arith.constant 1.000000e-16 : f32
        %130 = vector.broadcast %cst_83 : f32 to vector<1x1x256xf32>
        %131 = arith.addf %129, %130 : vector<1x1x256xf32>
        %132 = tpu.reciprocal %131 {approx = true} : vector<1x1x256xf32> -> vector<1x1x256xf32>
        %133 = arith.mulf %131, %132 : vector<1x1x256xf32>
        %cst_84 = arith.constant 2.000000e+00 : f32
        %134 = vector.broadcast %cst_84 : f32 to vector<1x1x256xf32>
        %135 = arith.subf %134, %133 : vector<1x1x256xf32>
        %136 = arith.mulf %132, %135 : vector<1x1x256xf32>
        %137 = arith.mulf %61, %136 : vector<1x1x256xf32>
        %138 = arith.truncf %137 : vector<1x1x256xf32> to vector<1x1x256xbf16>
        "tpu.trace_start"() <{level = 10 : i32, message = "bmc,bcp->bmp"}> : () -> ()
        %cst_85 = arith.constant dense<0.000000e+00> : vector<1x1x8xf32>
        %139 = tpu.matmul %138, %55, %cst_85 {dimension_numbers = #tpu.dot_dimension_numbers<[2], [1], [1], [2], [0, 0, 0, 1, 1, 2], [0], [0]>} : vector<1x1x256xbf16>, vector<1x256x8xbf16>, vector<1x1x8xf32> -> vector<1x1x8xf32>
        "tpu.trace_stop"() : () -> ()
        %cst_86 = arith.constant 1.000000e-16 : f32
        %140 = vector.broadcast %cst_86 : f32 to vector<1x1x8xf32>
        %141 = arith.addf %139, %140 : vector<1x1x8xf32>
        %142 = tpu.reciprocal %141 {approx = true} : vector<1x1x8xf32> -> vector<1x1x8xf32>
        %143 = arith.mulf %141, %142 : vector<1x1x8xf32>
        %cst_87 = arith.constant 2.000000e+00 : f32
        %144 = vector.broadcast %cst_87 : f32 to vector<1x1x8xf32>
        %145 = arith.subf %144, %143 : vector<1x1x8xf32>
        %146 = arith.mulf %142, %145 : vector<1x1x8xf32>
        %147 = vector.broadcast %cst_50 : f32 to vector<1x1x8xf32>
        %148 = arith.mulf %147, %146 : vector<1x1x8xf32>
        %149 = arith.truncf %148 : vector<1x1x8xf32> to vector<1x1x8xbf16>
        "tpu.trace_start"() <{level = 10 : i32, message = "bmp,bpc->bmc"}> : () -> ()
        %cst_88 = arith.constant dense<0.000000e+00> : vector<1x1x256xf32>
        %150 = tpu.matmul %149, %32, %cst_88 {dimension_numbers = #tpu.dot_dimension_numbers<[2], [1], [1], [2], [0, 0, 0, 1, 1, 2], [0], [0]>} : vector<1x1x8xbf16>, vector<1x8x256xbf16>, vector<1x1x256xf32> -> vector<1x1x256xf32>
        "tpu.trace_stop"() : () -> ()
        %cst_89 = arith.constant 1.000000e-16 : f32
        %151 = vector.broadcast %cst_89 : f32 to vector<1x1x256xf32>
        %152 = arith.addf %150, %151 : vector<1x1x256xf32>
        %153 = tpu.reciprocal %152 {approx = true} : vector<1x1x256xf32> -> vector<1x1x256xf32>
        %154 = arith.mulf %152, %153 : vector<1x1x256xf32>
        %cst_90 = arith.constant 2.000000e+00 : f32
        %155 = vector.broadcast %cst_90 : f32 to vector<1x1x256xf32>
        %156 = arith.subf %155, %154 : vector<1x1x256xf32>
        %157 = arith.mulf %153, %156 : vector<1x1x256xf32>
        %158 = arith.mulf %61, %157 : vector<1x1x256xf32>
        %159 = arith.truncf %158 : vector<1x1x256xf32> to vector<1x1x256xbf16>
        "tpu.trace_start"() <{level = 10 : i32, message = "bmc,bcp->bmp"}> : () -> ()
        %cst_91 = arith.constant dense<0.000000e+00> : vector<1x1x8xf32>
        %160 = tpu.matmul %159, %55, %cst_91 {dimension_numbers = #tpu.dot_dimension_numbers<[2], [1], [1], [2], [0, 0, 0, 1, 1, 2], [0], [0]>} : vector<1x1x256xbf16>, vector<1x256x8xbf16>, vector<1x1x8xf32> -> vector<1x1x8xf32>
        "tpu.trace_stop"() : () -> ()
        %cst_92 = arith.constant 1.000000e-16 : f32
        %161 = vector.broadcast %cst_92 : f32 to vector<1x1x8xf32>
        %162 = arith.addf %160, %161 : vector<1x1x8xf32>
        %163 = tpu.reciprocal %162 {approx = true} : vector<1x1x8xf32> -> vector<1x1x8xf32>
        %164 = arith.mulf %162, %163 : vector<1x1x8xf32>
        %cst_93 = arith.constant 2.000000e+00 : f32
        %165 = vector.broadcast %cst_93 : f32 to vector<1x1x8xf32>
        %166 = arith.subf %165, %164 : vector<1x1x8xf32>
        %167 = arith.mulf %163, %166 : vector<1x1x8xf32>
        %168 = vector.broadcast %cst_50 : f32 to vector<1x1x8xf32>
        %169 = arith.mulf %168, %167 : vector<1x1x8xf32>
        %170 = arith.truncf %169 : vector<1x1x8xf32> to vector<1x1x8xbf16>
        "tpu.trace_start"() <{level = 10 : i32, message = "bmp,bpc->bmc"}> : () -> ()
        %cst_94 = arith.constant dense<0.000000e+00> : vector<1x1x256xf32>
        %171 = tpu.matmul %170, %32, %cst_94 {dimension_numbers = #tpu.dot_dimension_numbers<[2], [1], [1], [2], [0, 0, 0, 1, 1, 2], [0], [0]>} : vector<1x1x8xbf16>, vector<1x8x256xbf16>, vector<1x1x256xf32> -> vector<1x1x256xf32>
        "tpu.trace_stop"() : () -> ()
        %cst_95 = arith.constant 1.000000e-16 : f32
        %172 = vector.broadcast %cst_95 : f32 to vector<1x1x256xf32>
        %173 = arith.addf %171, %172 : vector<1x1x256xf32>
        %174 = tpu.reciprocal %173 {approx = true} : vector<1x1x256xf32> -> vector<1x1x256xf32>
        %175 = arith.mulf %173, %174 : vector<1x1x256xf32>
        %cst_96 = arith.constant 2.000000e+00 : f32
        %176 = vector.broadcast %cst_96 : f32 to vector<1x1x256xf32>
        %177 = arith.subf %176, %175 : vector<1x1x256xf32>
        %178 = arith.mulf %174, %177 : vector<1x1x256xf32>
        %179 = arith.mulf %61, %178 : vector<1x1x256xf32>
        %180 = arith.truncf %179 : vector<1x1x256xf32> to vector<1x1x256xbf16>
        "tpu.trace_start"() <{level = 10 : i32, message = "bmc,bcp->bmp"}> : () -> ()
        %cst_97 = arith.constant dense<0.000000e+00> : vector<1x1x8xf32>
        %181 = tpu.matmul %180, %55, %cst_97 {dimension_numbers = #tpu.dot_dimension_numbers<[2], [1], [1], [2], [0, 0, 0, 1, 1, 2], [0], [0]>} : vector<1x1x256xbf16>, vector<1x256x8xbf16>, vector<1x1x8xf32> -> vector<1x1x8xf32>
        "tpu.trace_stop"() : () -> ()
        %cst_98 = arith.constant 1.000000e-16 : f32
        %182 = vector.broadcast %cst_98 : f32 to vector<1x1x8xf32>
        %183 = arith.addf %181, %182 : vector<1x1x8xf32>
        %184 = tpu.reciprocal %183 {approx = true} : vector<1x1x8xf32> -> vector<1x1x8xf32>
        %185 = arith.mulf %183, %184 : vector<1x1x8xf32>
        %cst_99 = arith.constant 2.000000e+00 : f32
        %186 = vector.broadcast %cst_99 : f32 to vector<1x1x8xf32>
        %187 = arith.subf %186, %185 : vector<1x1x8xf32>
        %188 = arith.mulf %184, %187 : vector<1x1x8xf32>
        %189 = vector.broadcast %cst_50 : f32 to vector<1x1x8xf32>
        %190 = arith.mulf %189, %188 : vector<1x1x8xf32>
        %191 = arith.truncf %190 : vector<1x1x8xf32> to vector<1x1x8xbf16>
        "tpu.trace_start"() <{level = 10 : i32, message = "bmp,bpc->bmc"}> : () -> ()
        %cst_100 = arith.constant dense<0.000000e+00> : vector<1x1x256xf32>
        %192 = tpu.matmul %191, %32, %cst_100 {dimension_numbers = #tpu.dot_dimension_numbers<[2], [1], [1], [2], [0, 0, 0, 1, 1, 2], [0], [0]>} : vector<1x1x8xbf16>, vector<1x8x256xbf16>, vector<1x1x256xf32> -> vector<1x1x256xf32>
        "tpu.trace_stop"() : () -> ()
        %cst_101 = arith.constant 1.000000e-16 : f32
        %193 = vector.broadcast %cst_101 : f32 to vector<1x1x256xf32>
        %194 = arith.addf %192, %193 : vector<1x1x256xf32>
        %195 = tpu.reciprocal %194 {approx = true} : vector<1x1x256xf32> -> vector<1x1x256xf32>
        %196 = arith.mulf %194, %195 : vector<1x1x256xf32>
        %cst_102 = arith.constant 2.000000e+00 : f32
        %197 = vector.broadcast %cst_102 : f32 to vector<1x1x256xf32>
        %198 = arith.subf %197, %196 : vector<1x1x256xf32>
        %199 = arith.mulf %195, %198 : vector<1x1x256xf32>
        %200 = arith.mulf %61, %199 : vector<1x1x256xf32>
        %201 = arith.truncf %200 : vector<1x1x256xf32> to vector<1x1x256xbf16>
        "tpu.trace_start"() <{level = 10 : i32, message = "bmc,bcp->bmp"}> : () -> ()
        %cst_103 = arith.constant dense<0.000000e+00> : vector<1x1x8xf32>
        %202 = tpu.matmul %201, %55, %cst_103 {dimension_numbers = #tpu.dot_dimension_numbers<[2], [1], [1], [2], [0, 0, 0, 1, 1, 2], [0], [0]>} : vector<1x1x256xbf16>, vector<1x256x8xbf16>, vector<1x1x8xf32> -> vector<1x1x8xf32>
        "tpu.trace_stop"() : () -> ()
        %cst_104 = arith.constant 1.000000e-16 : f32
        %203 = vector.broadcast %cst_104 : f32 to vector<1x1x8xf32>
        %204 = arith.addf %202, %203 : vector<1x1x8xf32>
        %205 = tpu.reciprocal %204 {approx = true} : vector<1x1x8xf32> -> vector<1x1x8xf32>
        %206 = arith.mulf %204, %205 : vector<1x1x8xf32>
        %cst_105 = arith.constant 2.000000e+00 : f32
        %207 = vector.broadcast %cst_105 : f32 to vector<1x1x8xf32>
        %208 = arith.subf %207, %206 : vector<1x1x8xf32>
        %209 = arith.mulf %205, %208 : vector<1x1x8xf32>
        %210 = vector.broadcast %cst_50 : f32 to vector<1x1x8xf32>
        %211 = arith.mulf %210, %209 : vector<1x1x8xf32>
        %212 = arith.truncf %211 : vector<1x1x8xf32> to vector<1x1x8xbf16>
        "tpu.trace_start"() <{level = 10 : i32, message = "bmp,bpc->bmc"}> : () -> ()
        %cst_106 = arith.constant dense<0.000000e+00> : vector<1x1x256xf32>
        %213 = tpu.matmul %212, %32, %cst_106 {dimension_numbers = #tpu.dot_dimension_numbers<[2], [1], [1], [2], [0, 0, 0, 1, 1, 2], [0], [0]>} : vector<1x1x8xbf16>, vector<1x8x256xbf16>, vector<1x1x256xf32> -> vector<1x1x256xf32>
        "tpu.trace_stop"() : () -> ()
        %cst_107 = arith.constant 1.000000e-16 : f32
        %214 = vector.broadcast %cst_107 : f32 to vector<1x1x256xf32>
        %215 = arith.addf %213, %214 : vector<1x1x256xf32>
        %216 = tpu.reciprocal %215 {approx = true} : vector<1x1x256xf32> -> vector<1x1x256xf32>
        %217 = arith.mulf %215, %216 : vector<1x1x256xf32>
        %cst_108 = arith.constant 2.000000e+00 : f32
        %218 = vector.broadcast %cst_108 : f32 to vector<1x1x256xf32>
        %219 = arith.subf %218, %217 : vector<1x1x256xf32>
        %220 = arith.mulf %216, %219 : vector<1x1x256xf32>
        %221 = arith.mulf %61, %220 : vector<1x1x256xf32>
        %222 = arith.truncf %221 : vector<1x1x256xf32> to vector<1x1x256xbf16>
        "tpu.trace_start"() <{level = 10 : i32, message = "bmc,bcp->bmp"}> : () -> ()
        %cst_109 = arith.constant dense<0.000000e+00> : vector<1x1x8xf32>
        %223 = tpu.matmul %222, %55, %cst_109 {dimension_numbers = #tpu.dot_dimension_numbers<[2], [1], [1], [2], [0, 0, 0, 1, 1, 2], [0], [0]>} : vector<1x1x256xbf16>, vector<1x256x8xbf16>, vector<1x1x8xf32> -> vector<1x1x8xf32>
        "tpu.trace_stop"() : () -> ()
        %cst_110 = arith.constant 1.000000e-16 : f32
        %224 = vector.broadcast %cst_110 : f32 to vector<1x1x8xf32>
        %225 = arith.addf %223, %224 : vector<1x1x8xf32>
        %226 = tpu.reciprocal %225 {approx = true} : vector<1x1x8xf32> -> vector<1x1x8xf32>
        %227 = arith.mulf %225, %226 : vector<1x1x8xf32>
        %cst_111 = arith.constant 2.000000e+00 : f32
        %228 = vector.broadcast %cst_111 : f32 to vector<1x1x8xf32>
        %229 = arith.subf %228, %227 : vector<1x1x8xf32>
        %230 = arith.mulf %226, %229 : vector<1x1x8xf32>
        %231 = vector.broadcast %cst_50 : f32 to vector<1x1x8xf32>
        %232 = arith.mulf %231, %230 : vector<1x1x8xf32>
        %233 = arith.truncf %232 : vector<1x1x8xf32> to vector<1x1x8xbf16>
        "tpu.trace_start"() <{level = 10 : i32, message = "bmp,bpc->bmc"}> : () -> ()
        %cst_112 = arith.constant dense<0.000000e+00> : vector<1x1x256xf32>
        %234 = tpu.matmul %233, %32, %cst_112 {dimension_numbers = #tpu.dot_dimension_numbers<[2], [1], [1], [2], [0, 0, 0, 1, 1, 2], [0], [0]>} : vector<1x1x8xbf16>, vector<1x8x256xbf16>, vector<1x1x256xf32> -> vector<1x1x256xf32>
        "tpu.trace_stop"() : () -> ()
        %cst_113 = arith.constant 1.000000e-16 : f32
        %235 = vector.broadcast %cst_113 : f32 to vector<1x1x256xf32>
        %236 = arith.addf %234, %235 : vector<1x1x256xf32>
        %237 = tpu.reciprocal %236 {approx = true} : vector<1x1x256xf32> -> vector<1x1x256xf32>
        %238 = arith.mulf %236, %237 : vector<1x1x256xf32>
        %cst_114 = arith.constant 2.000000e+00 : f32
        %239 = vector.broadcast %cst_114 : f32 to vector<1x1x256xf32>
        %240 = arith.subf %239, %238 : vector<1x1x256xf32>
        %241 = arith.mulf %237, %240 : vector<1x1x256xf32>
        %242 = arith.mulf %61, %241 : vector<1x1x256xf32>
        %243 = arith.truncf %242 : vector<1x1x256xf32> to vector<1x1x256xbf16>
        "tpu.trace_start"() <{level = 10 : i32, message = "bmc,bcp->bmp"}> : () -> ()
        %cst_115 = arith.constant dense<0.000000e+00> : vector<1x1x8xf32>
        %244 = tpu.matmul %243, %55, %cst_115 {dimension_numbers = #tpu.dot_dimension_numbers<[2], [1], [1], [2], [0, 0, 0, 1, 1, 2], [0], [0]>} : vector<1x1x256xbf16>, vector<1x256x8xbf16>, vector<1x1x8xf32> -> vector<1x1x8xf32>
        "tpu.trace_stop"() : () -> ()
        %cst_116 = arith.constant 1.000000e-16 : f32
        %245 = vector.broadcast %cst_116 : f32 to vector<1x1x8xf32>
        %246 = arith.addf %244, %245 : vector<1x1x8xf32>
        %247 = tpu.reciprocal %246 {approx = true} : vector<1x1x8xf32> -> vector<1x1x8xf32>
        %248 = arith.mulf %246, %247 : vector<1x1x8xf32>
        %cst_117 = arith.constant 2.000000e+00 : f32
        %249 = vector.broadcast %cst_117 : f32 to vector<1x1x8xf32>
        %250 = arith.subf %249, %248 : vector<1x1x8xf32>
        %251 = arith.mulf %247, %250 : vector<1x1x8xf32>
        %252 = vector.broadcast %cst_50 : f32 to vector<1x1x8xf32>
        %253 = arith.mulf %252, %251 : vector<1x1x8xf32>
        %254 = arith.truncf %253 : vector<1x1x8xf32> to vector<1x1x8xbf16>
        "tpu.trace_start"() <{level = 10 : i32, message = "bmp,bpc->bmc"}> : () -> ()
        %cst_118 = arith.constant dense<0.000000e+00> : vector<1x1x256xf32>
        %255 = tpu.matmul %254, %32, %cst_118 {dimension_numbers = #tpu.dot_dimension_numbers<[2], [1], [1], [2], [0, 0, 0, 1, 1, 2], [0], [0]>} : vector<1x1x8xbf16>, vector<1x8x256xbf16>, vector<1x1x256xf32> -> vector<1x1x256xf32>
        "tpu.trace_stop"() : () -> ()
        %cst_119 = arith.constant 1.000000e-16 : f32
        %256 = vector.broadcast %cst_119 : f32 to vector<1x1x256xf32>
        %257 = arith.addf %255, %256 : vector<1x1x256xf32>
        %258 = tpu.reciprocal %257 {approx = true} : vector<1x1x256xf32> -> vector<1x1x256xf32>
        %259 = arith.mulf %257, %258 : vector<1x1x256xf32>
        %cst_120 = arith.constant 2.000000e+00 : f32
        %260 = vector.broadcast %cst_120 : f32 to vector<1x1x256xf32>
        %261 = arith.subf %260, %259 : vector<1x1x256xf32>
        %262 = arith.mulf %258, %261 : vector<1x1x256xf32>
        %263 = arith.mulf %61, %262 : vector<1x1x256xf32>
        %264 = arith.truncf %263 : vector<1x1x256xf32> to vector<1x1x256xbf16>
        "tpu.trace_start"() <{level = 10 : i32, message = "bmc,bcp->bmp"}> : () -> ()
        %cst_121 = arith.constant dense<0.000000e+00> : vector<1x1x8xf32>
        %265 = tpu.matmul %264, %55, %cst_121 {dimension_numbers = #tpu.dot_dimension_numbers<[2], [1], [1], [2], [0, 0, 0, 1, 1, 2], [0], [0]>} : vector<1x1x256xbf16>, vector<1x256x8xbf16>, vector<1x1x8xf32> -> vector<1x1x8xf32>
        "tpu.trace_stop"() : () -> ()
        %cst_122 = arith.constant 1.000000e-16 : f32
        %266 = vector.broadcast %cst_122 : f32 to vector<1x1x8xf32>
        %267 = arith.addf %265, %266 : vector<1x1x8xf32>
        %268 = tpu.reciprocal %267 {approx = true} : vector<1x1x8xf32> -> vector<1x1x8xf32>
        %269 = arith.mulf %267, %268 : vector<1x1x8xf32>
        %cst_123 = arith.constant 2.000000e+00 : f32
        %270 = vector.broadcast %cst_123 : f32 to vector<1x1x8xf32>
        %271 = arith.subf %270, %269 : vector<1x1x8xf32>
        %272 = arith.mulf %268, %271 : vector<1x1x8xf32>
        %273 = vector.broadcast %cst_50 : f32 to vector<1x1x8xf32>
        %274 = arith.mulf %273, %272 : vector<1x1x8xf32>
        %275 = arith.truncf %274 : vector<1x1x8xf32> to vector<1x1x8xbf16>
        "tpu.trace_start"() <{level = 10 : i32, message = "bmp,bpc->bmc"}> : () -> ()
        %cst_124 = arith.constant dense<0.000000e+00> : vector<1x1x256xf32>
        %276 = tpu.matmul %275, %32, %cst_124 {dimension_numbers = #tpu.dot_dimension_numbers<[2], [1], [1], [2], [0, 0, 0, 1, 1, 2], [0], [0]>} : vector<1x1x8xbf16>, vector<1x8x256xbf16>, vector<1x1x256xf32> -> vector<1x1x256xf32>
        "tpu.trace_stop"() : () -> ()
        %cst_125 = arith.constant 1.000000e-16 : f32
        %277 = vector.broadcast %cst_125 : f32 to vector<1x1x256xf32>
        %278 = arith.addf %276, %277 : vector<1x1x256xf32>
        %279 = tpu.reciprocal %278 {approx = true} : vector<1x1x256xf32> -> vector<1x1x256xf32>
        %280 = arith.mulf %278, %279 : vector<1x1x256xf32>
        %cst_126 = arith.constant 2.000000e+00 : f32
        %281 = vector.broadcast %cst_126 : f32 to vector<1x1x256xf32>
        %282 = arith.subf %281, %280 : vector<1x1x256xf32>
        %283 = arith.mulf %279, %282 : vector<1x1x256xf32>
        %284 = arith.mulf %61, %283 : vector<1x1x256xf32>
        %285 = arith.truncf %284 : vector<1x1x256xf32> to vector<1x1x256xbf16>
        "tpu.trace_start"() <{level = 10 : i32, message = "bmc,bcp->bmp"}> : () -> ()
        %cst_127 = arith.constant dense<0.000000e+00> : vector<1x1x8xf32>
        %286 = tpu.matmul %285, %55, %cst_127 {dimension_numbers = #tpu.dot_dimension_numbers<[2], [1], [1], [2], [0, 0, 0, 1, 1, 2], [0], [0]>} : vector<1x1x256xbf16>, vector<1x256x8xbf16>, vector<1x1x8xf32> -> vector<1x1x8xf32>
        "tpu.trace_stop"() : () -> ()
        %cst_128 = arith.constant 1.000000e-16 : f32
        %287 = vector.broadcast %cst_128 : f32 to vector<1x1x8xf32>
        %288 = arith.addf %286, %287 : vector<1x1x8xf32>
        %289 = tpu.reciprocal %288 {approx = true} : vector<1x1x8xf32> -> vector<1x1x8xf32>
        %290 = arith.mulf %288, %289 : vector<1x1x8xf32>
        %cst_129 = arith.constant 2.000000e+00 : f32
        %291 = vector.broadcast %cst_129 : f32 to vector<1x1x8xf32>
        %292 = arith.subf %291, %290 : vector<1x1x8xf32>
        %293 = arith.mulf %289, %292 : vector<1x1x8xf32>
        %294 = vector.broadcast %cst_50 : f32 to vector<1x1x8xf32>
        %295 = arith.mulf %294, %293 : vector<1x1x8xf32>
        %296 = arith.truncf %295 : vector<1x1x8xf32> to vector<1x1x8xbf16>
        "tpu.trace_start"() <{level = 10 : i32, message = "bmp,bpc->bmc"}> : () -> ()
        %cst_130 = arith.constant dense<0.000000e+00> : vector<1x1x256xf32>
        %297 = tpu.matmul %296, %32, %cst_130 {dimension_numbers = #tpu.dot_dimension_numbers<[2], [1], [1], [2], [0, 0, 0, 1, 1, 2], [0], [0]>} : vector<1x1x8xbf16>, vector<1x8x256xbf16>, vector<1x1x256xf32> -> vector<1x1x256xf32>
        "tpu.trace_stop"() : () -> ()
        %cst_131 = arith.constant 1.000000e-16 : f32
        %298 = vector.broadcast %cst_131 : f32 to vector<1x1x256xf32>
        %299 = arith.addf %297, %298 : vector<1x1x256xf32>
        %300 = tpu.reciprocal %299 {approx = true} : vector<1x1x256xf32> -> vector<1x1x256xf32>
        %301 = arith.mulf %299, %300 : vector<1x1x256xf32>
        %cst_132 = arith.constant 2.000000e+00 : f32
        %302 = vector.broadcast %cst_132 : f32 to vector<1x1x256xf32>
        %303 = arith.subf %302, %301 : vector<1x1x256xf32>
        %304 = arith.mulf %300, %303 : vector<1x1x256xf32>
        %305 = arith.mulf %61, %304 : vector<1x1x256xf32>
        %306 = arith.truncf %305 : vector<1x1x256xf32> to vector<1x1x256xbf16>
        "tpu.trace_start"() <{level = 10 : i32, message = "bmc,bcp->bmp"}> : () -> ()
        %cst_133 = arith.constant dense<0.000000e+00> : vector<1x1x8xf32>
        %307 = tpu.matmul %306, %55, %cst_133 {dimension_numbers = #tpu.dot_dimension_numbers<[2], [1], [1], [2], [0, 0, 0, 1, 1, 2], [0], [0]>} : vector<1x1x256xbf16>, vector<1x256x8xbf16>, vector<1x1x8xf32> -> vector<1x1x8xf32>
        "tpu.trace_stop"() : () -> ()
        %cst_134 = arith.constant 1.000000e-16 : f32
        %308 = vector.broadcast %cst_134 : f32 to vector<1x1x8xf32>
        %309 = arith.addf %307, %308 : vector<1x1x8xf32>
        %310 = tpu.reciprocal %309 {approx = true} : vector<1x1x8xf32> -> vector<1x1x8xf32>
        %311 = arith.mulf %309, %310 : vector<1x1x8xf32>
        %cst_135 = arith.constant 2.000000e+00 : f32
        %312 = vector.broadcast %cst_135 : f32 to vector<1x1x8xf32>
        %313 = arith.subf %312, %311 : vector<1x1x8xf32>
        %314 = arith.mulf %310, %313 : vector<1x1x8xf32>
        %315 = vector.broadcast %cst_50 : f32 to vector<1x1x8xf32>
        %316 = arith.mulf %315, %314 : vector<1x1x8xf32>
        %317 = arith.truncf %316 : vector<1x1x8xf32> to vector<1x1x8xbf16>
        "tpu.trace_start"() <{level = 10 : i32, message = "bmp,bpc->bmc"}> : () -> ()
        %cst_136 = arith.constant dense<0.000000e+00> : vector<1x1x256xf32>
        %318 = tpu.matmul %317, %32, %cst_136 {dimension_numbers = #tpu.dot_dimension_numbers<[2], [1], [1], [2], [0, 0, 0, 1, 1, 2], [0], [0]>} : vector<1x1x8xbf16>, vector<1x8x256xbf16>, vector<1x1x256xf32> -> vector<1x1x256xf32>
        "tpu.trace_stop"() : () -> ()
        %cst_137 = arith.constant 1.000000e-16 : f32
        %319 = vector.broadcast %cst_137 : f32 to vector<1x1x256xf32>
        %320 = arith.addf %318, %319 : vector<1x1x256xf32>
        %321 = tpu.reciprocal %320 {approx = true} : vector<1x1x256xf32> -> vector<1x1x256xf32>
        %322 = arith.mulf %320, %321 : vector<1x1x256xf32>
        %cst_138 = arith.constant 2.000000e+00 : f32
        %323 = vector.broadcast %cst_138 : f32 to vector<1x1x256xf32>
        %324 = arith.subf %323, %322 : vector<1x1x256xf32>
        %325 = arith.mulf %321, %324 : vector<1x1x256xf32>
        %326 = arith.mulf %61, %325 : vector<1x1x256xf32>
        %327 = arith.truncf %326 : vector<1x1x256xf32> to vector<1x1x256xbf16>
        "tpu.trace_start"() <{level = 10 : i32, message = "bmc,bcp->bmp"}> : () -> ()
        %cst_139 = arith.constant dense<0.000000e+00> : vector<1x1x8xf32>
        %328 = tpu.matmul %327, %55, %cst_139 {dimension_numbers = #tpu.dot_dimension_numbers<[2], [1], [1], [2], [0, 0, 0, 1, 1, 2], [0], [0]>} : vector<1x1x256xbf16>, vector<1x256x8xbf16>, vector<1x1x8xf32> -> vector<1x1x8xf32>
        "tpu.trace_stop"() : () -> ()
        %cst_140 = arith.constant 1.000000e-16 : f32
        %329 = vector.broadcast %cst_140 : f32 to vector<1x1x8xf32>
        %330 = arith.addf %328, %329 : vector<1x1x8xf32>
        %331 = tpu.reciprocal %330 {approx = true} : vector<1x1x8xf32> -> vector<1x1x8xf32>
        %332 = arith.mulf %330, %331 : vector<1x1x8xf32>
        %cst_141 = arith.constant 2.000000e+00 : f32
        %333 = vector.broadcast %cst_141 : f32 to vector<1x1x8xf32>
        %334 = arith.subf %333, %332 : vector<1x1x8xf32>
        %335 = arith.mulf %331, %334 : vector<1x1x8xf32>
        %336 = vector.broadcast %cst_50 : f32 to vector<1x1x8xf32>
        %337 = arith.mulf %336, %335 : vector<1x1x8xf32>
        %338 = arith.truncf %337 : vector<1x1x8xf32> to vector<1x1x8xbf16>
        "tpu.trace_start"() <{level = 10 : i32, message = "bmp,bpc->bmc"}> : () -> ()
        %cst_142 = arith.constant dense<0.000000e+00> : vector<1x1x256xf32>
        %339 = tpu.matmul %338, %32, %cst_142 {dimension_numbers = #tpu.dot_dimension_numbers<[2], [1], [1], [2], [0, 0, 0, 1, 1, 2], [0], [0]>} : vector<1x1x8xbf16>, vector<1x8x256xbf16>, vector<1x1x256xf32> -> vector<1x1x256xf32>
        "tpu.trace_stop"() : () -> ()
        %340 = tpu.weird %337 : vector<1x1x8xf32> -> vector<1x1x8xi1>
        %cst_143 = arith.constant dense<true> : vector<1x1x8xi1>
        %341 = arith.xori %340, %cst_143 : vector<1x1x8xi1>
        %cst_144 = arith.constant 0.000000e+00 : f32
        %cst_145 = arith.constant 1.000000e+00 : f32
        %342 = vector.broadcast %cst_144 : f32 to vector<1x1x8xf32>
        %343 = vector.broadcast %cst_145 : f32 to vector<1x1x8xf32>
        %344 = arith.select %341, %342, %343 : vector<1x1x8xi1>, vector<1x1x8xf32>
        %cst_146 = arith.constant dense<0.000000e+00> : vector<1xf32>
        %345 = vector.multi_reduction <add>, %344, %cst_146 [1, 2] : vector<1x1x8xf32> to vector<1xf32>
        %346 = vector.shape_cast %345 : vector<1xf32> to vector<1x1x1xf32>
        %347 = tpu.weird %326 : vector<1x1x256xf32> -> vector<1x1x256xi1>
        %cst_147 = arith.constant dense<true> : vector<1x1x256xi1>
        %348 = arith.xori %347, %cst_147 : vector<1x1x256xi1>
        %cst_148 = arith.constant 0.000000e+00 : f32
        %cst_149 = arith.constant 1.000000e+00 : f32
        %349 = vector.broadcast %cst_148 : f32 to vector<1x1x256xf32>
        %350 = vector.broadcast %cst_149 : f32 to vector<1x1x256xf32>
        %351 = arith.select %348, %349, %350 : vector<1x1x256xi1>, vector<1x1x256xf32>
        %cst_150 = arith.constant dense<0.000000e+00> : vector<1xf32>
        %352 = vector.multi_reduction <add>, %351, %cst_150 [1, 2] : vector<1x1x256xf32> to vector<1xf32>
        %353 = vector.shape_cast %352 : vector<1xf32> to vector<1x1x1xf32>
        %354 = arith.addf %346, %353 : vector<1x1x1xf32>
        %cst_151 = arith.constant 0.000000e+00 : f32
        %355 = vector.broadcast %cst_151 : f32 to vector<1x1x1xf32>
        %356 = arith.cmpf ogt, %354, %355 : vector<1x1x1xf32>
        %c0_152 = arith.constant 0 : index
        %c0_153 = arith.constant 0 : index
        %c0_154 = arith.constant 0 : index
        %357 = vector.load %arg15[%c0_152, %c0_153, %c0_154] : memref<1x1x1xf32, #tpu.memory_space<vmem>>, vector<1x1x1xf32>
        %cst_155 = arith.constant 5.000000e-01 : f32
        %358 = vector.broadcast %cst_155 : f32 to vector<1x1x1xf32>
        %359 = arith.cmpf ogt, %357, %358 : vector<1x1x1xf32>
        %cst_156 = arith.constant dense<true> : vector<1x1x1xi1>
        %360 = arith.xori %356, %cst_156 : vector<1x1x1xi1>
        %361 = arith.andi %359, %360 : vector<1x1x1xi1>
        %362 = arith.mulf %339, %326 : vector<1x1x256xf32>
        %363 = arith.subf %61, %362 : vector<1x1x256xf32>
        %364 = arith.mulf %363, %363 : vector<1x1x256xf32>
        %cst_157 = arith.constant dense<0.000000e+00> : vector<1xf32>
        %365 = vector.multi_reduction <add>, %364, %cst_157 [1, 2] : vector<1x1x256xf32> to vector<1xf32>
        %366 = vector.shape_cast %365 : vector<1xf32> to vector<1x1x1xf32>
        %367 = vector.shape_cast %361 : vector<1x1x1xi1> to vector<1x1x1xi1>
        %368 = vector.broadcast %367 : vector<1x1x1xi1> to vector<1x1x8xi1>
        %369 = arith.select %368, %337, %127 : vector<1x1x8xi1>, vector<1x1x8xf32>
        %c0_158 = arith.constant 0 : index
        %c0_159 = arith.constant 0 : index
        %c0_160 = arith.constant 0 : index
        %370 = vector.load %arg12[%c0_158, %c0_159, %c0_160] : memref<1x1x8xf32, #tpu.memory_space<vmem>>, vector<1x1x8xf32>
        tpu.vector_store %arg12[%c0_158, %c0_159, %c0_160], %369 {strides = array<i32>} : memref<1x1x8xf32, #tpu.memory_space<vmem>>, vector<1x1x8xf32>,
        %371 = vector.shape_cast %361 : vector<1x1x1xi1> to vector<1x1x1xi1>
        %372 = vector.broadcast %371 : vector<1x1x1xi1> to vector<1x1x256xi1>
        %373 = arith.select %372, %326, %128 : vector<1x1x256xi1>, vector<1x1x256xf32>
        %c0_161 = arith.constant 0 : index
        %c0_162 = arith.constant 0 : index
        %c0_163 = arith.constant 0 : index
        %374 = vector.load %arg13[%c0_161, %c0_162, %c0_163] : memref<1x1x256xf32, #tpu.memory_space<vmem>>, vector<1x1x256xf32>
        tpu.vector_store %arg13[%c0_161, %c0_162, %c0_163], %373 {strides = array<i32>} : memref<1x1x256xf32, #tpu.memory_space<vmem>>, vector<1x1x256xf32>,
        %375 = vector.shape_cast %361 : vector<1x1x1xi1> to vector<1x1x1xi1>
        %376 = vector.broadcast %375 : vector<1x1x1xi1> to vector<1x1x256xi1>
        %377 = arith.select %376, %339, %129 : vector<1x1x256xi1>, vector<1x1x256xf32>
        %c0_164 = arith.constant 0 : index
        %c0_165 = arith.constant 0 : index
        %c0_166 = arith.constant 0 : index
        %378 = vector.load %arg14[%c0_164, %c0_165, %c0_166] : memref<1x1x256xf32, #tpu.memory_space<vmem>>, vector<1x1x256xf32>
        tpu.vector_store %arg14[%c0_164, %c0_165, %c0_166], %377 {strides = array<i32>} : memref<1x1x256xf32, #tpu.memory_space<vmem>>, vector<1x1x256xf32>,
        %cst_167 = arith.constant 9.99999971E-10 : f32
        %379 = vector.broadcast %cst_167 : f32 to vector<1x1x1xf32>
        %380 = arith.cmpf ogt, %366, %379 : vector<1x1x1xf32>
        %381 = arith.andi %361, %380 : vector<1x1x1xi1>
        %cst_168 = arith.constant 1.000000e+00 : f32
        %cst_169 = arith.constant 0.000000e+00 : f32
        %382 = vector.broadcast %cst_168 : f32 to vector<1x1x1xf32>
        %383 = vector.broadcast %cst_169 : f32 to vector<1x1x1xf32>
        %384 = arith.select %381, %382, %383 : vector<1x1x1xi1>, vector<1x1x1xf32>
        %c0_170 = arith.constant 0 : index
        %c0_171 = arith.constant 0 : index
        %c0_172 = arith.constant 0 : index
        %385 = vector.load %arg15[%c0_170, %c0_171, %c0_172] : memref<1x1x1xf32, #tpu.memory_space<vmem>>, vector<1x1x1xf32>
        tpu.vector_store %arg15[%c0_170, %c0_171, %c0_172], %384 {strides = array<i32>} : memref<1x1x1xf32, #tpu.memory_space<vmem>>, vector<1x1x1xf32>,
      } else {
      }
    }
    %c0_51 = arith.constant 0 : index
    %c0_52 = arith.constant 0 : index
    %c0_53 = arith.constant 0 : index
    %72 = vector.load %arg13[%c0_51, %c0_52, %c0_53] : memref<1x1x256xf32, #tpu.memory_space<vmem>>, vector<1x1x256xf32>
    %cst_54 = arith.constant 1.000000e-16 : f32
    %73 = vector.broadcast %cst_54 : f32 to vector<1x1x256xf32>
    %74 = arith.addf %72, %73 : vector<1x1x256xf32>
    %75 = math.log %74 : vector<1x1x256xf32>
    %cst_55 = arith.constant 1.000000e+01 : f32
    %76 = vector.broadcast %cst_55 : f32 to vector<1x1x256xf32>
    %77 = arith.mulf %76, %75 : vector<1x1x256xf32>
    %78 = arith.mulf %57, %57 : vector<1x1x1xf32>
    %cst_56 = arith.constant 9.99999993E-9 : f32
    %79 = vector.broadcast %cst_56 : f32 to vector<1x1x1xf32>
    %80 = arith.addf %78, %79 : vector<1x1x1xf32>
    %81 = arith.divf %57, %80 : vector<1x1x1xf32>
    %82 = vector.broadcast %81 : vector<1x1x1xf32> to vector<1x1x256xf32>
    %83 = arith.mulf %82, %77 : vector<1x1x256xf32>
    %84 = arith.mulf %8, %77 : vector<1x1x256xf32>
    %cst_57 = arith.constant dense<0.000000e+00> : vector<1xf32>
    %85 = vector.multi_reduction <add>, %84, %cst_57 [1, 2] : vector<1x1x256xf32> to vector<1xf32>
    %86 = vector.shape_cast %85 : vector<1xf32> to vector<1x1x1xf32>
    %87 = arith.divf %86, %80 : vector<1x1x1xf32>
    %88 = vector.broadcast %87 : vector<1x1x1xf32> to vector<1x1x256xf32>
    %89 = arith.subf %83, %88 : vector<1x1x256xf32>
    %90 = arith.mulf %8, %89 : vector<1x1x256xf32>
    %cst_58 = arith.constant dense<0.000000e+00> : vector<1xf32>
    %91 = vector.multi_reduction <add>, %90, %cst_58 [1, 2] : vector<1x1x256xf32> to vector<1xf32>
    %92 = vector.shape_cast %91 : vector<1xf32> to vector<1x1x1xf32>
    %cst_59 = arith.constant 8.000000e+00 : f32
    %93 = vector.broadcast %cst_59 : f32 to vector<1x1x256xf32>
    %94 = arith.divf %9, %93 : vector<1x1x256xf32>
    %95 = arith.subf %61, %94 : vector<1x1x256xf32>
    %96 = math.absf %95 : vector<1x1x256xf32>
    %cst_60 = arith.constant dense<0.000000e+00> : vector<1xf32>
    %97 = vector.multi_reduction <add>, %96, %cst_60 [1, 2] : vector<1x1x256xf32> to vector<1xf32>
    %98 = vector.shape_cast %97 : vector<1xf32> to vector<1x1x1xf32>
    %cst_61 = arith.constant 8.000000e+00 : f32
    %99 = vector.broadcast %cst_61 : f32 to vector<1x1x1xf32>
    %100 = arith.mulf %98, %99 : vector<1x1x1xf32>
    %101 = tpu.iota {dimensions = array<i32: 2>} : vector<1x1x128xi32>
    %c0_i32_62 = arith.constant 0 : i32
    %102 = vector.broadcast %c0_i32_62 : i32 to vector<1x1x128xi32>
    %103 = arith.cmpi eq, %101, %102 : vector<1x1x128xi32>
    %c1_i32_63 = arith.constant 1 : i32
    %104 = vector.broadcast %c1_i32_63 : i32 to vector<1x1x128xi32>
    %105 = arith.cmpi eq, %101, %104 : vector<1x1x128xi32>
    %c2_i32 = arith.constant 2 : i32
    %106 = vector.broadcast %c2_i32 : i32 to vector<1x1x128xi32>
    %107 = arith.cmpi eq, %101, %106 : vector<1x1x128xi32>
    %cst_64 = arith.constant 0.000000e+00 : f32
    %108 = vector.shape_cast %57 : vector<1x1x1xf32> to vector<1x1x1xf32>
    %109 = vector.broadcast %108 : vector<1x1x1xf32> to vector<1x1x128xf32>
    %110 = vector.broadcast %cst_64 : f32 to vector<1x1x128xf32>
    %111 = arith.select %107, %109, %110 : vector<1x1x128xi1>, vector<1x1x128xf32>
    %112 = vector.shape_cast %100 : vector<1x1x1xf32> to vector<1x1x1xf32>
    %113 = vector.broadcast %112 : vector<1x1x1xf32> to vector<1x1x128xf32>
    %114 = arith.select %105, %113, %111 : vector<1x1x128xi1>, vector<1x1x128xf32>
    %115 = vector.shape_cast %92 : vector<1x1x1xf32> to vector<1x1x1xf32>
    %116 = vector.broadcast %115 : vector<1x1x1xf32> to vector<1x1x128xf32>
    %117 = arith.select %103, %116, %114 : vector<1x1x128xi1>, vector<1x1x128xf32>
    %c0_65 = arith.constant 0 : index
    %c0_66 = arith.constant 0 : index
    %c0_67 = arith.constant 0 : index
    %118 = vector.load %arg11[%c0_65, %c0_66, %c0_67] : memref<1x1x128xf32, #tpu.memory_space<vmem>>, vector<1x1x128xf32>
    tpu.vector_store %arg11[%c0_65, %c0_66, %c0_67], %117 {strides = array<i32>} : memref<1x1x128xf32, #tpu.memory_space<vmem>>, vector<1x1x128xf32>,
    return
  }
  func.func @transform_0(%arg0: i32) -> (i32, i32, i32) {
    %c0_i32 = arith.constant 0 : i32
    %c0_i32_0 = arith.constant 0 : i32
    %c0_i32_1 = arith.constant 0 : i32
    return %arg0, %c0_i32, %c0_i32_0 : i32, i32, i32
  }
  func.func @transform_1(%arg0: i32) -> (i32, i32, i32) {
    %c0_i32 = arith.constant 0 : i32
    %c0_i32_0 = arith.constant 0 : i32
    %c0_i32_1 = arith.constant 0 : i32
    return %arg0, %c0_i32, %c0_i32_0 : i32, i32, i32
  }
  func.func @transform_2(%arg0: i32) -> (i32, i32, i32) {
    %c0_i32 = arith.constant 0 : i32
    %c0_i32_0 = arith.constant 0 : i32
    %c0_i32_1 = arith.constant 0 : i32
    return %arg0, %c0_i32, %c0_i32_0 : i32, i32, i32
  }
  func.func @transform_3(%arg0: i32) -> (i32, i32, i32) {
    %c0_i32 = arith.constant 0 : i32
    %c0_i32_0 = arith.constant 0 : i32
    %c0_i32_1 = arith.constant 0 : i32
    return %arg0, %c0_i32, %c0_i32_0 : i32, i32, i32
  }
  func.func @transform_4(%arg0: i32) -> (i32, i32, i32) {
    %c0_i32 = arith.constant 0 : i32
    %c0_i32_0 = arith.constant 0 : i32
    %c0_i32_1 = arith.constant 0 : i32
    %c0_i32_2 = arith.constant 0 : i32
    return %c0_i32, %c0_i32_0, %c0_i32_1 : i32, i32, i32
  }
  func.func @transform_5(%arg0: i32) -> (i32, i32, i32) {
    %c0_i32 = arith.constant 0 : i32
    %c0_i32_0 = arith.constant 0 : i32
    %c0_i32_1 = arith.constant 0 : i32
    %c0_i32_2 = arith.constant 0 : i32
    return %c0_i32, %c0_i32_0, %c0_i32_1 : i32, i32, i32
  }
  func.func @transform_6(%arg0: i32) -> (i32, i32, i32) {
    %c0_i32 = arith.constant 0 : i32
    %c0_i32_0 = arith.constant 0 : i32
    %c0_i32_1 = arith.constant 0 : i32
    %c0_i32_2 = arith.constant 0 : i32
    return %c0_i32, %c0_i32_0, %c0_i32_1 : i32, i32, i32
  }
  func.func @transform_7(%arg0: i32) -> (i32, i32, i32) {
    %c0_i32 = arith.constant 0 : i32
    %c0_i32_0 = arith.constant 0 : i32
    %c0_i32_1 = arith.constant 0 : i32
    %c0_i32_2 = arith.constant 0 : i32
    return %c0_i32, %c0_i32_0, %c0_i32_1 : i32, i32, i32
  }
  func.func @transform_8(%arg0: i32) -> (i32, i32, i32) {
    %c0_i32 = arith.constant 0 : i32
    %c0_i32_0 = arith.constant 0 : i32
    %c0_i32_1 = arith.constant 0 : i32
    return %arg0, %c0_i32, %c0_i32_0 : i32, i32, i32
  }
  func.func @transform_9(%arg0: i32) -> (i32, i32, i32) {
    %c0_i32 = arith.constant 0 : i32
    %c0_i32_0 = arith.constant 0 : i32
    %c0_i32_1 = arith.constant 0 : i32
    return %arg0, %c0_i32, %c0_i32_0 : i32, i32, i32
  }
  func.func @transform_10(%arg0: i32) -> (i32, i32, i32) {
    %c0_i32 = arith.constant 0 : i32
    %c0_i32_0 = arith.constant 0 : i32
    %c0_i32_1 = arith.constant 0 : i32
    return %arg0, %c0_i32, %c0_i32_0 : i32, i32, i32
  }
}

</mosaic_0001>

<bundles_post_ra>
// kernel: tpu_custom_call.1
= control target key start
LH: loop header
LB: loop body
LE: loop exit
PB: predicated region body
PF: predicated region fallthrough
CT: control target
= control target key end

     0   :  { %15 = vsyncpa [#allocation7], 0  ;;  %s5233_s0 = inlined_call_operand.vmem [shape: f32[2,8,1], index: 0, kind: input, shape index: {}]   ;;  %s5234_s1 = inlined_call_operand.vmem [shape: f32[2,8,1], index: 1, kind: input, shape index: {}]   ;;  %s5235_s2 = inlined_call_operand.vmem [shape: f32[2,1,8], index: 2, kind: input, shape index: {}]   ;;  %s5236_s3 = inlined_call_operand.vmem [shape: f32[2,1,8], index: 3, kind: input, shape index: {}]   ;;  %s5237_s4 = inlined_call_operand.vmem [shape: f32[1,1,256], index: 4, kind: input, shape index: {}]   ;;  %s5238_s5 = inlined_call_operand.vmem [shape: f32[1,1,256], index: 5, kind: input, shape index: {}]   ;;  %s5239_s6 = inlined_call_operand.vmem [shape: f32[1,256,1], index: 6, kind: input, shape index: {}]   ;;  %s5240_s7 = inlined_call_operand.vmem [shape: f32[1,256,1], index: 7, kind: input, shape index: {}]   ;;  %s5241_s8 = inlined_call_operand.vmem [shape: f32[2,1,256], index: 8, kind: input, shape index: {}]   ;;  %s5242_s9 = inlined_call_operand.vmem [shape: f32[2,1,256], index: 9, kind: input, shape index: {}]   ;;  %s5243_s10 = inlined_call_operand.hbm [shape: f32[2,1,128], index: 10, kind: output, shape index: {}]  }
   0x1   :  { %17 = vsyncpa [#allocation7 + $0x1], 0  ;;  %s3825_s13 = smov 0   ;;  %s3827_s14 = smov 0  }
   0x2   :  { %s3829_s15 = smov 0   ;;  %s3831_s16 = smov 0  }
   0x3 LB: > { %s3846_s17 = sadd.s32 4294967295, %s3753_s16   ;;  %s3240_s18 = sadd.s32 4294967294, %s3753_s16   ;;  %s3753_s16 = sphi %s3831_s16, %s5345_s16   ;;  %s3749_s15 = sphi %s3829_s15, %s5344_s15   ;;  %s3745_s14 = sphi %s3827_s14, %s5343_s14   ;;  %s3741_s13 = sphi %s3825_s13, %s5342_s13  }
   0x4   : > { %s3850_s19 = sadd.s32 1, %s3753_s16   ;;  %s270_s20 = sadd.s32 1, %s3749_s15 }
   0x5   : > { %s267_s21 = ssub.s32 %s3753_s16, %s3850_s19  ;;  %p280_p0 = scmp.ne.s32.totalorder %s3749_s15, %s3745_s14 }
   0x6   : > { %p268_p1 = scmp.eq.s32.totalorder %s267_s21, 0  ;;  %p281_p2 = scmp.eq.s32.totalorder %s3846_s17, 1 }
   0x7   : > { %p286_p3 = scmp.ne.s32.totalorder %s3745_s14, %s3741_s13  ;;  %p287_p4 = scmp.eq.s32.totalorder %s3240_s18, 1 }
   0x8   : > { %s3861_s22 = scalar_select %p268_p1, %s3749_s15, %s270_s20  }
   0x9   : > { %p3863_p5 = por %p281_p2, %p280_p0  ;;  %p3867_p6 = por %p287_p4, %p286_p3 }
   0xa   : > { %5269 = sst [smem:[#allocation9_spill]] %s3861_s22  ;;  %p3243_p7 = scmp.ge.s32.totalorder %s3753_s16, 1 }
   0xb   : > { %p357_p8 = scmp.lt.s32.totalorder %s3753_s16, 3 }
   0xd   : > { %p358_p9 = pnand %p3243_p7, %p357_p8 }
   0xf   : > { %361 = sbr.rel (%p358_p9) target bundleno = 5505 (0x1581), region = 60 }
  0x14   : > { %p411_p10 = scmp.lt.s32.totalorder %s3846_s17, 1  ;;  %v3877_v0 = vld [vmem:[%s5239_s6 + $0x8] sm:$0xff]  ;;  %v3759_v2 = vmov 0   ;;  %v3909_v11 = vld [vmem:[%s5239_s6 + $0x18] sm:$0xff]  ;;  %v5244_v28 = vlaneseq  ;;  %vm1493_vm0 = vcmask 1040384   ;;  %s409_s12 = sand.u32 1, %s3745_s14  }
  0x15   : > { %v3882_v1 = vld [vmem:[%s5240_s7 + $0x8] sm:$0xff]  ;;  %3553 = vset.pattern.permute.xlu1 %v3759_v2  ;;  %3552 = vset.pattern.permute.xlu0 %v3759_v2  ;;  %v585_v3 = vmul.f32 %v3877_v0, %v3877_v0  ;;  %v3914_v12 = vld [vmem:[%s5240_s7 + $0x18] sm:$0xff]  ;;  %v587_v14 = vmul.f32 %v3909_v11, %v3909_v11  ;;  %vm1508_vm1 = vcmask 57344   ;;  %v3760_v57 = vmov 0.125  }
  0x16   : > { %s3885_s29 = scalar_select %p411_p10, %s3846_s17, 1  ;;  %1558 = vmatprep.mubr.bf16.mxu0 %v3759_v2  ;;  %v617_v4 = vmul.f32 %v3882_v1, %v3882_v1  ;;  %v619_v15 = vmul.f32 %v3914_v12, %v3914_v12  ;;  %v3923_v16 = vld [vmem:[%s5239_s6 + $0x28] sm:$0xff]  ;;  %v3937_v21 = vld [vmem:[%s5239_s6 + $0x38] sm:$0xff]  ;;  %v3973_v34 = vshrl.u32 %v5244_v28, 7  ;;  %1509 = vst.msk [vmem:[#allocation2] sm:$0x1] %vm1508_vm1, %v3760_v57 }
  0x17   : > { %v3928_v17 = vld [vmem:[%s5240_s7 + $0x28] sm:$0xff]  ;;  %v589_v19 = vmul.f32 %v3923_v16, %v3923_v16  ;;  %v3942_v22 = vld [vmem:[%s5240_s7 + $0x38] sm:$0xff]  ;;  %v591_v24 = vmul.f32 %v3937_v21, %v3937_v21  ;;  %v4306_v28 = vld [vmem:[%s5240_s7 + $0xb0] sm:$0xff]  ;;  %vm1519_vm2 = vcmask 1043456   ;;  %vm1515_vm3 = vcmask 64512  }
  0x18   : > { %s3244_s30 = sshll.u32 %s3885_s29, 3  ;;  %s3246_s11 = sshll.u32 %s3885_s29, 1  ;;  %v649_v9 = vadd.f32 %v617_v4, %v585_v3  ;;  %v651_v18 = vadd.f32 %v619_v15, %v587_v14  ;;  %v621_v20 = vmul.f32 %v3928_v17, %v3928_v17  ;;  %v623_v25 = vmul.f32 %v3942_v22, %v3942_v22  ;;  %v3951_v26 = vld [vmem:[%s5239_s6 + $0x48] sm:$0xff]  ;;  %v3965_v32 = vld [vmem:[%s5239_s6 + $0x58] sm:$0xff]  ;;  %5273 = vst [vmem:[#allocation11_spill] sm:$0xff] %v3973_v34  ;;  %v4083_v15 = vld [vmem:[%s5239_s6] sm:$0xff] }
  0x19   : > { %s418_s20 = scalar_lea.vmem %s5234_s1, %s3244_s30  ;;  %s414_s26 = scalar_lea.vmem %s5233_s0, %s3244_s30  ;;  %v3956_v27 = vld [vmem:[%s5240_s7 + $0x48] sm:$0xff]  ;;  %v593_v30 = vmul.f32 %v3951_v26, %v3951_v26  ;;  %v3970_v33 = vld [vmem:[%s5240_s7 + $0x58] sm:$0xff]  ;;  %v595_v36 = vmul.f32 %v3965_v32, %v3965_v32  ;;  %v3995_v40 = vsub.s32 0, %v3973_v34  ;;  %v3998_v41 = vsub.s32 1, %v3973_v34  ;;  %v4336_v34 = vld [vmem:[%s5240_s7 + $0xd0] sm:$0xff] }
  0x1a   : > { %v436_v5 = vld [vmem:[%s418_s20] sm:$0xff]  ;;  %s432_s22 = scalar_lea.vmem %s5242_s9, %s3246_s11  ;;  %v653_v23 = vadd.f32 %v621_v20, %v589_v19  ;;  %v655_v29 = vadd.f32 %v623_v25, %v591_v24  ;;  %v625_v31 = vmul.f32 %v3956_v27, %v3956_v27  ;;  %s428_s30 = scalar_lea.vmem %s5241_s8, %s3246_s11  ;;  %v627_v37 = vmul.f32 %v3970_v33, %v3970_v33  ;;  %v3987_v38 = vld [vmem:[%s5239_s6 + $0x68] sm:$0xff]  ;;  %v4009_v46 = vld [vmem:[%s5239_s6 + $0x78] sm:$0xff]  ;;  %5280 = vst [vmem:[#allocation18_spill] sm:$0xff] %v4336_v34 }
  0x1b   : > { %v435_v6 = vld [vmem:[%s414_s26] sm:$0xff]  ;;  %551 = vperm.xlu1 %3553, %v436_v5   ;;  %v508_v7 = vmul.f32 %v436_v5, %v436_v5  ;;  %v3992_v39 = vld [vmem:[%s5240_s7 + $0x68] sm:$0xff]  ;;  %5274 = vst [vmem:[#allocation12_spill] sm:$0xff] %v3995_v40  ;;  %5275 = vst [vmem:[#allocation13_spill] sm:$0xff] %v3998_v41  ;;  %v597_v44 = vmul.f32 %v3987_v38, %v3987_v38  ;;  %v599_v50 = vmul.f32 %v4009_v46, %v4009_v46  ;;  %s421_s20 = scalar_lea.vmem %s5235_s2, %s3885_s29  ;;  %s424_s25 = scalar_lea.vmem %s5236_s3, %s3885_s29  ;;  %vm1586_vm5 = vcmask 0  }
  0x1c   : > { %533 = vperm.xlu0 %3552, %v435_v6   ;;  %v507_v8 = vmul.f32 %v435_v6, %v435_v6  ;;  %v3904_v10 = vld [vmem:[%s432_s22] sm:$0x3]  ;;  %v657_v35 = vadd.f32 %v625_v31, %v593_v30  ;;  %v659_v43 = vadd.f32 %v627_v37, %v595_v36  ;;  %v629_v45 = vmul.f32 %v3992_v39, %v3992_v39  ;;  %v4018_v49 = vld [vmem:[%s5240_s7 + $0x78] sm:$0xff]  ;;  %v4030_v55 = vld [vmem:[%s5239_s6 + $0x88] sm:$0xff]  ;;  %s4852_s29 = scalar_lea.vmem [#allocation6], %s409_s12  ;;  %s4854_s11 = smov 0  }
  0x1d   : > { %5272 = vst [vmem:[#allocation10_spill] sm:$0xff] %v3904_v10  ;;  %v4000_v42 = vld [vmem:[%s428_s30] sm:$0x3]  ;;  %v631_v52 = vmul.f32 %v4018_v49, %v4018_v49  ;;  %v4035_v56 = vld [vmem:[%s5240_s7 + $0x88] sm:$0xff]  ;;  %v601_v60 = vmul.f32 %v4030_v55, %v4030_v55  ;;  %v4045_v62 = vld [vmem:[%s5239_s6 + $0x98] sm:$0xff]  ;;  %v584_v24 = vmul.f32 %v4083_v15, %v4083_v15 }
  0x1e   : > { %v509_v13 = vadd.f32 %v508_v7, %v507_v8  ;;  %5276 = vst [vmem:[#allocation14_spill] sm:$0xff] %v4000_v42  ;;  %v1486_v47 = vrot.slane %v4000_v42, %v3995_v40  ;;  %v1490_v48 = vrot.slane %v4000_v42, %v3998_v41  ;;  %v661_v51 = vadd.f32 %v629_v45, %v597_v44  ;;  %v4050_v63 = vld [vmem:[%s5240_s7 + $0x98] sm:$0xff]  ;;  %v4059_v5 = vld [vmem:[%s5239_s6 + $0xa8] sm:$0xff]  ;;  %v4111_v31 = vld [vmem:[%s5239_s6 + $0x10] sm:$0xff] }
  0x1f   : > { %v663_v59 = vadd.f32 %v631_v52, %v599_v50  ;;  %v633_v61 = vmul.f32 %v4035_v56, %v4035_v56  ;;  %v603_v3 = vmul.f32 %v4045_v62, %v4045_v62  ;;  %v635_v4 = vmul.f32 %v4050_v63, %v4050_v63  ;;  %v4064_v6 = vld [vmem:[%s5240_s7 + $0xa8] sm:$0xff]  ;;  %v4078_v14 = vld [vmem:[%s5240_s7 + $0xb8] sm:$0xff]  ;;  %v4144_v52 = vld [vmem:[%s5240_s7 + $0x20] sm:$0xff] }
  0x20   : > { %693 = vperm.xlu0 %3552, %v649_v9   ;;  %v1494_v53 = vsel %vm1493_vm0, %v1486_v47, 0.0  ;;  %v1495_v54 = vsel %vm1493_vm0, %v1490_v48, 0.0  ;;  %v605_v8 = vmul.f32 %v4059_v5, %v4059_v5  ;;  %v637_v9 = vmul.f32 %v4064_v6, %v4064_v6  ;;  %v4106_v30 = vld [vmem:[%s5240_s7 + $0xc8] sm:$0xff]  ;;  %v4129_v48 = vld [vmem:[%s5239_s6 + $0xd8] sm:$0xff]  ;;  %v4321_v10 = vld [vmem:[%s5240_s7 + $0xc0] sm:$0xff] }
  0x21   : > { %v1496_v58 = vadd.f32 %v1495_v54, %v1494_v53  ;;  %v665_v2 = vadd.f32 %v633_v61, %v601_v60  ;;  %v667_v7 = vadd.f32 %v635_v4, %v603_v3  ;;  %v586_v45 = vmul.f32 %v4111_v31, %v4111_v31  ;;  %v4134_v50 = vld [vmem:[%s5240_s7 + $0xd8] sm:$0xff]  ;;  %v4157_v61 = vld [vmem:[%s5239_s6 + $0xe8] sm:$0xff]  ;;  %v4167_v3 = vld [vmem:[%s5239_s6 + $0x30] sm:$0xff] }
  0x22   : > { %v669_v19 = vadd.f32 %v637_v9, %v605_v8  ;;  %5277 = vst [vmem:[#allocation15_spill] sm:$0xff] %v4134_v50  ;;  %v611_v54 = vmul.f32 %v4129_v48, %v4129_v48  ;;  %v643_v57 = vmul.f32 %v4134_v50, %v4134_v50  ;;  %v620_v60 = vmul.f32 %v4144_v52, %v4144_v52  ;;  %v4172_v4 = vld [vmem:[%s5240_s7 + $0x30] sm:$0xff] }
  0x23   : > { %v613_v8 = vmul.f32 %v4157_v61, %v4157_v61 }
  0x24   : > { %515 = vperm.xlu0 %3552, %v509_v13   ;;  %v4073_v13 = vld [vmem:[%s5239_s6 + $0xb8] sm:$0xff] }
  0x25   : > { %v607_v20 = vmul.f32 %v4073_v13, %v4073_v13 }
  0x28   : > { %703 = vperm.xlu0 %3552, %v651_v18   ;;  %v4088_v18 = vld [vmem:[%s5240_s7] sm:$0xff] }
  0x29   : > { %v616_v25 = vmul.f32 %v4088_v18, %v4088_v18 }
  0x2b   : > { %v648_v44 = vadd.f32 %v616_v25, %v584_v24  ;;  %v4185_v24 = vld [vmem:[%s5239_s6 + $0xf8] sm:$0xff] }
  0x2c   : > { %713 = vperm.xlu0 %3552, %v653_v23   ;;  %v639_v23 = vmul.f32 %v4078_v14, %v4078_v14  ;;  %v4190_v25 = vld [vmem:[%s5240_s7 + $0xf8] sm:$0xff] }
  0x2d   : > { %5279 = vst [vmem:[#allocation17_spill] sm:$0xff] %v4190_v25 }
  0x2e   : > { %v671_v36 = vadd.f32 %v639_v23, %v607_v20  ;;  %v590_v20 = vmul.f32 %v4167_v3, %v4167_v3  ;;  %v622_v23 = vmul.f32 %v4172_v4, %v4172_v4 }
  0x30   : > { %723 = vperm.xlu0 %3552, %v655_v29   ;;  %v4101_v29 = vld [vmem:[%s5239_s6 + $0xc8] sm:$0xff] }
  0x31   : > { %v609_v37 = vmul.f32 %v4101_v29, %v4101_v29 }
  0x34   : > { %733 = vperm.xlu0 %3552, %v657_v35   ;;  %v4116_v35 = vld [vmem:[%s5240_s7 + $0x10] sm:$0xff] }
  0x35   : > { %v618_v47 = vmul.f32 %v4116_v35, %v4116_v35 }
  0x38   : > { %743 = vperm.xlu0 %3552, %v659_v43   ;;  %v641_v43 = vmul.f32 %v4106_v30, %v4106_v30 }
  0x3a   : > { %v673_v53 = vadd.f32 %v641_v43, %v609_v37  ;;  %v4200_v37 = vld [vmem:[%s5240_s7 + $0x40] sm:$0xff] }
  0x3c   : > { %753 = vperm.xlu0 %3552, %v661_v51   ;;  %v4139_v51 = vld [vmem:[%s5239_s6 + $0x20] sm:$0xff] }
  0x3f   : > { %1497 = vadd.xlane.f32.xlu1 %v1496_v58  ;;  %v650_v58 = vadd.f32 %v618_v47, %v586_v45  ;;  %v647_v45 = vmul.f32 %v4190_v25, %v4190_v25  ;;  %v654_v47 = vadd.f32 %v622_v23, %v590_v20  ;;  %v4351_v25 = vld [vmem:[%s5240_s7 + $0xe0] sm:$0xff] }
  0x40   : > { %763 = vperm.xlu0 %3552, %v663_v59   ;;  %v588_v59 = vmul.f32 %v4139_v51, %v4139_v51  ;;  %5281 = vst [vmem:[#allocation19_spill] sm:$0xff] %v4351_v25 }
  0x44   : > { %773 = vperm.xlu0 %3552, %v665_v2   ;;  %v4162_v2 = vld [vmem:[%s5240_s7 + $0xe8] sm:$0xff] }
  0x45   : > { %5278 = vst [vmem:[#allocation16_spill] sm:$0xff] %v4162_v2  ;;  %v645_v9 = vmul.f32 %v4162_v2, %v4162_v2  ;;  %v4366_v2 = vld [vmem:[%s5240_s7 + $0xf0] sm:$0xff] }
  0x46   : > { %5282 = vst [vmem:[#allocation20_spill] sm:$0xff] %v4366_v2 }
  0x47   : > { %v677_v43 = vadd.f32 %v645_v9, %v613_v8  ;;  %v4227_v9 = vld [vmem:[%s5239_s6 + $0x60] sm:$0xff] }
  0x48   : > { %783 = vperm.xlu0 %3552, %v667_v7   ;;  %v675_v7 = vadd.f32 %v643_v57, %v611_v54  ;;  %v624_v54 = vmul.f32 %v4200_v37, %v4200_v37  ;;  %v4213_v57 = vld [vmem:[%s5239_s6 + $0x50] sm:$0xff]  ;;  %v596_v23 = vmul.f32 %v4227_v9, %v4227_v9 }
  0x4c   : > { %793 = vperm.xlu0 %3552, %v669_v19   ;;  %v652_v19 = vadd.f32 %v620_v60, %v588_v59 }
  0x50   : > { %803 = vperm.xlu0 %3552, %v671_v36   ;;  %688 = vperm.xlu1 %3553, %v648_v44   ;;  %v4195_v36 = vld [vmem:[%s5239_s6 + $0x40] sm:$0xff]  ;;  %v615_v44 = vmul.f32 %v4185_v24, %v4185_v24 }
  0x52   : > { %v679_v59 = vadd.f32 %v647_v45, %v615_v44  ;;  %v4241_v44 = vld [vmem:[%s5239_s6 + $0x70] sm:$0xff] }
  0x53   : > { %v4246_v45 = vld [vmem:[%s5240_s7 + $0x70] sm:$0xff] }
  0x54   : > { %813 = vperm.xlu0 %3552, %v673_v53   ;;  %698 = vperm.xlu1 %3553, %v650_v58   ;;  %v592_v53 = vmul.f32 %v4195_v36, %v4195_v36  ;;  %v4218_v58 = vld [vmem:[%s5240_s7 + $0x50] sm:$0xff] }
  0x55   : > { %v626_v8 = vmul.f32 %v4218_v58, %v4218_v58 }
  0x56   : > { %v656_v60 = vadd.f32 %v624_v54, %v592_v53  ;;  %v598_v53 = vmul.f32 %v4241_v44, %v4241_v44  ;;  %v630_v54 = vmul.f32 %v4246_v45, %v4246_v45 }
  0x58   : > { %823 = vperm.xlu0 %3552, %v675_v7   ;;  %708 = vperm.xlu1 %3553, %v652_v19   ;;  %v594_v7 = vmul.f32 %v4213_v57, %v4213_v57  ;;  %v4232_v19 = vld [vmem:[%s5240_s7 + $0x60] sm:$0xff] }
  0x5a   : > { %v658_v20 = vadd.f32 %v626_v8, %v594_v7 }
  0x5c   : > { %833 = vperm.xlu0 %3552, %v677_v43   ;;  %718 = vperm.xlu1 %3553, %v654_v47   ;;  %v628_v43 = vmul.f32 %v4232_v19, %v4232_v19 }
  0x5e   : > { %v660_v47 = vadd.f32 %v628_v43, %v596_v23  ;;  %v4276_v23 = vld [vmem:[%s5240_s7 + $0x90] sm:$0xff] }
  0x60   : > { %843 = vperm.xlu0 %3552, %v679_v59   ;;  %728 = vperm.xlu1 %3553, %v656_v60   ;;  %v4256_v59 = vld [vmem:[%s5239_s6 + $0x80] sm:$0xff] }
  0x61   : > { %v4261_v60 = vld [vmem:[%s5240_s7 + $0x80] sm:$0xff]  ;;  %v600_v7 = vmul.f32 %v4256_v59, %v4256_v59 }
  0x62   : > { %v632_v8 = vmul.f32 %v4261_v60, %v4261_v60 }
  0x64   : > { %885 = vperm.xlu0 %3552, %v3877_v0   ;;  %738 = vperm.xlu1 %3553, %v658_v20   ;;  %v662_v0 = vadd.f32 %v630_v54, %v598_v53  ;;  %v4271_v20 = vld [vmem:[%s5239_s6 + $0x90] sm:$0xff]  ;;  %v4286_v53 = vld [vmem:[%s5239_s6 + $0xa0] sm:$0xff] }
  0x65   : > { %v602_v43 = vmul.f32 %v4271_v20, %v4271_v20  ;;  %v4291_v54 = vld [vmem:[%s5240_s7 + $0xa0] sm:$0xff] }
  0x68   : > { %895 = vperm.xlu0 %3552, %v3909_v11   ;;  %748 = vperm.xlu1 %3553, %v660_v47   ;;  %v664_v11 = vadd.f32 %v632_v8, %v600_v7  ;;  %v634_v47 = vmul.f32 %v4276_v23, %v4276_v23  ;;  %v636_v7 = vmul.f32 %v4291_v54, %v4291_v54  ;;  %v4301_v8 = vld [vmem:[%s5239_s6 + $0xb0] sm:$0xff] }
  0x6c   : > { %905 = vperm.xlu0 %3552, %v3923_v16   ;;  %758 = vperm.xlu1 %3553, %v662_v0   ;;  %v666_v16 = vadd.f32 %v634_v47, %v602_v43  ;;  %v604_v0 = vmul.f32 %v4286_v53, %v4286_v53  ;;  %v638_v43 = vmul.f32 %v4306_v28, %v4306_v28  ;;  %v4316_v47 = vld [vmem:[%s5239_s6 + $0xc0] sm:$0xff] }
  0x70   : > { %915 = vperm.xlu0 %3552, %v3937_v21   ;;  %768 = vperm.xlu1 %3553, %v664_v11   ;;  %v668_v21 = vadd.f32 %v636_v7, %v604_v0  ;;  %v606_v11 = vmul.f32 %v4301_v8, %v4301_v8  ;;  %v640_v0 = vmul.f32 %v4321_v10, %v4321_v10  ;;  %v4331_v7 = vld [vmem:[%s5239_s6 + $0xd0] sm:$0xff] }
  0x74   : > { %925 = vperm.xlu0 %3552, %v3951_v26   ;;  %778 = vperm.xlu1 %3553, %v666_v16   ;;  %v670_v26 = vadd.f32 %v638_v43, %v606_v11  ;;  %v608_v16 = vmul.f32 %v4316_v47, %v4316_v47  ;;  %v642_v11 = vmul.f32 %v4336_v34, %v4336_v34  ;;  %v4346_v43 = vld [vmem:[%s5239_s6 + $0xe0] sm:$0xff] }
  0x78   : > { %935 = vperm.xlu0 %3552, %v3965_v32   ;;  %788 = vperm.xlu1 %3553, %v668_v21   ;;  %v672_v32 = vadd.f32 %v640_v0, %v608_v16  ;;  %v610_v21 = vmul.f32 %v4331_v7, %v4331_v7  ;;  %v644_v16 = vmul.f32 %v4351_v25, %v4351_v25  ;;  %v4361_v0 = vld [vmem:[%s5239_s6 + $0xf0] sm:$0xff] }
  0x7c   : > { %945 = vperm.xlu0 %3552, %v3987_v38   ;;  %798 = vperm.xlu1 %3553, %v670_v26   ;;  %v674_v38 = vadd.f32 %v642_v11, %v610_v21  ;;  %v612_v26 = vmul.f32 %v4346_v43, %v4346_v43  ;;  %v646_v21 = vmul.f32 %v4366_v2, %v4366_v2 }
  0x80   : > { %955 = vperm.xlu0 %3552, %v4009_v46   ;;  %808 = vperm.xlu1 %3553, %v672_v32   ;;  %v676_v46 = vadd.f32 %v644_v16, %v612_v26  ;;  %v614_v32 = vmul.f32 %v4361_v0, %v4361_v0 }
  0x82   : > { %v678_v11 = vadd.f32 %v646_v21, %v614_v32 }
  0x84   : > { %965 = vperm.xlu0 %3552, %v4030_v55   ;;  %818 = vperm.xlu1 %3553, %v674_v38   ;;  %v440_v55 = vld [vmem:[%s5238_s5] sm:$0x3] }
  0x85   : > { %v439_v38 = vld [vmem:[%s5237_s4] sm:$0x3]  ;;  %v511_v26 = vmul.f32 %v440_v55, %v440_v55 }
  0x86   : > { %v510_v16 = vmul.f32 %v439_v38, %v439_v38 }
  0x88   : > { %975 = vperm.xlu0 %3552, %v4045_v62   ;;  %828 = vperm.xlu1 %3553, %v676_v46   ;;  %v558_v62 = vrot.slane %v440_v55, %v3995_v40  ;;  %v512_v21 = vadd.f32 %v511_v26, %v510_v16 }
  0x8c   : > { %985 = vperm.xlu0 %3552, %v4059_v5   ;;  %838 = vperm.xlu1 %3553, %v678_v11   ;;  %v562_v5 = vrot.slane %v440_v55, %v3998_v41 }
  0x90   : > { %995 = vperm.xlu0 %3552, %v4073_v13   ;;  %880 = vperm.xlu1 %3553, %v4083_v15   ;;  %v540_v13 = vrot.slane %v439_v38, %v3995_v40  ;;  %v544_v15 = vrot.slane %v439_v38, %v3998_v41  ;;  %v526_v38 = vrot.slane %v512_v21, %v3998_v41 }
  0x94   : > { %1005 = vperm.xlu0 %3552, %v4101_v29   ;;  %890 = vperm.xlu1 %3553, %v4111_v31   ;;  %v522_v31 = vrot.slane %v512_v21, %v3995_v40 }
  0x96   : > { %v552_v46 = vpop.permute.xlu1 %551 }
  0x97   : > { %v534_v32 = vpop.permute.xlu0 %533  ;;  %v565_v11 = vmul.f32 %v558_v62, %v552_v46  ;;  %v566_v2 = vmul.f32 %v562_v5, %v552_v46 }
  0x98   : > { %v547_v25 = vmul.f32 %v540_v13, %v534_v32  ;;  %v548_v50 = vmul.f32 %v544_v15, %v534_v32  ;;  %1015 = vperm.xlu0 %3552, %v4129_v48   ;;  %900 = vperm.xlu1 %3553, %v4139_v51  }
  0x9a   : > { %v567_v55 = vadd.f32 %v565_v11, %v547_v25  ;;  %v568_v34 = vadd.f32 %v566_v2, %v548_v50  ;;  %v4411_v25 = vld [vmem:[%s421_s20] sm:$0x1] }
  0x9b   : > { %v4391_v29 = vpop.permute.xlu0 %693 }
  0x9c   : > { %1025 = vperm.xlu0 %3552, %v4157_v61   ;;  %910 = vperm.xlu1 %3553, %v4167_v3   ;;  %v569_v16 = vmul.f32 2.0, %v567_v55  ;;  %v570_v62 = vmul.f32 2.0, %v568_v34 }
  0x9f   : > { %v516_v26 = vpop.permute.xlu0 %515 }
  0xa0   : > { %v529_v48 = vadd.f32 %v522_v31, %v516_v26  ;;  %v530_v5 = vadd.f32 %v526_v38, %v516_v26  ;;  %1035 = vperm.xlu0 %3552, %v4185_v24   ;;  %920 = vperm.xlu1 %3553, %v4195_v36   ;;  %v4413_v36 = vld [vmem:[%s424_s25] sm:$0x1] }
  0xa2   : > { %v571_v51 = vsub.f32 %v529_v48, %v569_v16  ;;  %v572_v50 = vsub.f32 %v530_v5, %v570_v62 }
  0xa3   : > { %v4399_v2 = vpop.permute.xlu0 %703 }
  0xa4   : > { %v573_v61 = vmul.f32 -0.1, %v571_v51  ;;  %1083 = vperm.xlu0 %3552, %v3882_v1   ;;  %v574_v34 = vmul.f32 -0.1, %v572_v50  ;;  %930 = vperm.xlu1 %3553, %v4213_v57   ;;  %v581_v1 = vmul.f32 %v4411_v25, %v4411_v25  ;;  %v582_v57 = vmul.f32 %v4413_v36, %v4413_v36 }
  0xa6   : > { %v577_v3 = vmul.f32 1.442695, %v574_v34  ;;  %v575_v24 = vmul.f32 1.442695, %v573_v61  ;;  %v583_v46 = vadd.f32 %v582_v57, %v581_v1 }
  0xa7   : > { %v4415_v13 = vpop.permute.xlu0 %713 }
  0xa8   : > { %1093 = vperm.xlu0 %3552, %v3914_v12   ;;  %3554 = vpow2.f32 %v577_v3  ;;  %940 = vperm.xlu1 %3553, %v4227_v9   ;;  %v4432_v12 = vrot.slane %v583_v46, %v3995_v40 }
  0xa9   : > { %3556 = vpow2.f32 %v575_v24 }
  0xab   : > { %v4423_v15 = vpop.permute.xlu0 %723 }
  0xac   : > { %1103 = vperm.xlu0 %3552, %v3928_v17   ;;  %950 = vperm.xlu1 %3553, %v4241_v44  }
  0xaf   : > { %v4427_v32 = vpop.permute.xlu0 %733 }
  0xb0   : > { %1113 = vperm.xlu0 %3552, %v3942_v22   ;;  %960 = vperm.xlu1 %3553, %v4256_v59  }
  0xb3   : > { %v744_v9 = vpop.permute.xlu0 %743 }
  0xb4   : > { %v4435_v21 = vadd.f32 %v744_v9, %v4432_v12  ;;  %1123 = vperm.xlu0 %3552, %v3956_v27   ;;  %970 = vperm.xlu1 %3553, %v4271_v20  }
  0xb5   : > { %v3555_v11 = vpop.eup %3554 }
  0xb6   : > { %v3557_v17 = vpop.eup %3556  ;;  %v4439_v44 = vpack.c.bf16 %v3555_v11, %v3555_v11 }
  0xb7   : > { %v754_v55 = vpop.permute.xlu0 %753  ;;  %v579_v22 = vpack.c.bf16 %v3557_v17, %v3557_v17  ;;  %v4514_v17 = vrot.slane %v4411_v25, %v3995_v40 }
  0xb8   : > { %5283 = vst [vmem:[#allocation21_spill] sm:$0xff] %v4439_v44  ;;  %v4442_v59 = vadd.f32 %v754_v55, %v4432_v12  ;;  %1133 = vperm.xlu0 %3552, %v3970_v33   ;;  %3248 = vmatprep.subr.msk.bf16.mxu0 %vm1519_vm2, %v4439_v44  ;;  %v3761_v33 = vmov 1040203264  }
  0xb9   : > { %980 = vperm.xlu1 %3553, %v4286_v53   ;;  %v4449_v27 = vsel %vm1519_vm2, %v579_v22, 0 }
  0xba   : > { %5284 = vst [vmem:[#allocation22_spill] sm:$0xff] %v4449_v27  ;;  %1541 = vmatpush1.bf16.msra.mxu0 %v4449_v27 }
  0xbb   : > { %v764_v20 = vpop.permute.xlu0 %763 }
  0xbc   : > { %v4453_v31 = vadd.f32 %v764_v20, %v4432_v12  ;;  %1138 = vperm.xlu0 %3552, %v4232_v19  }
  0xbd   : > { %990 = vperm.xlu1 %3553, %v4301_v8   ;;  %3249 = vmatmul.mubr.msk.bf16.vlgmr.msra.gmra.mxu0 %vm1515_vm3, %v3761_v33 }
  0xbf   : > { %v774_v38 = vpop.permute.xlu0 %773 }
  0xc0   : > { %v4459_v53 = vadd.f32 %v774_v38, %v4432_v12  ;;  %1143 = vperm.xlu0 %3552, %v3992_v39  }
  0xc1   : > { %1000 = vperm.xlu1 %3553, %v4316_v47  }
  0xc3   : > { %v784_v26 = vpop.permute.xlu0 %783 }
  0xc4   : > { %v4464_v16 = vadd.f32 %v784_v26, %v4432_v12  ;;  %1148 = vperm.xlu0 %3552, %v4246_v45  }
  0xc5   : > { %1010 = vperm.xlu1 %3553, %v4331_v7  }
  0xc7   : > { %v794_v19 = vpop.permute.xlu0 %793 }
  0xc8   : > { %v4469_v8 = vadd.f32 %v794_v19, %v4432_v12  ;;  %1153 = vperm.xlu0 %3552, %v4018_v49   ;;  %v1498_v62 = vpop.xlane.xlu1 %1497 }
  0xc9   : > { %1020 = vperm.xlu1 %3553, %v4346_v43   ;;  %v1499_v39 = vrot.slane %v1498_v62, 4 }
  0xca   : > { %5285 = vst [vmem:[#allocation23_spill] sm:$0xff] %v4469_v8 }
  0xcb   : > { %v804_v48 = vpop.permute.xlu0 %803  ;;  %v1500_v47 = vadd.f32 %v1499_v39, %v1498_v62 }
  0xcc   : > { %v4474_v5 = vadd.f32 %v804_v48, %v4432_v12  ;;  %1158 = vperm.xlu0 %3552, %v4261_v60   ;;  %v689_v45 = vpop.permute.xlu1 %688  ;;  %v5292_v48 = vld [vmem:[#allocation18_spill] sm:$0xff] }
  0xcd   : > { %1030 = vperm.xlu1 %3553, %v4361_v0   ;;  %v1501_v7 = vrot.slane %v1500_v47, 2  ;;  %v4479_v51 = vadd.f32 %v689_v45, %v4432_v12 }
  0xcf   : > { %v814_v50 = vpop.permute.xlu0 %813  ;;  %v1502_v49 = vadd.f32 %v1501_v7, %v1500_v47 }
  0xd0   : > { %v4482_v43 = vadd.f32 %v814_v50, %v4432_v12  ;;  %1163 = vperm.xlu0 %3552, %v4035_v56   ;;  %v699_v61 = vpop.permute.xlu1 %698  ;;  %v5294_v50 = vld [vmem:[#allocation19_spill] sm:$0xff] }
  0xd1   : > { %1078 = vperm.xlu1 %3553, %v4088_v18   ;;  %v1503_v34 = vrot.slane %v1502_v49, 1  ;;  %v4487_v60 = vadd.f32 %v699_v61, %v4432_v12 }
  0xd2   : > { %5286 = vst [vmem:[#allocation24_spill] sm:$0xff] %v4482_v43 }
  0xd3   : > { %v824_v0 = vpop.permute.xlu0 %823  ;;  %v4489_v3 = vadd.f32 %v1503_v34, %v1502_v49 }
  0xd4   : > { %v4492_v24 = vadd.f32 %v824_v0, %v4432_v12  ;;  %1168 = vperm.xlu0 %3552, %v4276_v23   ;;  %v709_v1 = vpop.permute.xlu1 %708  ;;  %v5295_v0 = vld [vmem:[#allocation16_spill] sm:$0xff] }
  0xd5   : > { %5287 = vst [vmem:[#allocation25_spill] sm:$0xff] %v4489_v3  ;;  %1088 = vperm.xlu1 %3553, %v4116_v35   ;;  %v1505_v56 = vadd.f32 1e-08, %v4489_v3  ;;  %v4498_v18 = vadd.f32 %v709_v1, %v4432_v12  ;;  %v5296_v1 = vld [vmem:[#allocation20_spill] sm:$0xff] }
  0xd6   : > { %5288 = vst [vmem:[#allocation26_spill] sm:$0xff] %v4492_v24 }
  0xd7   : > { %v834_v57 = vpop.permute.xlu0 %833  ;;  %3558 = vrcp.f32 %v1505_v56 }
  0xd8   : > { %v4501_v46 = vadd.f32 %v834_v57, %v4432_v12  ;;  %1173 = vperm.xlu0 %3552, %v4050_v63   ;;  %v719_v9 = vpop.permute.xlu1 %718 }
  0xd9   : > { %1098 = vperm.xlu1 %3553, %v4144_v52   ;;  %v4506_v23 = vadd.f32 %v719_v9, %v4432_v12 }
  0xda   : > { %5289 = vst [vmem:[#allocation27_spill] sm:$0xff] %v4501_v46 }
  0xdb   : > { %v844_v35 = vpop.permute.xlu0 %843 }
  0xdc   : > { %v4509_v11 = vadd.f32 %v844_v35, %v4432_v12  ;;  %1178 = vperm.xlu0 %3552, %v4291_v54   ;;  %v729_v55 = vpop.permute.xlu1 %728 }
  0xdd   : > { %1108 = vperm.xlu1 %3553, %v4172_v4   ;;  %v4518_v63 = vadd.f32 %v729_v55, %v4432_v12  ;;  %v5297_v55 = vld [vmem:[#allocation17_spill] sm:$0xff] }
  0xde   : > { %5290 = vst [vmem:[#allocation28_spill] sm:$0xff] %v4509_v11 }
  0xdf   : > { %v886_v52 = vpop.permute.xlu0 %885 }
  0xe0   : > { %v4521_v22 = vmul.f32 %v4514_v17, %v886_v52  ;;  %1188 = vperm.xlu0 %3552, %v4306_v28   ;;  %v739_v20 = vpop.permute.xlu1 %738 }
  0xe1   : > { %1118 = vperm.xlu1 %3553, %v4200_v37   ;;  %v4526_v54 = vadd.f32 %v739_v20, %v4432_v12 }
  0xe3   : > { %v896_v25 = vpop.permute.xlu0 %895 }
  0xe4   : > { %v4529_v33 = vmul.f32 %v4514_v17, %v896_v25  ;;  %1193 = vperm.xlu0 %3552, %v4078_v14   ;;  %v3559_v4 = vpop.eup %3558  ;;  %v749_v38 = vpop.permute.xlu1 %748 }
  0xe5   : > { %1128 = vperm.xlu1 %3553, %v4218_v58   ;;  %v4534_v26 = vmul.f32 %v3559_v4, %v4000_v42  ;;  %v4537_v28 = vadd.f32 %v749_v38, %v4432_v12 }
  0xe7   : > { %5291 = vst [vmem:[#allocation29_spill] sm:$0xff] %v4534_v26  ;;  %v906_v37 = vpop.permute.xlu0 %905 }
  0xe8   : > { %v4540_v19 = vmul.f32 %v4514_v17, %v906_v37  ;;  %1198 = vperm.xlu0 %3552, %v4321_v10   ;;  %v759_v62 = vpop.permute.xlu1 %758 }
  0xe9   : > { %1183 = vperm.xlu1 %3553, %v4064_v6   ;;  %v4545_v14 = vadd.f32 %v759_v62, %v4432_v12  ;;  %v5293_v6 = vld [vmem:[#allocation15_spill] sm:$0xff] }
  0xeb   : > { %v916_v58 = vpop.permute.xlu0 %915 }
  0xec   : > { %v4548_v39 = vmul.f32 %v4514_v17, %v916_v58  ;;  %1203 = vperm.xlu0 %3552, %v4106_v30   ;;  %v769_v47 = vpop.permute.xlu1 %768 }
  0xed   : > { %1208 = vperm.xlu1 %3553, %v5292_v48   ;;  %v4553_v45 = vadd.f32 %v769_v47, %v4432_v12 }
  0xef   : > { %v926_v7 = vpop.permute.xlu0 %925 }
  0xf0   : > { %v4556_v10 = vmul.f32 %v4514_v17, %v926_v7  ;;  %1213 = vperm.xlu0 %3552, %v5293_v6   ;;  %v779_v49 = vpop.permute.xlu1 %778 }
  0xf1   : > { %1218 = vperm.xlu1 %3553, %v5294_v50   ;;  %v4561_v61 = vadd.f32 %v779_v49, %v4432_v12 }
  0xf3   : > { %v936_v34 = vpop.permute.xlu0 %935 }
  0xf4   : > { %v4564_v30 = vmul.f32 %v4514_v17, %v936_v34  ;;  %1223 = vperm.xlu0 %3552, %v5295_v0   ;;  %v789_v56 = vpop.permute.xlu1 %788 }
  0xf5   : > { %1228 = vperm.xlu1 %3553, %v5296_v1   ;;  %v4569_v57 = vadd.f32 %v789_v56, %v4432_v12 }
  0xf7   : > { %v946_v9 = vpop.permute.xlu0 %945 }
  0xf8   : > { %v4572_v35 = vmul.f32 %v4514_v17, %v946_v9  ;;  %1233 = vperm.xlu0 %3552, %v5297_v55   ;;  %v799_v52 = vpop.permute.xlu1 %798 }
  0xf9   : > { %v4576_v20 = vadd.f32 %v799_v52, %v4432_v12 }
  0xfb   : > { %v956_v25 = vpop.permute.xlu0 %955 }
  0xfc   : > { %v4579_v4 = vmul.f32 %v4514_v17, %v956_v25  ;;  %v809_v38 = vpop.permute.xlu1 %808 }
  0xfd   : > { %v4582_v37 = vadd.f32 %v809_v38, %v4432_v12 }
  0xff   : > { %5298 = vst [vmem:[#allocation18_spill] sm:$0xff] %v4582_v37  ;;  %v966_v62 = vpop.permute.xlu0 %965 }
 0x100   : > { %v4585_v58 = vmul.f32 %v4514_v17, %v966_v62  ;;  %v819_v48 = vpop.permute.xlu1 %818  ;;  %v5302_v62 = vlaneseq }
 0x101   : > { %v4588_v47 = vadd.f32 %v819_v48, %v4432_v12  ;;  %v5303_v48 = vmov 0 }
 0x102   : > { %vm4609_vm4 = vcmp.lt.s32.totalorder %v5302_v62, 256 }
 0x103   : > { %5299 = vst [vmem:[#allocation15_spill] sm:$0xff] %v4588_v47  ;;  %v976_v7 = vpop.permute.xlu0 %975  ;;  %v5304_v48 = vsel %vm4609_vm4, 4294967295, %v5303_v48 }
 0x104   : > { %v4591_v6 = vmul.f32 %v4514_v17, %v976_v7  ;;  %v829_v50 = vpop.permute.xlu1 %828  ;;  %5305 = vst [vmem:[#allocation20_spill] sm:$0xff] %v5304_v48 }
 0x105   : > { %v4594_v49 = vadd.f32 %v829_v50, %v4432_v12  ;;  %v3762_v50 = vmov 0.00390625  }
 0x106   : > { %1514 = vst.msk [vmem:[#allocation3] sm:$0x3] %vm4609_vm4, %v3762_v50 }
 0x107   : > { %5300 = vst [vmem:[#allocation19_spill] sm:$0xff] %v4594_v49  ;;  %v986_v34 = vpop.permute.xlu0 %985 }
 0x108   : > { %v4597_v0 = vmul.f32 %v4514_v17, %v986_v34  ;;  %v839_v1 = vpop.permute.xlu1 %838  ;;  %v3763_v34 = vmov 1.0  }
 0x109   : > { %v4600_v56 = vadd.f32 %v839_v1, %v4432_v12  ;;  %1587 = vst.msk [vmem:[#allocation5] sm:$0x1] %vm1586_vm5, %v3763_v34 }
 0x10b   : > { %5301 = vst [vmem:[#allocation16_spill] sm:$0xff] %v4600_v56  ;;  %v996_v9 = vpop.permute.xlu0 %995 }
 0x10c   : > { %v4603_v55 = vmul.f32 %v4514_v17, %v996_v9  ;;  %v881_v52 = vpop.permute.xlu1 %880 }
 0x10d   : > { %v4606_v25 = vmul.f32 %v4514_v17, %v881_v52 }
 0x10f   : > { %v1006_v38 = vpop.permute.xlu0 %1005 }
 0x110   : > { %v4614_v7 = vmul.f32 %v4514_v17, %v1006_v38  ;;  %v891_v1 = vpop.permute.xlu1 %890 }
 0x111   : > { %v4620_v9 = vmul.f32 %v4514_v17, %v891_v1 }
 0x113   : > { %v1016_v52 = vpop.permute.xlu0 %1015 }
 0x114   : > { %v4623_v62 = vmul.f32 %v4514_v17, %v1016_v52  ;;  %v901_v3 = vpop.permute.xlu1 %900  ;;  %v4639_v52 = vrot.slane %v4413_v36, %v3995_v40 }
 0x115   : > { %v4626_v42 = vmul.f32 %v4514_v17, %v901_v3 }
 0x116   : > { %5306 = vst [vmem:[#allocation17_spill] sm:$0xff] %v4623_v62 }
 0x117   : > { %v1026_v38 = vpop.permute.xlu0 %1025 }
 0x118   : > { %v4629_v41 = vmul.f32 %v4514_v17, %v1026_v38  ;;  %v911_v50 = vpop.permute.xlu1 %910 }
 0x119   : > { %v4632_v26 = vmul.f32 %v4514_v17, %v911_v50 }
 0x11a   : > { %5307 = vst [vmem:[#allocation30_spill] sm:$0xff] %v4629_v41 }
 0x11b   : > { %v1036_v34 = vpop.permute.xlu0 %1035 }
 0x11c   : > { %v4635_v1 = vmul.f32 %v4514_v17, %v1036_v34  ;;  %v921_v27 = vpop.permute.xlu1 %920  ;;  %v4651_v34 = vadd.f32 %v4391_v29, %v4432_v12 }
 0x11d   : > { %v4642_v3 = vmul.f32 %v4514_v17, %v921_v27 }
 0x11e   : > { %5308 = vst [vmem:[#allocation31_spill] sm:$0xff] %v4635_v1 }
 0x11f   : > { %v1084_v44 = vpop.permute.xlu0 %1083 }
 0x120   : > { %v1243_v38 = vmul.f32 %v4639_v52, %v1084_v44  ;;  %v931_v48 = vpop.permute.xlu1 %930 }
 0x121   : > { %v4647_v50 = vmul.f32 %v4514_v17, %v931_v48  ;;  %v4662_v48 = vadd.f32 %v4399_v2, %v4432_v12 }
 0x122   : > { %v1275_v11 = vadd.f32 %v1243_v38, %v4521_v22 }
 0x123   : > { %v1094_v56 = vpop.permute.xlu0 %1093 }
 0x124   : > { %v4653_v36 = vmul.f32 2.0, %v1275_v11  ;;  %v1245_v40 = vmul.f32 %v4639_v52, %v1094_v56  ;;  %v941_v27 = vpop.permute.xlu1 %940 }
 0x125   : > { %v1056_v22 = vmul.f32 %v4514_v17, %v941_v27 }
 0x126   : > { %v1277_v44 = vadd.f32 %v1245_v40, %v4529_v33  ;;  %v851_v33 = vadd.f32 %v4415_v13, %v4432_v12 }
 0x127   : > { %v1104_v38 = vpop.permute.xlu0 %1103 }
 0x128   : > { %v4664_v46 = vmul.f32 2.0, %v1277_v44  ;;  %v1247_v29 = vmul.f32 %v4639_v52, %v1104_v38  ;;  %v951_v11 = vpop.permute.xlu1 %950 }
 0x129   : > { %v1058_v1 = vmul.f32 %v4514_v17, %v951_v11 }
 0x12a   : > { %v1341_v56 = vsub.f32 %v4662_v48, %v4664_v46  ;;  %v1279_v49 = vadd.f32 %v1247_v29, %v4540_v19  ;;  %v853_v46 = vadd.f32 %v4423_v15, %v4432_v12 }
 0x12b   : > { %v1114_v40 = vpop.permute.xlu0 %1113 }
 0x12c   : > { %v1311_v27 = vmul.f32 2.0, %v1279_v49  ;;  %v1249_v2 = vmul.f32 %v4639_v52, %v1114_v40  ;;  %v961_v24 = vpop.permute.xlu1 %960 }
 0x12d   : > { %v1060_v38 = vmul.f32 %v4514_v17, %v961_v24 }
 0x12e   : > { %v1343_v44 = vsub.f32 %v851_v33, %v1311_v27  ;;  %v1281_v41 = vadd.f32 %v1249_v2, %v4548_v39  ;;  %v4685_v39 = vadd.f32 %v4427_v32, %v4432_v12 }
 0x12f   : > { %v1124_v47 = vpop.permute.xlu0 %1123 }
 0x130   : > { %v1313_v19 = vmul.f32 2.0, %v1281_v41  ;;  %v1251_v48 = vmul.f32 %v4639_v52, %v1124_v47  ;;  %v971_v29 = vpop.permute.xlu1 %970 }
 0x131   : > { %v4681_v49 = vmul.f32 %v4514_v17, %v971_v29 }
 0x132   : > { %v1345_v11 = vsub.f32 %v853_v46, %v1313_v19  ;;  %v1283_v13 = vadd.f32 %v1251_v48, %v4556_v10 }
 0x133   : > { %v1134_v40 = vpop.permute.xlu0 %1133 }
 0x134   : > { %v4687_v24 = vmul.f32 2.0, %v1283_v13  ;;  %v1253_v33 = vmul.f32 %v4639_v52, %v1134_v40  ;;  %v4690_v15 = vpop.permute.xlu1 %980 }
 0x136   : > { %v1285_v47 = vadd.f32 %v1253_v33, %v4564_v30 }
 0x137   : > { %v1139_v10 = vpop.permute.xlu0 %1138 }
 0x138   : > { %v4695_v27 = vmul.f32 2.0, %v1285_v47  ;;  %v1254_v2 = vmul.f32 %v4639_v52, %v1139_v10  ;;  %v4698_v46 = vpop.permute.xlu1 %990 }
 0x13a   : > { %v1286_v12 = vadd.f32 %v1254_v2, %v1056_v22 }
 0x13b   : > { %v1144_v19 = vpop.permute.xlu0 %1143 }
 0x13c   : > { %v1318_v48 = vmul.f32 2.0, %v1286_v12  ;;  %v1255_v29 = vmul.f32 %v4639_v52, %v1144_v19  ;;  %v4703_v13 = vpop.permute.xlu1 %1000 }
 0x13e   : > { %v1350_v40 = vsub.f32 %v4537_v28, %v1318_v48  ;;  %v1287_v30 = vadd.f32 %v1255_v29, %v4572_v35 }
 0x13f   : > { %v1149_v33 = vpop.permute.xlu0 %1148 }
 0x140   : > { %v1382_v47 = vmul.f32 -0.1, %v1350_v40  ;;  %v1319_v41 = vmul.f32 2.0, %v1287_v30  ;;  %v1256_v10 = vmul.f32 %v4639_v52, %v1149_v33  ;;  %v4708_v62 = vpop.permute.xlu1 %1010 }
 0x142   : > { %v1351_v32 = vsub.f32 %v4442_v59, %v1319_v41  ;;  %v1288_v22 = vadd.f32 %v1256_v10, %v1058_v1  ;;  %v1426_v2 = vmul.f32 1.442695, %v1382_v47  ;;  %v5309_v1 = vsub.f32 %v4651_v34, %v4653_v36 }
 0x143   : > { %v1154_v12 = vpop.permute.xlu0 %1153 }
 0x144   : > { %v1383_v43 = vmul.f32 -0.1, %v1351_v32  ;;  %v1320_v19 = vmul.f32 2.0, %v1288_v22  ;;  %v1257_v8 = vmul.f32 %v4639_v52, %v1154_v12  ;;  %v4712_v37 = vpop.permute.xlu1 %1020  ;;  %3560 = vpow2.f32 %v1426_v2 }
 0x145   : > { %v1371_v41 = vmul.f32 -0.1, %v5309_v1  ;;  %v1373_v32 = vmul.f32 -0.1, %v1341_v56 }
 0x146   : > { %v1428_v28 = vmul.f32 1.442695, %v1383_v43  ;;  %v1352_v35 = vsub.f32 %v4545_v14, %v1320_v19  ;;  %v1289_v48 = vadd.f32 %v1257_v8, %v4579_v4  ;;  %v1375_v14 = vmul.f32 -0.1, %v1343_v44 }
 0x147   : > { %v1159_v29 = vpop.permute.xlu0 %1158  ;;  %v1404_v12 = vmul.f32 1.442695, %v1371_v41  ;;  %v1408_v19 = vmul.f32 1.442695, %v1373_v32 }
 0x148   : > { %3562 = vpow2.f32 %v1428_v28  ;;  %v1384_v40 = vmul.f32 -0.1, %v1352_v35  ;;  %v1321_v30 = vmul.f32 2.0, %v1289_v48  ;;  %v1258_v59 = vmul.f32 %v4639_v52, %v1159_v29  ;;  %v4720_v33 = vpop.permute.xlu1 %1030 }
 0x149   : > { %v1377_v28 = vmul.f32 -0.1, %v1345_v11  ;;  %v5310_v11 = vsub.f32 %v4685_v39, %v4687_v24 }
 0x14a   : > { %v1353_v43 = vsub.f32 %v4453_v31, %v1321_v30  ;;  %v1290_v47 = vadd.f32 %v1258_v59, %v1060_v38  ;;  %v1430_v10 = vmul.f32 1.442695, %v1384_v40  ;;  %v1412_v31 = vmul.f32 1.442695, %v1375_v14 }
 0x14b   : > { %v1164_v8 = vpop.permute.xlu0 %1163  ;;  %v1416_v30 = vmul.f32 1.442695, %v1377_v28  ;;  %v1379_v59 = vmul.f32 -0.1, %v5310_v11 }
 0x14c   : > { %v1385_v4 = vmul.f32 -0.1, %v1353_v43  ;;  %v1322_v22 = vmul.f32 2.0, %v1290_v47  ;;  %v1259_v2 = vmul.f32 %v4639_v52, %v1164_v8  ;;  %v1079_v35 = vpop.permute.xlu1 %1078  ;;  %3564 = vpow2.f32 %v1430_v10 }
 0x14d   : > { %v1242_v56 = vmul.f32 %v4639_v52, %v1079_v35  ;;  %v1064_v10 = vmul.f32 %v4514_v17, %v4690_v15 }
 0x14e   : > { %v1432_v48 = vmul.f32 1.442695, %v1385_v4  ;;  %v1354_v34 = vsub.f32 %v4553_v45, %v1322_v22  ;;  %v1291_v36 = vadd.f32 %v1259_v2, %v4585_v58 }
 0x14f   : > { %v1169_v44 = vpop.permute.xlu0 %1168  ;;  %v1274_v40 = vadd.f32 %v1242_v56, %v4606_v25 }
 0x150   : > { %3566 = vpow2.f32 %v1432_v48  ;;  %v1386_v38 = vmul.f32 -0.1, %v1354_v34  ;;  %v1323_v29 = vmul.f32 2.0, %v1291_v36  ;;  %v1260_v45 = vmul.f32 %v4639_v52, %v1169_v44  ;;  %v1089_v1 = vpop.permute.xlu1 %1088 }
 0x151   : > { %3568 = vpow2.f32 %v1404_v12  ;;  %v1306_v41 = vmul.f32 2.0, %v1274_v40  ;;  %v1244_v32 = vmul.f32 %v4639_v52, %v1089_v1  ;;  %v3561_v14 = vpop.eup %3560 }
 0x152   : > { %3570 = vpow2.f32 %v1408_v19  ;;  %v1355_v58 = vsub.f32 %v4459_v53, %v1323_v29  ;;  %v1434_v43 = vmul.f32 1.442695, %v1386_v38  ;;  %v1292_v47 = vadd.f32 %v1260_v45, %v4681_v49 }
 0x153   : > { %3572 = vpow2.f32 %v1412_v31  ;;  %v1174_v25 = vpop.permute.xlu0 %1173  ;;  %v1338_v24 = vsub.f32 %v4479_v51, %v1306_v41  ;;  %v1276_v8 = vadd.f32 %v1244_v32, %v4620_v9  ;;  %v1420_v53 = vmul.f32 1.442695, %v1379_v59 }
 0x154   : > { %v1387_v39 = vmul.f32 -0.1, %v1355_v58  ;;  %3574 = vpow2.f32 %v1416_v30  ;;  %v1324_v22 = vmul.f32 2.0, %v1292_v47  ;;  %v1261_v2 = vmul.f32 %v4639_v52, %v1174_v25  ;;  %v1099_v12 = vpop.permute.xlu1 %1098 }
 0x155   : > { %v3563_v4 = vpop.eup %3562  ;;  %v1370_v28 = vmul.f32 -0.1, %v1338_v24  ;;  %v1308_v35 = vmul.f32 2.0, %v1276_v8  ;;  %3576 = vpow2.f32 %v1434_v43  ;;  %v1246_v51 = vmul.f32 %v4639_v52, %v1099_v12 }
 0x156   : > { %v4740_v19 = vpack.c.bf16 %v3563_v4, %v3561_v14  ;;  %v1436_v49 = vmul.f32 1.442695, %v1387_v39  ;;  %v1356_v15 = vsub.f32 %v4561_v61, %v1324_v22  ;;  %v1293_v48 = vadd.f32 %v1261_v2, %v4591_v6 }
 0x157   : > { %v1179_v9 = vpop.permute.xlu0 %1178  ;;  %v1402_v34 = vmul.f32 1.442695, %v1370_v28  ;;  %v1340_v36 = vsub.f32 %v4487_v60, %v1308_v35  ;;  %v5311_v31 = vsub.f32 %v4435_v21, %v4695_v27  ;;  %v1278_v40 = vadd.f32 %v1246_v51, %v4626_v42 }
 0x158   : > { %3578 = vpow2.f32 %v1436_v49  ;;  %v1262_v56 = vmul.f32 %v4639_v52, %v1179_v9  ;;  %v1388_v38 = vmul.f32 -0.1, %v1356_v15  ;;  %v1325_v29 = vmul.f32 2.0, %v1293_v48  ;;  %v1109_v61 = vpop.permute.xlu1 %1108 }
 0x159   : > { %v1381_v44 = vmul.f32 -0.1, %v5311_v31  ;;  %3580 = vpow2.f32 %v1402_v34  ;;  %v1372_v6 = vmul.f32 -0.1, %v1340_v36  ;;  %v1248_v11 = vmul.f32 %v4639_v52, %v1109_v61  ;;  %v3565_v21 = vpop.eup %3564 }
 0x15a   : > { %v1294_v30 = vadd.f32 %v1262_v56, %v1064_v10  ;;  %v1066_v59 = vmul.f32 %v4514_v17, %v4698_v46  ;;  %v1438_v60 = vmul.f32 1.442695, %v1388_v38  ;;  %v1357_v45 = vsub.f32 %v4464_v16, %v1325_v29 }
 0x15b   : > { %v1310_v1 = vmul.f32 2.0, %v1278_v40  ;;  %v1189_v58 = vpop.permute.xlu0 %1188  ;;  %v1406_v27 = vmul.f32 1.442695, %v1372_v6  ;;  %v1280_v32 = vadd.f32 %v1248_v11, %v4632_v26  ;;  %3582 = vpow2.f32 %v1420_v53 }
 0x15c   : > { %v1326_v41 = vmul.f32 2.0, %v1294_v30  ;;  %v1264_v42 = vmul.f32 %v4639_v52, %v1189_v58  ;;  %v1424_v47 = vmul.f32 1.442695, %v1381_v44  ;;  %v1389_v25 = vmul.f32 -0.1, %v1357_v45  ;;  %v1119_v10 = vpop.permute.xlu1 %1118 }
 0x15d   : > { %v3567_v43 = vpop.eup %3566  ;;  %v1342_v14 = vsub.f32 %v4498_v18, %v1310_v1  ;;  %3584 = vpow2.f32 %v1406_v27  ;;  %v1312_v24 = vmul.f32 2.0, %v1280_v32  ;;  %v1250_v2 = vmul.f32 %v4639_v52, %v1119_v10 }
 0x15e   : > { %v3569_v46 = vpop.eup %3568  ;;  %v4758_v39 = vpack.c.bf16 %v3567_v43, %v3565_v21  ;;  %v1358_v16 = vsub.f32 %v4569_v57, %v1326_v41  ;;  %v1440_v4 = vmul.f32 1.442695, %v1389_v25  ;;  %v1296_v22 = vadd.f32 %v1264_v42, %v1066_v59 }
 0x15f   : > { %v4761_v8 = vpop.eup %3570  ;;  %v1374_v26 = vmul.f32 -0.1, %v1342_v14  ;;  %v1194_v53 = vpop.permute.xlu0 %1193  ;;  %3586 = vpow2.f32 %v1438_v60  ;;  %v1344_v49 = vsub.f32 %v4506_v23, %v1312_v24  ;;  %v1282_v15 = vadd.f32 %v1250_v2, %v4642_v3 }
 0x160   : > { %v4764_v12 = vpop.eup %3572  ;;  %v1390_v18 = vmul.f32 -0.1, %v1358_v16  ;;  %v1265_v28 = vmul.f32 %v4639_v52, %v1194_v53  ;;  %3588 = vpow2.f32 %v1440_v4  ;;  %v1328_v57 = vmul.f32 2.0, %v1296_v22  ;;  %v1129_v48 = vpop.permute.xlu1 %1128 }
 0x161   : > { %v1410_v35 = vmul.f32 1.442695, %v1374_v26  ;;  %v4769_v51 = vpop.eup %3574  ;;  %v1376_v34 = vmul.f32 -0.1, %v1344_v49  ;;  %v1252_v56 = vmul.f32 %v4639_v52, %v1129_v48  ;;  %v1068_v31 = vmul.f32 %v4514_v17, %v4703_v13  ;;  %v5312_v26 = vld [vmem:[#allocation18_spill] sm:$0xff] }
 0x162   : > { %v1442_v9 = vmul.f32 1.442695, %v1390_v18  ;;  %v1297_v36 = vadd.f32 %v1265_v28, %v4603_v55  ;;  %v1360_v23 = vsub.f32 %v4576_v20, %v1328_v57  ;;  %v1314_v44 = vmul.f32 2.0, %v1282_v15  ;;  %v3577_v29 = vpop.eup %3576 }
 0x163   : > { %3590 = vpow2.f32 %v1410_v35  ;;  %v1199_v38 = vpop.permute.xlu0 %1198  ;;  %v1414_v3 = vmul.f32 1.442695, %v1376_v34  ;;  %v1284_v61 = vadd.f32 %v1252_v56, %v4647_v50  ;;  %v1072_v34 = vmul.f32 %v4514_v17, %v4712_v37 }
 0x164   : > { %3592 = vpow2.f32 %v1424_v47  ;;  %v1329_v40 = vmul.f32 2.0, %v1297_v36  ;;  %v1392_v30 = vmul.f32 -0.1, %v1360_v23  ;;  %v1346_v55 = vsub.f32 %v4518_v63, %v1314_v44  ;;  %v1184_v59 = vpop.permute.xlu1 %1183  ;;  %v5314_v36 = vld [vmem:[#allocation24_spill] sm:$0xff] }
 0x165   : > { %v3579_v6 = vpop.eup %3578  ;;  %3594 = vpow2.f32 %v1442_v9  ;;  %v1266_v11 = vmul.f32 %v4639_v52, %v1199_v38  ;;  %v1316_v60 = vmul.f32 2.0, %v1284_v61  ;;  %v1263_v50 = vmul.f32 %v4639_v52, %v1184_v59  ;;  %v5315_v61 = vld [vmem:[#allocation17_spill] sm:$0xff] }
 0x166   : > { %v4779_v13 = vpack.c.bf16 %v3579_v6, %v3577_v29  ;;  %3596 = vpow2.f32 %v1414_v3  ;;  %v1361_v20 = vsub.f32 %v4474_v5, %v1329_v40  ;;  %v3581_v45 = vpop.eup %3580  ;;  %v1446_v1 = vmul.f32 1.442695, %v1392_v30 }
 0x167   : > { %v1378_v58 = vmul.f32 -0.1, %v1346_v55  ;;  %v1298_v21 = vadd.f32 %v1266_v11, %v1068_v31  ;;  %v1204_v27 = vpop.permute.xlu0 %1203  ;;  %v4783_v41 = vpack.c.bf16 %v3569_v46, %v3581_v45  ;;  %v1348_v63 = vsub.f32 %v4526_v54, %v1316_v60 }
 0x168   : > { %v1393_v32 = vmul.f32 -0.1, %v1361_v20  ;;  %v1267_v42 = vmul.f32 %v4639_v52, %v1204_v27  ;;  %3598 = vpow2.f32 %v1446_v1  ;;  %v1295_v5 = vadd.f32 %v1263_v50, %v4597_v0  ;;  %v1209_v25 = vpop.permute.xlu1 %1208  ;;  %v4788_v14 = vpop.eup %3582  ;;  %v5316_v20 = vld [vmem:[#allocation15_spill] sm:$0xff]  ;;  %v5317_v27 = vld [vmem:[#allocation30_spill] sm:$0xff] }
 0x169   : > { %v1418_v43 = vmul.f32 1.442695, %v1378_v58  ;;  %v1330_v47 = vmul.f32 2.0, %v1298_v21  ;;  %v1380_v16 = vmul.f32 -0.1, %v1348_v63  ;;  %v1268_v46 = vmul.f32 %v4639_v52, %v1209_v25  ;;  %v5318_v25 = vld [vmem:[#allocation26_spill] sm:$0xff] }
 0x16a   : > { %v1448_v10 = vmul.f32 1.442695, %v1393_v32  ;;  %v1299_v24 = vadd.f32 %v1267_v42, %v4614_v7  ;;  %v3585_v4 = vpop.eup %3584  ;;  %v1070_v54 = vmul.f32 %v4514_v17, %v4708_v62  ;;  %v1327_v2 = vmul.f32 2.0, %v1295_v5  ;;  %v5313_v7 = vld [vmem:[#allocation23_spill] sm:$0xff] }
 0x16b   : > { %3600 = vpow2.f32 %v1418_v43  ;;  %v1362_v22 = vsub.f32 %v5312_v26, %v1330_v47  ;;  %v1214_v53 = vpop.permute.xlu0 %1213  ;;  %v4796_v0 = vpack.c.bf16 %v4761_v8, %v3585_v4  ;;  %v1422_v18 = vmul.f32 1.442695, %v1380_v16  ;;  %v5319_v16 = vld [vmem:[#allocation19_spill] sm:$0xff] }
 0x16c   : > { %3602 = vpow2.f32 %v1448_v10  ;;  %v1331_v49 = vmul.f32 2.0, %v1299_v24  ;;  %v3587_v28 = vpop.eup %3586  ;;  %v1359_v57 = vsub.f32 %v5313_v7, %v1327_v2  ;;  %v1300_v15 = vadd.f32 %v1268_v46, %v1070_v54  ;;  %v1219_v9 = vpop.permute.xlu1 %1218 }
 0x16d   : > { %v1394_v35 = vmul.f32 -0.1, %v1362_v22  ;;  %v1269_v48 = vmul.f32 %v4639_v52, %v1214_v53  ;;  %v3589_v62 = vpop.eup %3588  ;;  %3604 = vpow2.f32 %v1422_v18  ;;  %v1270_v8 = vmul.f32 %v4639_v52, %v1219_v9  ;;  %v5320_v18 = vld [vmem:[#allocation27_spill] sm:$0xff] }
 0x16e   : > { %v1363_v56 = vsub.f32 %v5314_v36, %v1331_v49  ;;  %v4804_v31 = vpack.c.bf16 %v3589_v62, %v3587_v28  ;;  %v1391_v44 = vmul.f32 -0.1, %v1359_v57  ;;  %v1332_v38 = vmul.f32 2.0, %v1300_v15 }
 0x16f   : > { %v1450_v23 = vmul.f32 1.442695, %v1394_v35  ;;  %v1224_v29 = vpop.permute.xlu0 %1223  ;;  %v1301_v6 = vadd.f32 %v1269_v48, %v5315_v61  ;;  %v1302_v30 = vadd.f32 %v1270_v8, %v1072_v34  ;;  %v1074_v42 = vmul.f32 %v4514_v17, %v4720_v33 }
 0x170   : > { %v3591_v3 = vpop.eup %3590  ;;  %v1395_v40 = vmul.f32 -0.1, %v1363_v56  ;;  %v1271_v55 = vmul.f32 %v4639_v52, %v1224_v29  ;;  %v1444_v59 = vmul.f32 1.442695, %v1391_v44  ;;  %v1364_v60 = vsub.f32 %v5316_v20, %v1332_v38  ;;  %v1229_v45 = vpop.permute.xlu1 %1228  ;;  %v5323_v29 = vld [vmem:[#allocation28_spill] sm:$0xff] }
 0x171   : > { %v3593_v11 = vpop.eup %3592  ;;  %v4809_v37 = vpack.c.bf16 %v4764_v12, %v3591_v3  ;;  %3606 = vpow2.f32 %v1450_v23  ;;  %v1333_v21 = vmul.f32 2.0, %v1301_v6  ;;  %v1334_v50 = vmul.f32 2.0, %v1302_v30 }
 0x172   : > { %v3595_v1 = vpop.eup %3594  ;;  %v1452_v58 = vmul.f32 1.442695, %v1395_v40  ;;  %v1303_v32 = vadd.f32 %v1271_v55, %v5317_v27  ;;  %3608 = vpow2.f32 %v1444_v59  ;;  %v1396_v43 = vmul.f32 -0.1, %v1364_v60  ;;  %v5324_v55 = vld [vmem:[#allocation11_spill] sm:$0xff] }
 0x173   : > { %v3597_v63 = vpop.eup %3596  ;;  %v1272_v12 = vmul.f32 %v4639_v52, %v1229_v45  ;;  %v1234_v47 = vpop.permute.xlu0 %1233  ;;  %v1365_v10 = vsub.f32 %v5318_v25, %v1333_v21  ;;  %v1366_v24 = vsub.f32 %v5319_v16, %v1334_v50  ;;  %v3764_v2 = vmov 1966171168  }
 0x174   : > { %v4817_v5 = vpack.c.bf16 %v4769_v51, %v3597_v63  ;;  %3610 = vpow2.f32 %v1452_v58  ;;  %v1454_v46 = vmul.f32 1.442695, %v1396_v43  ;;  %v1335_v4 = vmul.f32 2.0, %v1303_v32  ;;  %v5321_v51 = vld [vmem:[#allocation31_spill] sm:$0xff] }
 0x175   : > { %v1304_v54 = vadd.f32 %v1272_v12, %v1074_v42  ;;  %v1273_v26 = vmul.f32 %v4639_v52, %v1234_v47  ;;  %v3599_v22 = vpop.eup %3598  ;;  %v1397_v17 = vmul.f32 -0.1, %v1365_v10  ;;  %v1398_v33 = vmul.f32 -0.1, %v1366_v24  ;;  %v5322_v52 = vld [vmem:[#allocation16_spill] sm:$0xff] }
 0x176   : > { %v1571_v53 = vunpack.c.l.s4 %v3764_v2  ;;  %v1367_v49 = vsub.f32 %v5320_v18, %v1335_v4  ;;  %3612 = vpow2.f32 %v1454_v46 }
 0x177   : > { %v1336_v28 = vmul.f32 2.0, %v1304_v54  ;;  %v1305_v35 = vadd.f32 %v1273_v26, %v5321_v51  ;;  %v1456_v57 = vmul.f32 1.442695, %v1397_v17  ;;  %v1458_v15 = vmul.f32 1.442695, %v1398_v33 }
 0x178   : > { %v3601_v7 = vpop.eup %3600  ;;  %v1399_v62 = vmul.f32 -0.1, %v1367_v49  ;;  %v1572_v8 = vunpack.c.0.s8 %v1571_v53 }
 0x179   : > { %v3603_v48 = vpop.eup %3602  ;;  %v4825_v9 = vpack.c.bf16 %v4788_v14, %v3601_v7  ;;  %v1368_v34 = vsub.f32 %v5322_v52, %v1336_v28  ;;  %v1337_v36 = vmul.f32 2.0, %v1305_v35  ;;  %3614 = vpow2.f32 %v1456_v57 }
 0x17a   : > { %v4828_v56 = vpack.c.bf16 %v3603_v48, %v3599_v22  ;;  %v3605_v23 = vpop.eup %3604  ;;  %v1460_v44 = vmul.f32 1.442695, %v1399_v62  ;;  %3616 = vpow2.f32 %v1458_v15  ;;  %v4834_v59 = vsub.s32 %v1572_v8, %v5324_v55 }
 0x17b   : > { %v1400_v38 = vmul.f32 -0.1, %v1368_v34  ;;  %v1369_v3 = vsub.f32 %v5323_v29, %v1337_v36  ;;  %v4831_v40 = vpack.c.bf16 %v3593_v11, %v3605_v23 }
 0x17c   : > { %3618 = vpow2.f32 %v1460_v44 }
 0x17d   : > { %v1462_v61 = vmul.f32 1.442695, %v1400_v38  ;;  %v1401_v14 = vmul.f32 -0.1, %v1369_v3  ;;  %v1560_v6 = vpop.f32.mrf.mxu0 }
 0x17e   : > { %v3607_v30 = vpop.eup %3606 }
 0x17f   : > { %v1464_v20 = vmul.f32 1.442695, %v1401_v14  ;;  %v1562_v60 = vpop.f32.mrf.mxu0  ;;  %v3609_v45 = vpop.eup %3608  ;;  %3620 = vpow2.f32 %v1462_v61 }
 0x180   : > { %v1569_v58 = vcombine.low %v1560_v6, %v1562_v60  ;;  %v4836_v50 = vpack.c.bf16 %v3609_v45, %v3595_v1 }
 0x181   : > { %v3611_v21 = vpop.eup %3610  ;;  %3622 = vpow2.f32 %v1464_v20  ;;  %v1564_v11 = vpop.f32.mrf.mxu0 }
 0x182   : > { %v4838_v27 = vpack.c.bf16 %v3611_v21, %v3607_v30  ;;  %v1576_v32 = vrot.slane %v1569_v58, %v4834_v59 }
 0x183   : > { %v1565_v63 = vpop.f32.mrf.mxu0  ;;  %v3613_v43 = vpop.eup %3612 }
 0x184   : > { %v1583_v42 = vrot.slane %v1576_v32, %v4834_v59 }
 0x186   : > { %1585 = vst.msk [vmem:[#allocation4] sm:$0x3] %vm4609_vm4, %v1583_v42  ;;  %v3615_v47 = vpop.eup %3614 }
 0x187   : > { %v4844_v25 = vpack.c.bf16 %v3615_v47, %v3613_v43  ;;  %v3617_v10 = vpop.eup %3616 }
 0x189   : > { %v3619_v1 = vpop.eup %3618 }
 0x18a   : > { %v4846_v16 = vpack.c.bf16 %v3619_v1, %v3617_v10 }
 0x18c   : > { %v3621_v24 = vpop.eup %3620 }
 0x18e   : > { %v3623_v46 = vpop.eup %3622 }
 0x18f   : > { %v4848_v4 = vpack.c.bf16 %v3623_v46, %v3621_v24 }
 0x190 LB: >> { %v1594_v54 = vld [vmem:[#allocation5] sm:$0x1]  ;;  %s3757_s11 = sphi %s4854_s11, %s1593_s11  }
 0x191   : >> { %3493 = vpush %v1594_v54 }
 0x1c2   : >> { %s3494_s26 = spop %3493 }
 0x1c3   : >> { %p1597_p11 = scmp.gt.f32.partialorder %s3494_s26, 0.5 }
 0x1c4   : >> { %3273 = vmatprep.subr.bf16.mxu0 (%p1597_p11), %v4848_v4  ;;  %v1603_v26 = vld [vmem:[#allocation4] sm:$0x3] (%p1597_p11)  ;;  %v5327_v33 = vld [vmem:[#allocation22_spill] sm:$0xff] (%p1597_p11)  ;;  %v5330_v57 = vld [vmem:[#allocation12_spill] sm:$0xff] (%p1597_p11)  ;;  %v3765_v52 = vmov (%p1597_p11), 0   ;;  %vm3766_vm7 = vmmov (%p1597_p11), 1  }
 0x1c5   : >> { %1600 = sbr.rel (!%p1597_p11) target bundleno = 5150 (0x141e), region = 71  ;;  %v5326_v22 = vld [vmem:[#allocation21_spill] sm:$0xff] (%p1597_p11)  ;;  %3274 = vmatpush3.bf16.msra.mxu0 (%p1597_p11), %v4758_v39  ;;  %v1604_v17 = vadd.f32 (%p1597_p11), 1e-16, %v1603_v26  ;;  %1704 = vmatprep.mubr.bf16.mxu1 (%p1597_p11), %v3765_v52 }
 0x1c6   : >> { %3250 = vmatprep.subr.msk.bf16.mxu1 (%p1597_p11), %vm1519_vm2, %v5326_v22  ;;  %3275 = vmatprep.subr.bf16.mxu0 (%p1597_p11), %v4846_v16  ;;  %v5328_v28 = vld [vmem:[#allocation29_spill] sm:$0xff] (%p1597_p11) }
 0x1c7   : >> { %1687 = vmatpush1.bf16.msra.mxu1 (%p1597_p11), %v5327_v33  ;;  %3626 = vrcp.f32 (%p1597_p11), %v1604_v17  ;;  %v5329_v35 = vld [vmem:[#allocation13_spill] sm:$0xff] (%p1597_p11)  ;;  %3624 = vset.pattern.permute.xlu1 (%p1597_p11), %v3765_v52 }
 0x1c8   : >> { %3295 = vmatprep.subr.bf16.mxu1 (%p1597_p11), %v4848_v4  ;;  %3625 = vset.pattern.permute.xlu0 (%p1597_p11), %v3765_v52 }
 0x1c9   : >> { %3276 = vmatpush3.bf16.msra.mxu0 (%p1597_p11), %v4740_v19 }
 0x1ca   : >> { %3277 = vmatprep.subr.bf16.mxu0 %v4844_v25 }
 0x1cd   : >> { %3278 = vmatpush3.bf16.msra.mxu0 %v4831_v40 }
 0x1ce   : >> { %3279 = vmatprep.subr.bf16.mxu0 %v4838_v27 }
 0x1d1   : >> { %3280 = vmatpush3.bf16.msra.mxu0 %v4825_v9 }
 0x1d2   : >> { %3281 = vmatprep.subr.bf16.mxu0 %v4828_v56 }
 0x1d4   : >> { %v3627_v2 = vpop.eup %3626 }
 0x1d5   : >> { %3282 = vmatpush3.bf16.msra.mxu0 %v4817_v5  ;;  %v1606_v53 = vmul.f32 %v3627_v2, %v1604_v17 }
 0x1d6   : >> { %3283 = vmatprep.subr.bf16.mxu0 %v4836_v50 }
 0x1d7   : >> { %v1607_v18 = vsub.f32 2.0, %v1606_v53 }
 0x1d9   : >> { %3284 = vmatpush3.bf16.msra.mxu0 %v4809_v37  ;;  %v1608_v49 = vmul.f32 %v3627_v2, %v1607_v18 }
 0x1da   : >> { %3285 = vmatprep.subr.bf16.mxu0 %v4804_v31 }
 0x1db   : >> { %v1609_v51 = vmul.f32 %v1608_v49, %v5328_v28 }
 0x1dd   : >> { %3286 = vmatpush3.bf16.msra.mxu0 %v4796_v0  ;;  %v1618_v7 = vrot.slane %v1609_v51, %v5329_v35  ;;  %v1614_v15 = vrot.slane %v1609_v51, %v5330_v57 }
 0x1de   : >> { %3287 = vmatprep.subr.bf16.mxu0 %v4779_v13 }
 0x1df   : >> { %v1622_v48 = vpack.c.bf16 %v1618_v7, %v1618_v7  ;;  %v1621_v62 = vpack.c.bf16 %v1614_v15, %v1614_v15 }
 0x1e1   : >> { %3288 = vmatpush3.bf16.msra.mxu0 %v4783_v41  ;;  %1655 = vmatprep.mubr.bf16.mxu0 %v1622_v48 }
 0x1e2   : >> { %3252 = vmatprep.subr.msk.bf16.mxu0 %vm1519_vm2, %v5326_v22 }
 0x1e4   : >> { %1656 = vmatmul.mubr.bf16.vlgmr.msra.gmra.mxu0 %v1621_v62 }
 0x1e5   : >> { %1817 = vmatpush1.bf16.msra.mxu0 %v5327_v33  ;;  %1834 = vmatprep.mubr.bf16.mxu0 %v3765_v52 }
 0x1e6   : >> { %3254 = vmatprep.subr.msk.bf16.mxu0 %vm1519_vm2, %v5326_v22 }
 0x2a4   : >> { %v3289_v34 = vpop.f32.mrf.mxu0 }
 0x2a6   : >> { %v3290_v36 = vpop.f32.mrf.mxu0 }
 0x2a7   : >> { %v3291_v8 = vadd.f32 %v3290_v36, %v3289_v34 }
 0x2a8   : >> { %v3292_v23 = vpop.f32.mrf.mxu0 }
 0x2a9   : >> { %v1658_v44 = vadd.f32 1e-16, %v3291_v8 }
 0x2aa   : >> { %v3293_v38 = vpop.f32.mrf.mxu0 }
 0x2ab   : >> { %3628 = vrcp.f32 %v1658_v44 }
 0x2b8   : >> { %v3629_v29 = vpop.eup %3628 }
 0x2b9   : >> { %v1664_v3 = vmul.f32 %v3629_v29, %v1658_v44 }
 0x2bb   : >> { %v1665_v61 = vsub.f32 2.0, %v1664_v3 }
 0x2bd   : >> { %v1666_v14 = vmul.f32 %v3629_v29, %v1665_v61 }
 0x2bf   : >> { %v1667_v6 = vmul.f32 0.125, %v1666_v14 }
 0x2c1   : >> { %v1668_v30 = vpack.c.bf16 %v1667_v6, %v1667_v6 }
 0x2c3   : >> { %3251 = vmatmul.mubr.msk.bf16.vlgmr.msra.gmra.mxu1 %vm1515_vm3, %v1668_v30 }
 0x2c4   : >> { %3296 = vmatpush3.bf16.msra.mxu1 %v4758_v39 }
 0x2c5   : >> { %3297 = vmatprep.subr.bf16.mxu1 %v4846_v16 }
 0x2c8   : >> { %3298 = vmatpush3.bf16.msra.mxu1 %v4740_v19 }
 0x2c9   : >> { %3299 = vmatprep.subr.bf16.mxu1 %v4844_v25 }
 0x2cc   : >> { %3300 = vmatpush3.bf16.msra.mxu1 %v4831_v40 }
 0x2cd   : >> { %3301 = vmatprep.subr.bf16.mxu1 %v4838_v27 }
 0x2d0   : >> { %3302 = vmatpush3.bf16.msra.mxu1 %v4825_v9 }
 0x2d1   : >> { %3303 = vmatprep.subr.bf16.mxu1 %v4828_v56 }
 0x2d4   : >> { %3304 = vmatpush3.bf16.msra.mxu1 %v4817_v5 }
 0x2d5   : >> { %3305 = vmatprep.subr.bf16.mxu1 %v4836_v50 }
 0x2d8   : >> { %3306 = vmatpush3.bf16.msra.mxu1 %v4809_v37 }
 0x2d9   : >> { %3307 = vmatprep.subr.bf16.mxu1 %v4804_v31 }
 0x2dc   : >> { %3308 = vmatpush3.bf16.msra.mxu1 %v4796_v0 }
 0x2dd   : >> { %3309 = vmatprep.subr.bf16.mxu1 %v4779_v13 }
 0x2e0   : >> { %3310 = vmatpush3.bf16.msra.mxu1 %v4783_v41 }
 0x2e1   : >> { %3317 = vmatprep.subr.bf16.mxu1 %v4848_v4 }
 0x383   : >> { %v1706_v55 = vpop.f32.mrf.mxu1 }
 0x384   : >> { %v1707_v20 = vadd.f32 1e-16, %v1706_v55 }
 0x385   : >> { %v1708_v60 = vpop.f32.mrf.mxu1 }
 0x386   : >> { %3630 = vrcp.f32 %v1707_v20  ;;  %v1709_v45 = vadd.f32 1e-16, %v1708_v60 }
 0x387   : >> { %v1710_v58 = vpop.f32.mrf.mxu1 }
 0x388   : >> { %3632 = vrcp.f32 %v1709_v45 }
 0x389   : >> { %v1711_v21 = vpop.f32.mrf.mxu1 }
 0x393   : >> { %v3631_v11 = vpop.eup %3630 }
 0x394   : >> { %v1715_v32 = vmul.f32 %v3631_v11, %v1707_v20 }
 0x395   : >> { %v3633_v63 = vpop.eup %3632 }
 0x396   : >> { %v1717_v42 = vsub.f32 2.0, %v1715_v32  ;;  %v1716_v43 = vmul.f32 %v3633_v63, %v1709_v45 }
 0x398   : >> { %v1718_v12 = vsub.f32 2.0, %v1716_v43  ;;  %v1719_v47 = vmul.f32 %v3631_v11, %v1717_v42 }
 0x39a   : >> { %v1720_v10 = vmul.f32 %v3633_v63, %v1718_v12 }
 0x39c   : >> { %v1723_v1 = vcombine.low %v1719_v47, %v1720_v10 }
 0x39e   : >> { %v1730_v24 = vrot.slane %v1723_v1, %v4834_v59 }
 0x3a0   : >> { %v1737_v46 = vrot.slane %v1730_v24, %v4834_v59 }
 0x3a2   : >> { %v1739_v54 = vmul.f32 %v1737_v46, %v5328_v28 }
 0x3a4   : >> { %v1748_v26 = vrot.slane %v1739_v54, %v5329_v35  ;;  %v1744_v17 = vrot.slane %v1739_v54, %v5330_v57 }
 0x3a6   : >> { %v1752_v2 = vpack.c.bf16 %v1748_v26, %v1748_v26  ;;  %v1751_v53 = vpack.c.bf16 %v1744_v17, %v1744_v17 }
 0x3a8   : >> { %1785 = vmatprep.mubr.bf16.mxu1 %v1752_v2 }
 0x3a9   : >> { %1786 = vmatmul.mubr.bf16.vlgmr.msra.gmra.mxu1 %v1751_v53 }
 0x3aa   : >> { %3318 = vmatpush3.bf16.msra.mxu1 %v4758_v39 }
 0x3ab   : >> { %3319 = vmatprep.subr.bf16.mxu1 %v4846_v16 }
 0x3ae   : >> { %3320 = vmatpush3.bf16.msra.mxu1 %v4740_v19 }
 0x3af   : >> { %3321 = vmatprep.subr.bf16.mxu1 %v4844_v25 }
 0x3b2   : >> { %3322 = vmatpush3.bf16.msra.mxu1 %v4831_v40 }
 0x3b3   : >> { %3323 = vmatprep.subr.bf16.mxu1 %v4838_v27 }
 0x3b6   : >> { %3324 = vmatpush3.bf16.msra.mxu1 %v4825_v9 }
 0x3b7   : >> { %3325 = vmatprep.subr.bf16.mxu1 %v4828_v56 }
 0x3ba   : >> { %3326 = vmatpush3.bf16.msra.mxu1 %v4817_v5 }
 0x3bb   : >> { %3327 = vmatprep.subr.bf16.mxu1 %v4836_v50 }
 0x3be   : >> { %3328 = vmatpush3.bf16.msra.mxu1 %v4809_v37 }
 0x3bf   : >> { %3329 = vmatprep.subr.bf16.mxu1 %v4804_v31 }
 0x3c2   : >> { %3330 = vmatpush3.bf16.msra.mxu1 %v4796_v0 }
 0x3c3   : >> { %3331 = vmatprep.subr.bf16.mxu1 %v4779_v13 }
 0x3c6   : >> { %3332 = vmatpush3.bf16.msra.mxu1 %v4783_v41 }
 0x3c7   : >> { %3256 = vmatprep.subr.msk.bf16.mxu1 %vm1519_vm2, %v5326_v22 }
 0x469   : >> { %v3311_v18 = vpop.f32.mrf.mxu1 }
 0x46b   : >> { %v3312_v49 = vpop.f32.mrf.mxu1 }
 0x46c   : >> { %v3313_v51 = vadd.f32 %v3312_v49, %v3311_v18 }
 0x46d   : >> { %v3314_v7 = vpop.f32.mrf.mxu1 }
 0x46e   : >> { %v1788_v15 = vadd.f32 1e-16, %v3313_v51 }
 0x46f   : >> { %v3315_v48 = vpop.f32.mrf.mxu1 }
 0x470   : >> { %3634 = vrcp.f32 %v1788_v15 }
 0x47d   : >> { %v3635_v62 = vpop.eup %3634 }
 0x47e   : >> { %v1794_v34 = vmul.f32 %v3635_v62, %v1788_v15 }
 0x480   : >> { %v1795_v36 = vsub.f32 2.0, %v1794_v34 }
 0x482   : >> { %v1796_v8 = vmul.f32 %v3635_v62, %v1795_v36 }
 0x484   : >> { %v1797_v23 = vmul.f32 0.125, %v1796_v8 }
 0x486   : >> { %v1798_v44 = vpack.c.bf16 %v1797_v23, %v1797_v23 }
 0x488   : >> { %3253 = vmatmul.mubr.msk.bf16.vlgmr.msra.gmra.mxu0 %vm1515_vm3, %v1798_v44 }
 0x489   : >> { %1947 = vmatpush1.bf16.msra.mxu0 %v5327_v33  ;;  %1964 = vmatprep.mubr.bf16.mxu0 %v3765_v52 }
 0x48a   : >> { %3339 = vmatprep.subr.bf16.mxu0 %v4848_v4 }
 0x548   : >> { %v1836_v38 = vpop.f32.mrf.mxu0 }
 0x549   : >> { %v1837_v29 = vadd.f32 1e-16, %v1836_v38 }
 0x54a   : >> { %v1838_v3 = vpop.f32.mrf.mxu0 }
 0x54b   : >> { %3636 = vrcp.f32 %v1837_v29  ;;  %v1839_v61 = vadd.f32 1e-16, %v1838_v3 }
 0x54c   : >> { %v1840_v14 = vpop.f32.mrf.mxu0 }
 0x54d   : >> { %3638 = vrcp.f32 %v1839_v61 }
 0x54e   : >> { %v1841_v6 = vpop.f32.mrf.mxu0 }
 0x558   : >> { %v3637_v30 = vpop.eup %3636 }
 0x559   : >> { %v1845_v55 = vmul.f32 %v3637_v30, %v1837_v29 }
 0x55a   : >> { %v3639_v20 = vpop.eup %3638 }
 0x55b   : >> { %v1847_v60 = vsub.f32 2.0, %v1845_v55  ;;  %v1846_v45 = vmul.f32 %v3639_v20, %v1839_v61 }
 0x55d   : >> { %v1848_v58 = vsub.f32 2.0, %v1846_v45  ;;  %v1849_v21 = vmul.f32 %v3637_v30, %v1847_v60 }
 0x55f   : >> { %v1850_v11 = vmul.f32 %v3639_v20, %v1848_v58 }
 0x561   : >> { %v1853_v32 = vcombine.low %v1849_v21, %v1850_v11 }
 0x563   : >> { %v1860_v63 = vrot.slane %v1853_v32, %v4834_v59 }
 0x565   : >> { %v1867_v42 = vrot.slane %v1860_v63, %v4834_v59 }
 0x567   : >> { %v1869_v43 = vmul.f32 %v1867_v42, %v5328_v28 }
 0x569   : >> { %v1878_v12 = vrot.slane %v1869_v43, %v5329_v35  ;;  %v1874_v47 = vrot.slane %v1869_v43, %v5330_v57 }
 0x56b   : >> { %v1882_v10 = vpack.c.bf16 %v1878_v12, %v1878_v12  ;;  %v1881_v1 = vpack.c.bf16 %v1874_v47, %v1874_v47 }
 0x56d   : >> { %1915 = vmatprep.mubr.bf16.mxu1 %v1882_v10 }
 0x56e   : >> { %1916 = vmatmul.mubr.bf16.vlgmr.msra.gmra.mxu1 %v1881_v1 }
 0x56f   : >> { %2077 = vmatpush1.bf16.msra.mxu1 %v5327_v33  ;;  %2094 = vmatprep.mubr.bf16.mxu1 %v3765_v52 }
 0x570   : >> { %3361 = vmatprep.subr.bf16.mxu1 %v4848_v4 }
 0x62e   : >> { %v3333_v24 = vpop.f32.mrf.mxu1 }
 0x630   : >> { %v3334_v46 = vpop.f32.mrf.mxu1 }
 0x631   : >> { %v3335_v54 = vadd.f32 %v3334_v46, %v3333_v24 }
 0x632   : >> { %v3336_v26 = vpop.f32.mrf.mxu1 }
 0x633   : >> { %v1918_v17 = vadd.f32 1e-16, %v3335_v54 }
 0x634   : >> { %v3337_v2 = vpop.f32.mrf.mxu1 }
 0x635   : >> { %3640 = vrcp.f32 %v1918_v17 }
 0x642   : >> { %v3641_v53 = vpop.eup %3640 }
 0x643   : >> { %v1924_v18 = vmul.f32 %v3641_v53, %v1918_v17 }
 0x645   : >> { %v1925_v49 = vsub.f32 2.0, %v1924_v18 }
 0x647   : >> { %v1926_v51 = vmul.f32 %v3641_v53, %v1925_v49 }
 0x649   : >> { %v1927_v7 = vmul.f32 0.125, %v1926_v51 }
 0x64b   : >> { %v1928_v15 = vpack.c.bf16 %v1927_v7, %v1927_v7 }
 0x64d   : >> { %3255 = vmatmul.mubr.msk.bf16.vlgmr.msra.gmra.mxu0 %vm1515_vm3, %v1928_v15 }
 0x64e   : >> { %3340 = vmatpush3.bf16.msra.mxu0 %v4758_v39 }
 0x64f   : >> { %3341 = vmatprep.subr.bf16.mxu0 %v4846_v16 }
 0x652   : >> { %3342 = vmatpush3.bf16.msra.mxu0 %v4740_v19 }
 0x653   : >> { %3343 = vmatprep.subr.bf16.mxu0 %v4844_v25 }
 0x656   : >> { %3344 = vmatpush3.bf16.msra.mxu0 %v4831_v40 }
 0x657   : >> { %3345 = vmatprep.subr.bf16.mxu0 %v4838_v27 }
 0x65a   : >> { %3346 = vmatpush3.bf16.msra.mxu0 %v4825_v9 }
 0x65b   : >> { %3347 = vmatprep.subr.bf16.mxu0 %v4828_v56 }
 0x65e   : >> { %3348 = vmatpush3.bf16.msra.mxu0 %v4817_v5 }
 0x65f   : >> { %3349 = vmatprep.subr.bf16.mxu0 %v4836_v50 }
 0x662   : >> { %3350 = vmatpush3.bf16.msra.mxu0 %v4809_v37 }
 0x663   : >> { %3351 = vmatprep.subr.bf16.mxu0 %v4804_v31 }
 0x666   : >> { %3352 = vmatpush3.bf16.msra.mxu0 %v4796_v0 }
 0x667   : >> { %3353 = vmatprep.subr.bf16.mxu0 %v4779_v13 }
 0x66a   : >> { %3354 = vmatpush3.bf16.msra.mxu0 %v4783_v41 }
 0x66b   : >> { %3258 = vmatprep.subr.msk.bf16.mxu0 %vm1519_vm2, %v5326_v22 }
 0x70d   : >> { %v1966_v48 = vpop.f32.mrf.mxu0 }
 0x70e   : >> { %v1967_v62 = vadd.f32 1e-16, %v1966_v48 }
 0x70f   : >> { %v1968_v34 = vpop.f32.mrf.mxu0 }
 0x710   : >> { %3642 = vrcp.f32 %v1967_v62  ;;  %v1969_v36 = vadd.f32 1e-16, %v1968_v34 }
 0x711   : >> { %v1970_v8 = vpop.f32.mrf.mxu0 }
 0x712   : >> { %3644 = vrcp.f32 %v1969_v36 }
 0x713   : >> { %v1971_v23 = vpop.f32.mrf.mxu0 }
 0x71d   : >> { %v3643_v44 = vpop.eup %3642 }
 0x71e   : >> { %v1975_v38 = vmul.f32 %v3643_v44, %v1967_v62 }
 0x71f   : >> { %v3645_v29 = vpop.eup %3644 }
 0x720   : >> { %v1977_v3 = vsub.f32 2.0, %v1975_v38  ;;  %v1976_v61 = vmul.f32 %v3645_v29, %v1969_v36 }
 0x722   : >> { %v1978_v14 = vsub.f32 2.0, %v1976_v61  ;;  %v1979_v6 = vmul.f32 %v3643_v44, %v1977_v3 }
 0x724   : >> { %v1980_v30 = vmul.f32 %v3645_v29, %v1978_v14 }
 0x726   : >> { %v1983_v55 = vcombine.low %v1979_v6, %v1980_v30 }
 0x728   : >> { %v1990_v20 = vrot.slane %v1983_v55, %v4834_v59 }
 0x72a   : >> { %v1997_v60 = vrot.slane %v1990_v20, %v4834_v59 }
 0x72c   : >> { %v1999_v45 = vmul.f32 %v1997_v60, %v5328_v28 }
 0x72e   : >> { %v2008_v58 = vrot.slane %v1999_v45, %v5329_v35  ;;  %v2004_v21 = vrot.slane %v1999_v45, %v5330_v57 }
 0x730   : >> { %v2012_v11 = vpack.c.bf16 %v2008_v58, %v2008_v58  ;;  %v2011_v32 = vpack.c.bf16 %v2004_v21, %v2004_v21 }
 0x732   : >> { %2045 = vmatprep.mubr.bf16.mxu0 %v2012_v11 }
 0x733   : >> { %2046 = vmatmul.mubr.bf16.vlgmr.msra.gmra.mxu0 %v2011_v32 }
 0x734   : >> { %2207 = vmatpush1.bf16.msra.mxu0 %v5327_v33  ;;  %2224 = vmatprep.mubr.bf16.mxu0 %v3765_v52 }
 0x735   : >> { %3383 = vmatprep.subr.bf16.mxu0 %v4848_v4 }
 0x7f3   : >> { %v3355_v63 = vpop.f32.mrf.mxu0 }
 0x7f5   : >> { %v3356_v42 = vpop.f32.mrf.mxu0 }
 0x7f6   : >> { %v3357_v43 = vadd.f32 %v3356_v42, %v3355_v63 }
 0x7f7   : >> { %v3358_v12 = vpop.f32.mrf.mxu0 }
 0x7f8   : >> { %v2048_v47 = vadd.f32 1e-16, %v3357_v43 }
 0x7f9   : >> { %v3359_v10 = vpop.f32.mrf.mxu0 }
 0x7fa   : >> { %3646 = vrcp.f32 %v2048_v47 }
 0x807   : >> { %v3647_v1 = vpop.eup %3646 }
 0x808   : >> { %v2054_v24 = vmul.f32 %v3647_v1, %v2048_v47 }
 0x80a   : >> { %v2055_v46 = vsub.f32 2.0, %v2054_v24 }
 0x80c   : >> { %v2056_v54 = vmul.f32 %v3647_v1, %v2055_v46 }
 0x80e   : >> { %v2057_v26 = vmul.f32 0.125, %v2056_v54 }
 0x810   : >> { %v2058_v17 = vpack.c.bf16 %v2057_v26, %v2057_v26 }
 0x812   : >> { %3257 = vmatmul.mubr.msk.bf16.vlgmr.msra.gmra.mxu1 %vm1515_vm3, %v2058_v17 }
 0x813   : >> { %3362 = vmatpush3.bf16.msra.mxu1 %v4758_v39 }
 0x814   : >> { %3363 = vmatprep.subr.bf16.mxu1 %v4846_v16 }
 0x817   : >> { %3364 = vmatpush3.bf16.msra.mxu1 %v4740_v19 }
 0x818   : >> { %3365 = vmatprep.subr.bf16.mxu1 %v4844_v25 }
 0x81b   : >> { %3366 = vmatpush3.bf16.msra.mxu1 %v4831_v40 }
 0x81c   : >> { %3367 = vmatprep.subr.bf16.mxu1 %v4838_v27 }
 0x81f   : >> { %3368 = vmatpush3.bf16.msra.mxu1 %v4825_v9 }
 0x820   : >> { %3369 = vmatprep.subr.bf16.mxu1 %v4828_v56 }
 0x823   : >> { %3370 = vmatpush3.bf16.msra.mxu1 %v4817_v5 }
 0x824   : >> { %3371 = vmatprep.subr.bf16.mxu1 %v4836_v50 }
 0x827   : >> { %3372 = vmatpush3.bf16.msra.mxu1 %v4809_v37 }
 0x828   : >> { %3373 = vmatprep.subr.bf16.mxu1 %v4804_v31 }
 0x82b   : >> { %3374 = vmatpush3.bf16.msra.mxu1 %v4796_v0 }
 0x82c   : >> { %3375 = vmatprep.subr.bf16.mxu1 %v4779_v13 }
 0x82f   : >> { %3376 = vmatpush3.bf16.msra.mxu1 %v4783_v41 }
 0x830   : >> { %3260 = vmatprep.subr.msk.bf16.mxu1 %vm1519_vm2, %v5326_v22 }
 0x8d2   : >> { %v2096_v2 = vpop.f32.mrf.mxu1 }
 0x8d3   : >> { %v2097_v53 = vadd.f32 1e-16, %v2096_v2 }
 0x8d4   : >> { %v2098_v18 = vpop.f32.mrf.mxu1 }
 0x8d5   : >> { %3648 = vrcp.f32 %v2097_v53  ;;  %v2099_v49 = vadd.f32 1e-16, %v2098_v18 }
 0x8d6   : >> { %v2100_v51 = vpop.f32.mrf.mxu1 }
 0x8d7   : >> { %3650 = vrcp.f32 %v2099_v49 }
 0x8d8   : >> { %v2101_v7 = vpop.f32.mrf.mxu1 }
 0x8e2   : >> { %v3649_v15 = vpop.eup %3648 }
 0x8e3   : >> { %v2105_v48 = vmul.f32 %v3649_v15, %v2097_v53 }
 0x8e4   : >> { %v3651_v62 = vpop.eup %3650 }
 0x8e5   : >> { %v2107_v34 = vsub.f32 2.0, %v2105_v48  ;;  %v2106_v36 = vmul.f32 %v3651_v62, %v2099_v49 }
 0x8e7   : >> { %v2108_v8 = vsub.f32 2.0, %v2106_v36  ;;  %v2109_v23 = vmul.f32 %v3649_v15, %v2107_v34 }
 0x8e9   : >> { %v2110_v44 = vmul.f32 %v3651_v62, %v2108_v8 }
 0x8eb   : >> { %v2113_v38 = vcombine.low %v2109_v23, %v2110_v44 }
 0x8ed   : >> { %v2120_v29 = vrot.slane %v2113_v38, %v4834_v59 }
 0x8ef   : >> { %v2127_v3 = vrot.slane %v2120_v29, %v4834_v59 }
 0x8f1   : >> { %v2129_v61 = vmul.f32 %v2127_v3, %v5328_v28 }
 0x8f3   : >> { %v2138_v14 = vrot.slane %v2129_v61, %v5329_v35  ;;  %v2134_v6 = vrot.slane %v2129_v61, %v5330_v57 }
 0x8f5   : >> { %v2142_v30 = vpack.c.bf16 %v2138_v14, %v2138_v14  ;;  %v2141_v55 = vpack.c.bf16 %v2134_v6, %v2134_v6 }
 0x8f7   : >> { %2175 = vmatprep.mubr.bf16.mxu1 %v2142_v30 }
 0x8f8   : >> { %2176 = vmatmul.mubr.bf16.vlgmr.msra.gmra.mxu1 %v2141_v55 }
 0x8f9   : >> { %2337 = vmatpush1.bf16.msra.mxu1 %v5327_v33  ;;  %2354 = vmatprep.mubr.bf16.mxu1 %v3765_v52 }
 0x8fa   : >> { %3405 = vmatprep.subr.bf16.mxu1 %v4848_v4 }
 0x9b8   : >> { %v3377_v20 = vpop.f32.mrf.mxu1 }
 0x9ba   : >> { %v3378_v60 = vpop.f32.mrf.mxu1 }
 0x9bb   : >> { %v3379_v45 = vadd.f32 %v3378_v60, %v3377_v20 }
 0x9bc   : >> { %v3380_v58 = vpop.f32.mrf.mxu1 }
 0x9bd   : >> { %v2178_v21 = vadd.f32 1e-16, %v3379_v45 }
 0x9be   : >> { %v3381_v11 = vpop.f32.mrf.mxu1 }
 0x9bf   : >> { %3652 = vrcp.f32 %v2178_v21 }
 0x9cc   : >> { %v3653_v32 = vpop.eup %3652 }
 0x9cd   : >> { %v2184_v63 = vmul.f32 %v3653_v32, %v2178_v21 }
 0x9cf   : >> { %v2185_v42 = vsub.f32 2.0, %v2184_v63 }
 0x9d1   : >> { %v2186_v43 = vmul.f32 %v3653_v32, %v2185_v42 }
 0x9d3   : >> { %v2187_v12 = vmul.f32 0.125, %v2186_v43 }
 0x9d5   : >> { %v2188_v47 = vpack.c.bf16 %v2187_v12, %v2187_v12 }
 0x9d7   : >> { %3259 = vmatmul.mubr.msk.bf16.vlgmr.msra.gmra.mxu0 %vm1515_vm3, %v2188_v47 }
 0x9d8   : >> { %3384 = vmatpush3.bf16.msra.mxu0 %v4758_v39 }
 0x9d9   : >> { %3385 = vmatprep.subr.bf16.mxu0 %v4846_v16 }
 0x9dc   : >> { %3386 = vmatpush3.bf16.msra.mxu0 %v4740_v19 }
 0x9dd   : >> { %3387 = vmatprep.subr.bf16.mxu0 %v4844_v25 }
 0x9e0   : >> { %3388 = vmatpush3.bf16.msra.mxu0 %v4831_v40 }
 0x9e1   : >> { %3389 = vmatprep.subr.bf16.mxu0 %v4838_v27 }
 0x9e4   : >> { %3390 = vmatpush3.bf16.msra.mxu0 %v4825_v9 }
 0x9e5   : >> { %3391 = vmatprep.subr.bf16.mxu0 %v4828_v56 }
 0x9e8   : >> { %3392 = vmatpush3.bf16.msra.mxu0 %v4817_v5 }
 0x9e9   : >> { %3393 = vmatprep.subr.bf16.mxu0 %v4836_v50 }
 0x9ec   : >> { %3394 = vmatpush3.bf16.msra.mxu0 %v4809_v37 }
 0x9ed   : >> { %3395 = vmatprep.subr.bf16.mxu0 %v4804_v31 }
 0x9f0   : >> { %3396 = vmatpush3.bf16.msra.mxu0 %v4796_v0 }
 0x9f1   : >> { %3397 = vmatprep.subr.bf16.mxu0 %v4779_v13 }
 0x9f4   : >> { %3398 = vmatpush3.bf16.msra.mxu0 %v4783_v41 }
 0x9f5   : >> { %3262 = vmatprep.subr.msk.bf16.mxu0 %vm1519_vm2, %v5326_v22 }
 0xa97   : >> { %v2226_v10 = vpop.f32.mrf.mxu0 }
 0xa98   : >> { %v2227_v1 = vadd.f32 1e-16, %v2226_v10 }
 0xa99   : >> { %v2228_v24 = vpop.f32.mrf.mxu0 }
 0xa9a   : >> { %3654 = vrcp.f32 %v2227_v1  ;;  %v2229_v46 = vadd.f32 1e-16, %v2228_v24 }
 0xa9b   : >> { %v2230_v54 = vpop.f32.mrf.mxu0 }
 0xa9c   : >> { %3656 = vrcp.f32 %v2229_v46 }
 0xa9d   : >> { %v2231_v26 = vpop.f32.mrf.mxu0 }
 0xaa7   : >> { %v3655_v17 = vpop.eup %3654 }
 0xaa8   : >> { %v2235_v2 = vmul.f32 %v3655_v17, %v2227_v1 }
 0xaa9   : >> { %v3657_v53 = vpop.eup %3656 }
 0xaaa   : >> { %v2237_v18 = vsub.f32 2.0, %v2235_v2  ;;  %v2236_v49 = vmul.f32 %v3657_v53, %v2229_v46 }
 0xaac   : >> { %v2238_v51 = vsub.f32 2.0, %v2236_v49  ;;  %v2239_v7 = vmul.f32 %v3655_v17, %v2237_v18 }
 0xaae   : >> { %v2240_v15 = vmul.f32 %v3657_v53, %v2238_v51 }
 0xab0   : >> { %v2243_v48 = vcombine.low %v2239_v7, %v2240_v15 }
 0xab2   : >> { %v2250_v62 = vrot.slane %v2243_v48, %v4834_v59 }
 0xab4   : >> { %v2257_v34 = vrot.slane %v2250_v62, %v4834_v59 }
 0xab6   : >> { %v2259_v36 = vmul.f32 %v2257_v34, %v5328_v28 }
 0xab8   : >> { %v2268_v8 = vrot.slane %v2259_v36, %v5329_v35  ;;  %v2264_v23 = vrot.slane %v2259_v36, %v5330_v57 }
 0xaba   : >> { %v2272_v44 = vpack.c.bf16 %v2268_v8, %v2268_v8  ;;  %v2271_v38 = vpack.c.bf16 %v2264_v23, %v2264_v23 }
 0xabc   : >> { %2305 = vmatprep.mubr.bf16.mxu0 %v2272_v44 }
 0xabd   : >> { %2306 = vmatmul.mubr.bf16.vlgmr.msra.gmra.mxu0 %v2271_v38 }
 0xabe   : >> { %2467 = vmatpush1.bf16.msra.mxu0 %v5327_v33  ;;  %2484 = vmatprep.mubr.bf16.mxu0 %v3765_v52 }
 0xabf   : >> { %3427 = vmatprep.subr.bf16.mxu0 %v4848_v4 }
 0xb7d   : >> { %v3399_v29 = vpop.f32.mrf.mxu0 }
 0xb7f   : >> { %v3400_v3 = vpop.f32.mrf.mxu0 }
 0xb80   : >> { %v3401_v61 = vadd.f32 %v3400_v3, %v3399_v29 }
 0xb81   : >> { %v3402_v14 = vpop.f32.mrf.mxu0 }
 0xb82   : >> { %v2308_v6 = vadd.f32 1e-16, %v3401_v61 }
 0xb83   : >> { %v3403_v30 = vpop.f32.mrf.mxu0 }
 0xb84   : >> { %3658 = vrcp.f32 %v2308_v6 }
 0xb91   : >> { %v3659_v55 = vpop.eup %3658 }
 0xb92   : >> { %v2314_v20 = vmul.f32 %v3659_v55, %v2308_v6 }
 0xb94   : >> { %v2315_v60 = vsub.f32 2.0, %v2314_v20 }
 0xb96   : >> { %v2316_v45 = vmul.f32 %v3659_v55, %v2315_v60 }
 0xb98   : >> { %v2317_v58 = vmul.f32 0.125, %v2316_v45 }
 0xb9a   : >> { %v2318_v21 = vpack.c.bf16 %v2317_v58, %v2317_v58 }
 0xb9c   : >> { %3261 = vmatmul.mubr.msk.bf16.vlgmr.msra.gmra.mxu1 %vm1515_vm3, %v2318_v21 }
 0xb9d   : >> { %3406 = vmatpush3.bf16.msra.mxu1 %v4758_v39 }
 0xb9e   : >> { %3407 = vmatprep.subr.bf16.mxu1 %v4846_v16 }
 0xba1   : >> { %3408 = vmatpush3.bf16.msra.mxu1 %v4740_v19 }
 0xba2   : >> { %3409 = vmatprep.subr.bf16.mxu1 %v4844_v25 }
 0xba5   : >> { %3410 = vmatpush3.bf16.msra.mxu1 %v4831_v40 }
 0xba6   : >> { %3411 = vmatprep.subr.bf16.mxu1 %v4838_v27 }
 0xba9   : >> { %3412 = vmatpush3.bf16.msra.mxu1 %v4825_v9 }
 0xbaa   : >> { %3413 = vmatprep.subr.bf16.mxu1 %v4828_v56 }
 0xbad   : >> { %3414 = vmatpush3.bf16.msra.mxu1 %v4817_v5 }
 0xbae   : >> { %3415 = vmatprep.subr.bf16.mxu1 %v4836_v50 }
 0xbb1   : >> { %3416 = vmatpush3.bf16.msra.mxu1 %v4809_v37 }
 0xbb2   : >> { %3417 = vmatprep.subr.bf16.mxu1 %v4804_v31 }
 0xbb5   : >> { %3418 = vmatpush3.bf16.msra.mxu1 %v4796_v0 }
 0xbb6   : >> { %3419 = vmatprep.subr.bf16.mxu1 %v4779_v13 }
 0xbb9   : >> { %3420 = vmatpush3.bf16.msra.mxu1 %v4783_v41 }
 0xbba   : >> { %3264 = vmatprep.subr.msk.bf16.mxu1 %vm1519_vm2, %v5326_v22 }
 0xc5c   : >> { %v2356_v11 = vpop.f32.mrf.mxu1 }
 0xc5d   : >> { %v2357_v32 = vadd.f32 1e-16, %v2356_v11 }
 0xc5e   : >> { %v2358_v63 = vpop.f32.mrf.mxu1 }
 0xc5f   : >> { %3660 = vrcp.f32 %v2357_v32  ;;  %v2359_v42 = vadd.f32 1e-16, %v2358_v63 }
 0xc60   : >> { %v2360_v43 = vpop.f32.mrf.mxu1 }
 0xc61   : >> { %3662 = vrcp.f32 %v2359_v42 }
 0xc62   : >> { %v2361_v12 = vpop.f32.mrf.mxu1 }
 0xc6c   : >> { %v3661_v47 = vpop.eup %3660 }
 0xc6d   : >> { %v2365_v10 = vmul.f32 %v3661_v47, %v2357_v32 }
 0xc6e   : >> { %v3663_v1 = vpop.eup %3662 }
 0xc6f   : >> { %v2367_v24 = vsub.f32 2.0, %v2365_v10  ;;  %v2366_v46 = vmul.f32 %v3663_v1, %v2359_v42 }
 0xc71   : >> { %v2368_v54 = vsub.f32 2.0, %v2366_v46  ;;  %v2369_v26 = vmul.f32 %v3661_v47, %v2367_v24 }
 0xc73   : >> { %v2370_v17 = vmul.f32 %v3663_v1, %v2368_v54 }
 0xc75   : >> { %v2373_v2 = vcombine.low %v2369_v26, %v2370_v17 }
 0xc77   : >> { %v2380_v53 = vrot.slane %v2373_v2, %v4834_v59 }
 0xc79   : >> { %v2387_v18 = vrot.slane %v2380_v53, %v4834_v59 }
 0xc7b   : >> { %v2389_v49 = vmul.f32 %v2387_v18, %v5328_v28 }
 0xc7d   : >> { %v2398_v51 = vrot.slane %v2389_v49, %v5329_v35  ;;  %v2394_v7 = vrot.slane %v2389_v49, %v5330_v57 }
 0xc7f   : >> { %v2402_v15 = vpack.c.bf16 %v2398_v51, %v2398_v51  ;;  %v2401_v48 = vpack.c.bf16 %v2394_v7, %v2394_v7 }
 0xc81   : >> { %2435 = vmatprep.mubr.bf16.mxu1 %v2402_v15 }
 0xc82   : >> { %2436 = vmatmul.mubr.bf16.vlgmr.msra.gmra.mxu1 %v2401_v48 }
 0xc83   : >> { %2597 = vmatpush1.bf16.msra.mxu1 %v5327_v33  ;;  %2614 = vmatprep.mubr.bf16.mxu1 %v3765_v52 }
 0xc84   : >> { %3449 = vmatprep.subr.bf16.mxu1 %v4848_v4 }
 0xd42   : >> { %v3421_v62 = vpop.f32.mrf.mxu1 }
 0xd44   : >> { %v3422_v34 = vpop.f32.mrf.mxu1 }
 0xd45   : >> { %v3423_v36 = vadd.f32 %v3422_v34, %v3421_v62 }
 0xd46   : >> { %v3424_v8 = vpop.f32.mrf.mxu1 }
 0xd47   : >> { %v2438_v23 = vadd.f32 1e-16, %v3423_v36 }
 0xd48   : >> { %v3425_v44 = vpop.f32.mrf.mxu1 }
 0xd49   : >> { %3664 = vrcp.f32 %v2438_v23 }
 0xd56   : >> { %v3665_v38 = vpop.eup %3664 }
 0xd57   : >> { %v2444_v29 = vmul.f32 %v3665_v38, %v2438_v23 }
 0xd59   : >> { %v2445_v3 = vsub.f32 2.0, %v2444_v29 }
 0xd5b   : >> { %v2446_v61 = vmul.f32 %v3665_v38, %v2445_v3 }
 0xd5d   : >> { %v2447_v14 = vmul.f32 0.125, %v2446_v61 }
 0xd5f   : >> { %v2448_v6 = vpack.c.bf16 %v2447_v14, %v2447_v14 }
 0xd61   : >> { %3263 = vmatmul.mubr.msk.bf16.vlgmr.msra.gmra.mxu0 %vm1515_vm3, %v2448_v6 }
 0xd62   : >> { %3428 = vmatpush3.bf16.msra.mxu0 %v4758_v39 }
 0xd63   : >> { %3429 = vmatprep.subr.bf16.mxu0 %v4846_v16 }
 0xd66   : >> { %3430 = vmatpush3.bf16.msra.mxu0 %v4740_v19 }
 0xd67   : >> { %3431 = vmatprep.subr.bf16.mxu0 %v4844_v25 }
 0xd6a   : >> { %3432 = vmatpush3.bf16.msra.mxu0 %v4831_v40 }
 0xd6b   : >> { %3433 = vmatprep.subr.bf16.mxu0 %v4838_v27 }
 0xd6e   : >> { %3434 = vmatpush3.bf16.msra.mxu0 %v4825_v9 }
 0xd6f   : >> { %3435 = vmatprep.subr.bf16.mxu0 %v4828_v56 }
 0xd72   : >> { %3436 = vmatpush3.bf16.msra.mxu0 %v4817_v5 }
 0xd73   : >> { %3437 = vmatprep.subr.bf16.mxu0 %v4836_v50 }
 0xd76   : >> { %3438 = vmatpush3.bf16.msra.mxu0 %v4809_v37 }
 0xd77   : >> { %3439 = vmatprep.subr.bf16.mxu0 %v4804_v31 }
 0xd7a   : >> { %3440 = vmatpush3.bf16.msra.mxu0 %v4796_v0 }
 0xd7b   : >> { %3441 = vmatprep.subr.bf16.mxu0 %v4779_v13 }
 0xd7e   : >> { %3442 = vmatpush3.bf16.msra.mxu0 %v4783_v41 }
 0xd7f   : >> { %3266 = vmatprep.subr.msk.bf16.mxu0 %vm1519_vm2, %v5326_v22 }
 0xe21   : >> { %v2486_v30 = vpop.f32.mrf.mxu0 }
 0xe22   : >> { %v2487_v55 = vadd.f32 1e-16, %v2486_v30 }
 0xe23   : >> { %v2488_v20 = vpop.f32.mrf.mxu0 }
 0xe24   : >> { %3666 = vrcp.f32 %v2487_v55  ;;  %v2489_v60 = vadd.f32 1e-16, %v2488_v20 }
 0xe25   : >> { %v2490_v45 = vpop.f32.mrf.mxu0 }
 0xe26   : >> { %3668 = vrcp.f32 %v2489_v60 }
 0xe27   : >> { %v2491_v58 = vpop.f32.mrf.mxu0 }
 0xe31   : >> { %v3667_v21 = vpop.eup %3666 }
 0xe32   : >> { %v2495_v11 = vmul.f32 %v3667_v21, %v2487_v55 }
 0xe33   : >> { %v3669_v32 = vpop.eup %3668 }
 0xe34   : >> { %v2497_v63 = vsub.f32 2.0, %v2495_v11  ;;  %v2496_v42 = vmul.f32 %v3669_v32, %v2489_v60 }
 0xe36   : >> { %v2498_v43 = vsub.f32 2.0, %v2496_v42  ;;  %v2499_v12 = vmul.f32 %v3667_v21, %v2497_v63 }
 0xe38   : >> { %v2500_v47 = vmul.f32 %v3669_v32, %v2498_v43 }
 0xe3a   : >> { %v2503_v10 = vcombine.low %v2499_v12, %v2500_v47 }
 0xe3c   : >> { %v2510_v1 = vrot.slane %v2503_v10, %v4834_v59 }
 0xe3e   : >> { %v2517_v24 = vrot.slane %v2510_v1, %v4834_v59 }
 0xe40   : >> { %v2519_v46 = vmul.f32 %v2517_v24, %v5328_v28 }
 0xe42   : >> { %v2528_v54 = vrot.slane %v2519_v46, %v5329_v35  ;;  %v2524_v26 = vrot.slane %v2519_v46, %v5330_v57 }
 0xe44   : >> { %v2532_v17 = vpack.c.bf16 %v2528_v54, %v2528_v54  ;;  %v2531_v2 = vpack.c.bf16 %v2524_v26, %v2524_v26 }
 0xe46   : >> { %2565 = vmatprep.mubr.bf16.mxu0 %v2532_v17 }
 0xe47   : >> { %2566 = vmatmul.mubr.bf16.vlgmr.msra.gmra.mxu0 %v2531_v2 }
 0xe48   : >> { %2727 = vmatpush1.bf16.msra.mxu0 %v5327_v33  ;;  %2744 = vmatprep.mubr.bf16.mxu0 %v3765_v52 }
 0xe49   : >> { %3471 = vmatprep.subr.bf16.mxu0 %v4848_v4 }
 0xf07   : >> { %v3443_v53 = vpop.f32.mrf.mxu0 }
 0xf09   : >> { %v3444_v18 = vpop.f32.mrf.mxu0 }
 0xf0a   : >> { %v3445_v49 = vadd.f32 %v3444_v18, %v3443_v53 }
 0xf0b   : >> { %v3446_v51 = vpop.f32.mrf.mxu0 }
 0xf0c   : >> { %v2568_v7 = vadd.f32 1e-16, %v3445_v49 }
 0xf0d   : >> { %v3447_v15 = vpop.f32.mrf.mxu0 }
 0xf0e   : >> { %3670 = vrcp.f32 %v2568_v7 }
 0xf1b   : >> { %v3671_v48 = vpop.eup %3670 }
 0xf1c   : >> { %v2574_v62 = vmul.f32 %v3671_v48, %v2568_v7 }
 0xf1e   : >> { %v2575_v34 = vsub.f32 2.0, %v2574_v62 }
 0xf20   : >> { %v2576_v36 = vmul.f32 %v3671_v48, %v2575_v34 }
 0xf22   : >> { %v2577_v8 = vmul.f32 0.125, %v2576_v36 }
 0xf24   : >> { %v2578_v23 = vpack.c.bf16 %v2577_v8, %v2577_v8 }
 0xf26   : >> { %3265 = vmatmul.mubr.msk.bf16.vlgmr.msra.gmra.mxu1 %vm1515_vm3, %v2578_v23 }
 0xf27   : >> { %3450 = vmatpush3.bf16.msra.mxu1 %v4758_v39 }
 0xf28   : >> { %3451 = vmatprep.subr.bf16.mxu1 %v4846_v16 }
 0xf2b   : >> { %3452 = vmatpush3.bf16.msra.mxu1 %v4740_v19 }
 0xf2c   : >> { %3453 = vmatprep.subr.bf16.mxu1 %v4844_v25 }
 0xf2f   : >> { %3454 = vmatpush3.bf16.msra.mxu1 %v4831_v40 }
 0xf30   : >> { %3455 = vmatprep.subr.bf16.mxu1 %v4838_v27 }
 0xf33   : >> { %3456 = vmatpush3.bf16.msra.mxu1 %v4825_v9 }
 0xf34   : >> { %3457 = vmatprep.subr.bf16.mxu1 %v4828_v56 }
 0xf37   : >> { %3458 = vmatpush3.bf16.msra.mxu1 %v4817_v5 }
 0xf38   : >> { %3459 = vmatprep.subr.bf16.mxu1 %v4836_v50 }
 0xf3b   : >> { %3460 = vmatpush3.bf16.msra.mxu1 %v4809_v37 }
 0xf3c   : >> { %3461 = vmatprep.subr.bf16.mxu1 %v4804_v31 }
 0xf3f   : >> { %3462 = vmatpush3.bf16.msra.mxu1 %v4796_v0 }
 0xf40   : >> { %3463 = vmatprep.subr.bf16.mxu1 %v4779_v13 }
 0xf43   : >> { %3464 = vmatpush3.bf16.msra.mxu1 %v4783_v41 }
 0xf44   : >> { %3268 = vmatprep.subr.msk.bf16.mxu1 %vm1519_vm2, %v5326_v22 }
 0xfe6   : >> { %v2616_v44 = vpop.f32.mrf.mxu1 }
 0xfe7   : >> { %v2617_v38 = vadd.f32 1e-16, %v2616_v44 }
 0xfe8   : >> { %v2618_v29 = vpop.f32.mrf.mxu1 }
 0xfe9   : >> { %3672 = vrcp.f32 %v2617_v38  ;;  %v2619_v3 = vadd.f32 1e-16, %v2618_v29 }
 0xfea   : >> { %v2620_v61 = vpop.f32.mrf.mxu1 }
 0xfeb   : >> { %3674 = vrcp.f32 %v2619_v3 }
 0xfec   : >> { %v2621_v14 = vpop.f32.mrf.mxu1 }
 0xff6   : >> { %v3673_v6 = vpop.eup %3672 }
 0xff7   : >> { %v2625_v30 = vmul.f32 %v3673_v6, %v2617_v38 }
 0xff8   : >> { %v3675_v55 = vpop.eup %3674 }
 0xff9   : >> { %v2627_v20 = vsub.f32 2.0, %v2625_v30  ;;  %v2626_v60 = vmul.f32 %v3675_v55, %v2619_v3 }
 0xffb   : >> { %v2628_v45 = vsub.f32 2.0, %v2626_v60  ;;  %v2629_v58 = vmul.f32 %v3673_v6, %v2627_v20 }
 0xffd   : >> { %v2630_v21 = vmul.f32 %v3675_v55, %v2628_v45 }
 0xfff   : >> { %v2633_v11 = vcombine.low %v2629_v58, %v2630_v21 }
0x1001   : >> { %v2640_v32 = vrot.slane %v2633_v11, %v4834_v59 }
0x1003   : >> { %v2647_v63 = vrot.slane %v2640_v32, %v4834_v59 }
0x1005   : >> { %v2649_v42 = vmul.f32 %v2647_v63, %v5328_v28 }
0x1007   : >> { %v2658_v43 = vrot.slane %v2649_v42, %v5329_v35  ;;  %v2654_v12 = vrot.slane %v2649_v42, %v5330_v57 }
0x1009   : >> { %v2662_v47 = vpack.c.bf16 %v2658_v43, %v2658_v43  ;;  %v2661_v10 = vpack.c.bf16 %v2654_v12, %v2654_v12 }
0x100b   : >> { %2695 = vmatprep.mubr.bf16.mxu1 %v2662_v47 }
0x100c   : >> { %2696 = vmatmul.mubr.bf16.vlgmr.msra.gmra.mxu1 %v2661_v10 }
0x100d   : >> { %2857 = vmatpush1.bf16.msra.mxu1 %v5327_v33  ;;  %2874 = vmatprep.mubr.bf16.mxu1 %v3765_v52 }
0x10cc   : >> { %v3465_v1 = vpop.f32.mrf.mxu1 }
0x10ce   : >> { %v3466_v24 = vpop.f32.mrf.mxu1 }
0x10cf   : >> { %v3467_v46 = vadd.f32 %v3466_v24, %v3465_v1 }
0x10d0   : >> { %v3468_v54 = vpop.f32.mrf.mxu1 }
0x10d1   : >> { %v2698_v26 = vadd.f32 1e-16, %v3467_v46  ;;  %v3767_v54 = vmov 1.0  }
0x10d2   : >> { %v3469_v17 = vpop.f32.mrf.mxu1 }
0x10d3   : >> { %3676 = vrcp.f32 %v2698_v26 }
0x10e0   : >> { %v3677_v2 = vpop.eup %3676 }
0x10e1   : >> { %v2704_v53 = vmul.f32 %v3677_v2, %v2698_v26 }
0x10e3   : >> { %v2705_v18 = vsub.f32 2.0, %v2704_v53 }
0x10e5   : >> { %v2706_v49 = vmul.f32 %v3677_v2, %v2705_v18 }
0x10e7   : >> { %v2707_v51 = vmul.f32 0.125, %v2706_v49 }
0x10e9   : >> { %v2708_v7 = vpack.c.bf16 %v2707_v51, %v2707_v51 }
0x10eb   : >> { %3267 = vmatmul.mubr.msk.bf16.vlgmr.msra.gmra.mxu0 %vm1515_vm3, %v2708_v7 }
0x10ec   : >> { %3472 = vmatpush3.bf16.msra.mxu0 %v4758_v39 }
0x10ed   : >> { %3473 = vmatprep.subr.bf16.mxu0 %v4846_v16 }
0x10f0   : >> { %3474 = vmatpush3.bf16.msra.mxu0 %v4740_v19 }
0x10f1   : >> { %3475 = vmatprep.subr.bf16.mxu0 %v4844_v25 }
0x10f4   : >> { %3476 = vmatpush3.bf16.msra.mxu0 %v4831_v40 }
0x10f5   : >> { %3477 = vmatprep.subr.bf16.mxu0 %v4838_v27 }
0x10f8   : >> { %3478 = vmatpush3.bf16.msra.mxu0 %v4825_v9 }
0x10f9   : >> { %3479 = vmatprep.subr.bf16.mxu0 %v4828_v56 }
0x10fc   : >> { %3480 = vmatpush3.bf16.msra.mxu0 %v4817_v5 }
0x10fd   : >> { %3481 = vmatprep.subr.bf16.mxu0 %v4836_v50 }
0x1100   : >> { %3482 = vmatpush3.bf16.msra.mxu0 %v4809_v37 }
0x1101   : >> { %3483 = vmatprep.subr.bf16.mxu0 %v4804_v31 }
0x1104   : >> { %3484 = vmatpush3.bf16.msra.mxu0 %v4796_v0 }
0x1105   : >> { %3485 = vmatprep.subr.bf16.mxu0 %v4779_v13 }
0x1108   : >> { %3486 = vmatpush3.bf16.msra.mxu0 %v4783_v41 }
0x11ab   : >> { %v2746_v15 = vpop.f32.mrf.mxu0 }
0x11ac   : >> { %v2747_v48 = vadd.f32 1e-16, %v2746_v15 }
0x11ad   : >> { %v2748_v62 = vpop.f32.mrf.mxu0 }
0x11ae   : >> { %3678 = vrcp.f32 %v2747_v48  ;;  %v2749_v34 = vadd.f32 1e-16, %v2748_v62 }
0x11af   : >> { %v2750_v36 = vpop.f32.mrf.mxu0 }
0x11b0   : >> { %3680 = vrcp.f32 %v2749_v34 }
0x11b1   : >> { %v2751_v8 = vpop.f32.mrf.mxu0 }
0x11bb   : >> { %v3679_v23 = vpop.eup %3678 }
0x11bc   : >> { %v2755_v44 = vmul.f32 %v3679_v23, %v2747_v48 }
0x11bd   : >> { %v3681_v38 = vpop.eup %3680 }
0x11be   : >> { %v2757_v29 = vsub.f32 2.0, %v2755_v44  ;;  %v2756_v3 = vmul.f32 %v3681_v38, %v2749_v34 }
0x11c0   : >> { %v2758_v61 = vsub.f32 2.0, %v2756_v3  ;;  %v2759_v14 = vmul.f32 %v3679_v23, %v2757_v29 }
0x11c2   : >> { %v2760_v6 = vmul.f32 %v3681_v38, %v2758_v61 }
0x11c4   : >> { %v2763_v30 = vcombine.low %v2759_v14, %v2760_v6 }
0x11c6   : >> { %v2770_v55 = vrot.slane %v2763_v30, %v4834_v59 }
0x11c8   : >> { %v2777_v20 = vrot.slane %v2770_v55, %v4834_v59 }
0x11ca   : >> { %v5116_v60 = vmul.f32 %v2777_v20, %v5328_v28 }
0x11cc   : >> { %v2788_v45 = vrot.slane %v5116_v60, %v5329_v35  ;;  %v2784_v58 = vrot.slane %v5116_v60, %v5330_v57  ;;  %vm2895_vm6 = vweird.f32 %v5116_v60 }
0x11cd   : >> { %vm2896_vm8 = vmxor %vm2895_vm6, %vm3766_vm7 }
0x11ce   : >> { %v2792_v21 = vpack.c.bf16 %v2788_v45, %v2788_v45  ;;  %v2791_v11 = vpack.c.bf16 %v2784_v58, %v2784_v58  ;;  %v2897_v26 = vsel %vm2896_vm8, 0.0, %v3767_v54 }
0x11cf   : >> { %v2902_v2 = vrot.slane %v2897_v26, %v5330_v57  ;;  %v2906_v53 = vrot.slane %v2897_v26, %v5329_v35 }
0x11d0   : >> { %2825 = vmatprep.mubr.bf16.mxu0 %v2792_v21 }
0x11d1   : >> { %2826 = vmatmul.mubr.bf16.vlgmr.msra.gmra.mxu0 %v2791_v11  ;;  %v2909_v7 = vsel %vm1493_vm0, %v2902_v2, 0.0  ;;  %v2910_v15 = vsel %vm1493_vm0, %v2906_v53, 0.0  ;;  %v2922_v2 = vld [vmem:[#allocation5] sm:$0x1] }
0x11d2   : >> { %v2911_v48 = vadd.f32 %v2910_v15, %v2909_v7  ;;  %vm2923_vm12 = vcmp.gt.f32.partialorder %v2922_v2, 0.5  ;;  %v3684_v7 = vld [vmem:[#allocation4] sm:$0x3] }
0x11d3   : >> { %v2987_v15 = vrot.slane %v3684_v7, %v5330_v57 }
0x1291   : >> { %v3487_v32 = vpop.f32.mrf.mxu0 }
0x1293   : >> { %v3488_v63 = vpop.f32.mrf.mxu0 }
0x1294   : >> { %v3489_v42 = vadd.f32 %v3488_v63, %v3487_v32 }
0x1295   : >> { %v3490_v43 = vpop.f32.mrf.mxu0 }
0x1296   : >> { %v2828_v12 = vadd.f32 1e-16, %v3489_v42 }
0x1297   : >> { %v3491_v47 = vpop.f32.mrf.mxu0 }
0x1298   : >> { %3682 = vrcp.f32 %v2828_v12 }
0x12a5   : >> { %v3683_v10 = vpop.eup %3682 }
0x12a6   : >> { %v2834_v1 = vmul.f32 %v3683_v10, %v2828_v12 }
0x12a8   : >> { %v2835_v24 = vsub.f32 2.0, %v2834_v1 }
0x12aa   : >> { %v2836_v46 = vmul.f32 %v3683_v10, %v2835_v24 }
0x12ac   : >> { %v5124_v17 = vmul.f32 0.125, %v2836_v46 }
0x12ae   : >> { %v2838_v18 = vpack.c.bf16 %v5124_v17, %v5124_v17  ;;  %vm2883_vm9 = vweird.f32 %v5124_v17 }
0x12af   : >> { %vm2884_vm10 = vmxor %vm2883_vm9, %vm3766_vm7 }
0x12b0   : >> { %3269 = vmatmul.mubr.msk.bf16.vlgmr.msra.gmra.mxu1 %vm1515_vm3, %v2838_v18  ;;  %v2885_v49 = vsel %vm2884_vm10, 0.0, %v3767_v54 }
0x12b1   : >> { %v2886_v51 = vsel %vm1508_vm1, %v2885_v49, 0.0 }
0x12b2   : >> { %2887 = vadd.xlane.f32.xlu0 %v2886_v51 }
0x12b6   : >> { %2912 = vadd.xlane.f32.xlu0 %v2911_v48  ;;  %v2991_v48 = vrot.slane %v3684_v7, %v5329_v35 }
0x133b   : >> { %v2888_v62 = vpop.xlane.xlu0 %2887 }
0x133c   : >> { %v2889_v23 = vrot.slane %v2888_v62, 4 }
0x133e   : >> { %v2890_v14 = vadd.f32 %v2889_v23, %v2888_v62  ;;  %v1602_v23 = vld [vmem:[#allocation3] sm:$0x3] }
0x133f   : >> { %v2913_v34 = vpop.xlane.xlu0 %2912 }
0x1340   : >> { %v2914_v36 = vrot.slane %v2913_v34, 4  ;;  %v2891_v21 = vrot.slane %v2890_v14, 2 }
0x1342   : >> { %v2915_v38 = vadd.f32 %v2914_v36, %v2913_v34  ;;  %v2892_v42 = vadd.f32 %v2891_v21, %v2890_v14  ;;  %v1601_v36 = vld [vmem:[#allocation2] sm:$0x1] }
0x1344   : >> { %v2916_v55 = vrot.slane %v2915_v38, 2 }
0x1346   : >> { %v2917_v32 = vadd.f32 %v2916_v55, %v2915_v38 }
0x1348   : >> { %v2918_v12 = vrot.slane %v2917_v32, 1 }
0x134a   : >> { %v2919_v46 = vadd.f32 %v2918_v12, %v2917_v32 }
0x1370   : >> { %v2876_v8 = vpop.f32.mrf.mxu1 }
0x1371   : >> { %v2926_v29 = vmul.f32 %v2876_v8, %v2784_v58  ;;  %v2893_v58 = vrot.slane %v2892_v42, 1 }
0x1372   : >> { %v2878_v44 = vpop.f32.mrf.mxu1 }
0x1373   : >> { %v2927_v3 = vmul.f32 %v2878_v44, %v2788_v45  ;;  %v2894_v54 = vadd.f32 %v2893_v58, %v2892_v42 }
0x1374   : >> { %v2880_v61 = vpop.f32.mrf.mxu1 }
0x1375   : >> { %v2930_v6 = vcombine.low %v2926_v29, %v2927_v3  ;;  %v2920_v26 = vadd.f32 %v2919_v46, %v2894_v54 }
0x1376   : >> { %v2881_v30 = vpop.f32.mrf.mxu1 }
0x1377   : >> { %v2937_v20 = vrot.slane %v2930_v6, %v4834_v59  ;;  %vm2921_vm11 = vcmp.gt.f32.partialorder %v2920_v26, 0.0 }
0x1378   : >> { %vm2924_vm13 = vmxor %vm2921_vm11, %vm3766_vm7 }
0x1379   : >> { %v2944_v11 = vrot.slane %v2937_v20, %v4834_v59  ;;  %vm5144_vm14 = vmand %vm2923_vm12, %vm2924_vm13 }
0x137a   : >> { %v2970_v53 = vsel %vm5144_vm14, 1, %v3765_v52 }
0x137b   : >> { %v2946_v63 = vsub.f32 %v5328_v28, %v2944_v11 }
0x137d   : >> { %v2947_v43 = vmul.f32 %v2946_v63, %v2946_v63 }
0x137f   : >> { %v2952_v47 = vrot.slane %v2947_v43, %v5330_v57  ;;  %v2956_v45 = vrot.slane %v2947_v43, %v5329_v35 }
0x1381   : >> { %v2959_v10 = vsel %vm1493_vm0, %v2952_v47, 0.0  ;;  %v2960_v1 = vsel %vm1493_vm0, %v2956_v45, 0.0 }
0x1382   : >> { %v2961_v24 = vadd.f32 %v2960_v1, %v2959_v10 }
0x1384   : >> { %2962 = vadd.xlane.f32.xlu1 %v2961_v24 }
0x1395   : >> { %2972 = vperm.xlu1 %3624, %v2970_v53  }
0x140d   : >> { %v2963_v18 = vpop.xlane.xlu1 %2962 }
0x140e   : >> { %v2964_v49 = vrot.slane %v2963_v18, 4 }
0x1410   : >> { %v2965_v51 = vadd.f32 %v2964_v49, %v2963_v18 }
0x1411   : >> { %v2973_v62 = vpop.permute.xlu1 %2972 }
0x1412   : >> { %v2966_v34 = vrot.slane %v2965_v51, 2  ;;  %v2977_v38 = vrot.slane %v2973_v62, %v5330_v57 }
0x1414   : >> { %v2967_v29 = vadd.f32 %v2966_v34, %v2965_v51  ;;  %vm2978_vm15 = vcmp.eq.s32.totalorder %v2977_v38, 1 }
0x1415   : >> { %v2979_v3 = vsel %vm2978_vm15, %v5124_v17, %v1601_v36  ;;  %v2981_v52 = vsel %vm2978_vm15, %v5116_v60, %v1602_v23  ;;  %v2994_v61 = vsel %vm2978_vm15, %v2876_v8, %v2987_v15  ;;  %v2995_v14 = vsel %vm2978_vm15, %v2878_v44, %v2991_v48 }
0x1416   : >> { %v2968_v6 = vrot.slane %v2967_v29, 1  ;;  %2980 = vst.msk [vmem:[#allocation2] sm:$0x1] %vm1508_vm1, %v2979_v3  ;;  %v2998_v35 = vcombine.low %v2994_v61, %v2995_v14  ;;  %v3768_v17 = vmov 0.0  }
0x1417   : >> { %2982 = vst.msk [vmem:[#allocation3] sm:$0x3] %vm4609_vm4, %v2981_v52 }
0x1418   : >> { %v2969_v55 = vadd.f32 %v2968_v6, %v2967_v29  ;;  %v3005_v20 = vrot.slane %v2998_v35, %v4834_v59 }
0x141a   : >> { %vm3015_vm6 = vcmp.gt.f32.partialorder %v2969_v55, 1e-09  ;;  %v3012_v57 = vrot.slane %v3005_v20, %v4834_v59 }
0x141b   : >> { %vm3016_vm7 = vmand %vm5144_vm14, %vm3015_vm6 }
0x141c   : >> { %v3017_v60 = vsel %vm3016_vm7, 1.0, %v3768_v17  ;;  %3014 = vst.msk [vmem:[#allocation4] sm:$0x3] %vm4609_vm4, %v3012_v57 }
0x141d   : >> { %3018 = vst.msk [vmem:[#allocation5] sm:$0x1] %vm1586_vm5, %v3017_v60 }
0x141e PF: >> { %s1593_s11 = sadd.s32 1, %s3757_s11  }
0x141f   : >> { %p1590_p12 = scmp.ge.s32.totalorder %s1593_s11, 10  }
0x1420   : > { %v3019_v8 = vld [vmem:[#allocation3] sm:$0x3] (%p1590_p12)  ;;  %v5334_v63 = vld [vmem:[#allocation14_spill] sm:$0xff] (%p1590_p12)  ;;  %v5335_v43 = vld [vmem:[#allocation12_spill] sm:$0xff] (%p1590_p12)  ;;  %v5340_v52 = vlaneseq (%p1590_p12)  ;;  %s3270_s27 = sshll.u32 (%p1590_p12), %s3846_s17, 4  ;;  %s3126_s28 = sshll.u32 (%p1590_p12), %s4852_s29, 4  ;;  %s3127_s28 = int_to_ptr.vmem [resolvable:$true] %s3126_s28 }
0x1421   : > { %v3020_v44 = vadd.f32 (%p1590_p12), 1e-16, %v3019_v8  ;;  %v5336_v47 = vld [vmem:[#allocation13_spill] sm:$0xff] (%p1590_p12)  ;;  %v5337_v24 = vld [vmem:[#allocation10_spill] sm:$0xff] (%p1590_p12)  ;;  %s5195_s20 = scalar_lea.hbm (%p1590_p12), %s5243_s10, %s3270_s27  ;;  %s3114_s22 = scalar_lea.sflag (%p1590_p12), [#allocation7], %s409_s12 }
0x1422   : > { %1592 = sbr.rel (!%p1590_p12) target bundleno = 400 (0x190), region = 121  ;;  %v3078_v46 = vmul.f32 (%p1590_p12), 0.125, %v5337_v24  ;;  %v5338_v19 = vld [vmem:[#allocation29_spill] sm:$0xff] (%p1590_p12)  ;;  %v3105_v61 = vand.u32 (%p1590_p12), 127, %v5340_v52  ;;  %s3689_s21 = scalar_lea.vmem (%p1590_p12), %s3127_s28, 16 }
0x1423   : > { %3685 = vlog2.f32 (%p1590_p12), %v3020_v44  ;;  %v5339_v9 = vld [vmem:[#allocation25_spill] sm:$0xff] (%p1590_p12)  ;;  %p3690_p13 = scmp.ne.s32.totalorder (%p1590_p12), %s3127_s28, %s3689_s21  ;;  %s3769_s17 = smov (%p1590_p12), [#allocation6]  }
0x1424   : > { %v3079_v39 = vsub.f32 (%p1590_p12), %v5338_v19, %v3078_v46  ;;  %v3024_v56 = vmul.f32 (%p1590_p12), %v5339_v9, %v5339_v9  ;;  %vm3107_vm1 = vcmp.eq.s32.totalorder (%p1590_p12), %v3105_v61, 1  ;;  %vm3106_vm2 = vcmp.eq.s32.totalorder (%p1590_p12), %v3105_v61, 0  ;;  %s3693_s25 = sshll.u32 (%p1590_p12), %s3769_s17, 4  ;;  %s3694_s25 = int_to_ptr.vmem [resolvable:$false] %s3693_s25 }
0x1425   : > { %p3691_p0 = pnand (%p1590_p12), %p3690_p13, %p3863_p5  ;;  %s3695_s11 = scalar_lea.vmem (%p1590_p12), %s3694_s25, 32 }
0x1426   : > { %v3080_v13 = vand.u32 (%p1590_p12), 2147483647, %v3079_v39  ;;  %v3025_v40 = vadd.f32 (%p1590_p12), 1e-08, %v3024_v56  ;;  %p3696_p2 = scmp.lt.s32.totalorder (%p1590_p12), %s3127_s28, %s3694_s25  ;;  %p3697_p3 = scmp.lt.s32.totalorder (%p1590_p12), %s3695_s11, %s3689_s21 }
0x1427   : > { %p3692_p1 = pneg %p3691_p0 }
0x1428   : > { %v3085_v41 = vrot.slane %v3080_v13, %v5335_v43  ;;  %v3089_v0 = vrot.slane %v3080_v13, %v5336_v47  ;;  %3687 = vrcp.f32 %v3025_v40  ;;  %p3698_p4 = por %p3697_p3, %p3696_p2 }
0x142a   : > { %v3092_v31 = vsel %vm1493_vm0, %v3085_v41, 0.0  ;;  %v3093_v37 = vsel %vm1493_vm0, %v3089_v0, 0.0  ;;  %p3699_p7 = pnand %p3698_p4, %p3692_p1 }
0x142b   : > { %v3094_v5 = vadd.f32 %v3093_v37, %v3092_v31 }
0x1430   : > { %v3686_v21 = vpop.eup %3685 }
0x1431   : > { %v3022_v11 = vmul.f32 0.6931472, %v3686_v21 }
0x1433   : > { %v3023_v32 = vmul.f32 10.0, %v3022_v11 }
0x1435   : > { %v3029_v42 = vmul.f32 %v3023_v32, %v5334_v63  ;;  %v3688_v25 = vpop.eup %3687 }
0x1436   : > { %v3027_v22 = vmul.f32 %v3688_v25, %v5339_v9 }
0x1437   : > { %v3034_v12 = vrot.slane %v3029_v42, %v5335_v43  ;;  %v3038_v45 = vrot.slane %v3029_v42, %v5336_v47 }
0x1438   : > { %v3028_v26 = vmul.f32 %v3027_v22, %v3023_v32 }
0x1439   : > { %v3041_v58 = vsel %vm1493_vm0, %v3034_v12, 0.0  ;;  %v3042_v10 = vsel %vm1493_vm0, %v3038_v45, 0.0 }
0x143a   : > { %v3043_v1 = vadd.f32 %v3042_v10, %v3041_v58 }
0x143c   : > { %3044 = vadd.xlane.f32.xlu0 %v3043_v1 }
0x1440   : > { %3095 = vadd.xlane.f32.xlu0 %v3094_v5 }
0x14c5   : > { %v3045_v59 = vpop.xlane.xlu0 %3044 }
0x14c6   : > { %v3046_v50 = vrot.slane %v3045_v59, 4 }
0x14c8   : > { %v3047_v27 = vadd.f32 %v3046_v50, %v3045_v59 }
0x14c9   : > { %v3096_v48 = vpop.xlane.xlu0 %3095 }
0x14ca   : > { %v3048_v16 = vrot.slane %v3047_v27, 2  ;;  %v3097_v62 = vrot.slane %v3096_v48, 4 }
0x14cc   : > { %v3049_v4 = vadd.f32 %v3048_v16, %v3047_v27  ;;  %v3098_v34 = vadd.f32 %v3097_v62, %v3096_v48 }
0x14ce   : > { %v3050_v33 = vrot.slane %v3049_v4, 1  ;;  %v3099_v36 = vrot.slane %v3098_v34, 2 }
0x14d0   : > { %v3051_v54 = vadd.f32 %v3050_v33, %v3049_v4  ;;  %v3100_v23 = vadd.f32 %v3099_v36, %v3098_v34 }
0x14d2   : > { %v3052_v2 = vmul.f32 %v3688_v25, %v3051_v54  ;;  %v3101_v38 = vrot.slane %v3100_v23, 1 }
0x14d4   : > { %v3053_v28 = vsub.f32 %v3028_v26, %v3052_v2  ;;  %v3102_v6 = vadd.f32 %v3101_v38, %v3100_v23 }
0x14d6   : > { %v3054_v53 = vmul.f32 %v3053_v28, %v5334_v63  ;;  %v3103_v55 = vmul.f32 8.0, %v3102_v6 }
0x14d8   : > { %v3059_v18 = vrot.slane %v3054_v53, %v5335_v43  ;;  %v3063_v49 = vrot.slane %v3054_v53, %v5336_v47 }
0x14da   : > { %v3066_v51 = vsel %vm1493_vm0, %v3059_v18, 0.0  ;;  %v3067_v7 = vsel %vm1493_vm0, %v3063_v49, 0.0  ;;  %vm3108_vm0 = vcmp.eq.s32.totalorder %v3105_v61, 2 }
0x14db   : > { %v3068_v15 = vadd.f32 %v3067_v7, %v3066_v51  ;;  %v3109_v57 = vsel %vm3108_vm0, %v5339_v9, 0.0 }
0x14dc   : > { %v3110_v60 = vsel %vm3107_vm1, %v3103_v55, %v3109_v57 }
0x14dd   : > { %3069 = vadd.xlane.f32.xlu1 %v3068_v15 }
0x1566   : > { %v3070_v29 = vpop.xlane.xlu1 %3069 }
0x1567   : > { %v3071_v3 = vrot.slane %v3070_v29, 4 }
0x1569   : > { %v3072_v14 = vadd.f32 %v3071_v3, %v3070_v29 }
0x156b   : > { %v3073_v30 = vrot.slane %v3072_v14, 2 }
0x156d   : > { %v3074_v35 = vadd.f32 %v3073_v30, %v3072_v14 }
0x156f   : > { %v3075_v20 = vrot.slane %v3074_v35, 1 }
0x1571   : > { %v3076_v17 = vadd.f32 %v3075_v20, %v3074_v35 }
0x1573   : > { %v3111_v8 = vsel %vm3106_vm2, %v3076_v17, %v3110_v60 }
0x1574   : > { %3112 = vst [vmem:[%s4852_s29] sm:$0x1] %v3111_v8 }
0x1575   : > { %3702 = shalt.err (!%p3699_p7)
}
0x1576   : > { %s3703_s29 = scalar_lea.hbm %s5195_s20, 16  ;;  %s3707_s27 = scalar_lea.hbm %s5243_s10, 32 }
0x1577   : > { %p3704_p8 = scmp.ne.s32.totalorder %s5195_s20, %s3703_s29  ;;  %p3708_p11 = scmp.lt.s32.totalorder %s5195_s20, %s5243_s10 }
0x1578   : > { %p3709_p12 = scmp.lt.s32.totalorder %s3707_s27, %s3703_s29 }
0x1579   : > { %p3705_p9 = pnand %p3704_p8, %p3863_p5 }
0x157a   : > { %p3710_p13 = por %p3709_p12, %p3708_p11 }
0x157b   : > { %p3706_p10 = pneg %p3705_p9 }
0x157d   : > { %p3711_p0 = pnand %p3710_p13, %p3706_p10 }
0x157f   : > { %3714 = shalt.err (!%p3711_p0)
}
0x1580   : > { %3495 = dma.vmem_to_hbm [thread:$0]  (%p3863_p5), %s3127_s28, 16, %s5195_s20, %s3114_s22  }
0x1581 PF: > { %p3501_p1 = scmp.ge.s32.totalorder %s3753_s16, 2  ;;  %s3138_s21 = sand.u32 1, %s3741_s13  }
0x1582   : > { %s3139_s17 = scalar_lea.sflag [#allocation7], %s3138_s21 }
0x1583   : > { %p3498_p2 = pnand %p3501_p1, %p3867_p6 }
0x1585   : > { %p3499_p3 = pneg %p3498_p2 }
0x1587   : > { %3736 = dma.done.wait (%p3499_p3), %s3139_s17, 16  }
0x1588   : > { %3738 = vsyncadd (%p3499_p3), %s3139_s17, 4294967280  ;;  %s5341_s25 = sld [smem:[#allocation9_spill]]  ;;  %p20_p4 = scmp.ge.s32.totalorder %s3850_s19, 4  }
0x1589   : > { %s5342_s13 = smov %s3745_s14  ;;  %s5343_s14 = smov %s3749_s15 }
0x158a   : > { %s5345_s16 = smov %s3850_s19  ;;  %22 = sbr.rel (!%p20_p4) target bundleno = 3 (0x3), region = 132 }
0x158e   : > { %s5344_s15 = smov %s5341_s25 }
0x158f   :  { %3143 = vsyncpa [#allocation7], 1 }
0x1590   :  { %3145 = vsyncpa [#allocation7 + $0x1], 1 }

</bundles_post_ra>
